<compile_context>
chip_gen: v6e
topology: v6e:2x2x1
jax: 0.10.0
libtpu: 0.0.40
codegen_flags: <defaults>
</compile_context>

<pallas_src>
import functools
import math

import jax
import jax.numpy as jnp
from jax.experimental import pallas as pl
from jax.experimental.pallas import tpu as pltpu


# ----------------------------- Pallas kernel ------------------------------ #
def _unit_gcn_kernel(NS, IC, OUT, T, V, KSA, PADSA,
                     x_ref, wbig_ref, biasp_ref, pa_ref, rows_ref,
                     wsa_ref, bandta_ref, w1_ref, w2_ref, small_ref,
                     o_ref):
    f32 = jnp.float32
    hi = jax.lax.Precision.HIGHEST
    dot = functools.partial(jnp.dot, precision=hi, preferred_element_type=f32)
    dg = functools.partial(jax.lax.dot_general, precision=hi,
                           preferred_element_type=f32)

    x = x_ref[0]                                    # (V, C*T) lane-dense input

    # one fused matmul: [conv_d_0..2 | down | conv_a_0 conv_b_0 | ... ]
    P = dot(x, wbig_ref[...]) + biasp_ref[...]      # (V, (NS+1)*OUT*T + 2*NS*IC*T)

    dT = OUT * T
    abw = IC * T
    ab0 = (NS + 1) * dT

    alpha = small_ref[0:1, 0:1]                     # (1,1) scalars
    bsa = small_ref[0:1, 1:2]
    bta = small_ref[0:1, 2:3]

    # ---- adaptive graph convolution (conv_d applied before the V-mixing) ----
    # (the 1/(IC*T) normalisation is already folded into conv_a/conv_b weights)
    acc = jnp.zeros((V, dT), dtype=f32)
    for i in range(NS):                             # static unroll (NS=3)
        d_i = P[:, i * dT:(i + 1) * dT]             # (V, OUT*T)  == conv_d_i(x)
        a_i = P[:, ab0 + 2 * i * abw: ab0 + (2 * i + 1) * abw]        # (V, IC*T)
        b_i = P[:, ab0 + (2 * i + 1) * abw: ab0 + (2 * i + 2) * abw]  # (V, IC*T)
        # g[v,w] = sum_k a[v,k] b[w,k]   (no explicit transpose)
        g = jnp.tanh(dg(a_i, b_i, (((1,), (1,)), ((), ()))))          # (V, V)
        adj = pa_ref[i] + alpha * g                 # PA[i] + alpha * tanh(...)
        # acc[w, o*T+t] += sum_v adj[v,w] d_i[v, o*T+t]
        acc = acc + dg(adj, d_i, (((0,), (0,)), ((), ())))            # (V, OUT*T)

    # ---- BatchNorm2d (eval-mode fold), residual down path, ReLU ----
    # TODO(synk): BatchNorm2d is folded in eval mode (running_mean=0,
    # running_var=1); training-mode batch statistics are not implemented.
    down = P[:, NS * dT:(NS + 1) * dT]              # (V, OUT*T)
    y = jnp.maximum(acc * rows_ref[0:1, :] + down + rows_ref[1:2, :], 0.0)

    # ---- spatial attention: Conv1d over V, fused into one lane-dense matmul
    # D[v,k] = sum_{o,t} y[v, o*T+t] * w_sa[o,k]/T ; then banded diagonal sum.
    D = dot(y, wsa_ref[...])                        # (V, KSA)
    zpad = jnp.zeros((PADSA, KSA), dtype=f32)
    Dp = jnp.concatenate([zpad, D, zpad], axis=0)   # (V + 2*PADSA, KSA)
    s = jnp.zeros((V, 1), dtype=f32) + bsa
    for k in range(KSA):                            # static, cheap column adds
        s = s + Dp[k:k + V, k:k + 1]
    y = y * jax.nn.sigmoid(s) + y                   # per-joint gate (column)

    # ---- temporal attention: Conv1d over T, band pre-tiled over channels ----
    se_t = jnp.mean(y, axis=0, keepdims=True)       # (1, OUT*T) mean over V
    t1 = jax.nn.sigmoid(dot(se_t, bandta_ref[...]) + bta)             # (1, OUT*T)
    y = y * t1 + y

    # ---- channel attention: squeeze-excite MLP (T-mean folded into fc1) ----
    se_c = jnp.mean(y, axis=0, keepdims=True)       # (1, OUT*T)
    h = jnp.maximum(dot(se_c, w1_ref[...]) + small_ref[:, 8:], 0.0)   # (1, OUT//2)
    c1 = jax.nn.sigmoid(dot(h, w2_ref[...]) + rows_ref[2:3, :])       # (1, OUT*T)
    y = y * c1 + y

    o_ref[0] = y                                    # lane-dense (V, OUT*T) store


# ------------------------------ JAX wrapper -------------------------------- #
def unit_gcn_forward(x, kp):
    N, C, T, V = x.shape
    NS, IC, OUT, KSA, PADSA = kp['dims']

    x_v = x.transpose(0, 3, 1, 2).reshape(N, V, C * T)      # (N, V, C*T)

    order = ['wbig', 'biasp', 'pa', 'rows', 'wsa', 'bandta', 'w1big', 'w2t',
             'smalls']
    args = [kp[k] for k in order]

    def const_spec(a):
        nd = a.ndim
        return pl.BlockSpec(a.shape, lambda n, _nd=nd: (0,) * _nd)

    kernel = functools.partial(_unit_gcn_kernel, NS, IC, OUT, T, V, KSA, PADSA)
    y_v = pl.pallas_call(
        kernel,
        out_shape=jax.ShapeDtypeStruct((N, V, OUT * T), jnp.float32),
        grid=(N,),
        in_specs=[pl.BlockSpec((1, V, C * T), lambda n: (n, 0, 0))]
                 + [const_spec(a) for a in args],
        out_specs=pl.BlockSpec((1, V, OUT * T), lambda n: (n, 0, 0)),
        compiler_params=pltpu.CompilerParams(dimension_semantics=("parallel",)),
    )(x_v, *args)
    return y_v.reshape(N, V, OUT, T).transpose(0, 2, 3, 1)   # (N, OUT, T, V)


# ----------------------- parameter init & lifting -------------------------- #
def make_raw_params(key, C, OUT, V, NS=3, coff=4):
    IC = OUT // coff
    ks = iter(jax.random.split(key, 12))
    f32 = jnp.float32
    nrm = lambda k, shape, std: (std * jax.random.normal(k, shape)).astype(f32)

    K_sa = V - 1 if V % 2 == 0 else V
    pad_sa = (K_sa - 1) // 2
    K_ta, pad_ta = 9, 4

    p = dict(
        wa=nrm(next(ks), (NS, IC, C), math.sqrt(2.0 / IC)),
        ba=jnp.zeros((NS, IC), f32),
        wb=nrm(next(ks), (NS, IC, C), math.sqrt(2.0 / IC)),
        bb=jnp.zeros((NS, IC), f32),
        wd=nrm(next(ks), (NS, OUT, C), math.sqrt(2.0 / (OUT * NS))),
        bd=jnp.zeros((NS, OUT), f32),
        pa=(jax.random.uniform(next(ks), (NS, V, V)) / V).astype(f32),
        alpha=jnp.float32(0.1),
        bn_gamma=jnp.full((OUT,), 1e-6, f32),
        bn_beta=jnp.zeros((OUT,), f32),
        # TODO(synk): only the in_channels != out_channels down path (conv+BN)
        # is implemented; the identity down path is not exercised here.
        w_down=nrm(next(ks), (OUT, C), math.sqrt(2.0 / OUT)),
        b_down=jnp.zeros((OUT,), f32),
        down_bn_gamma=jnp.ones((OUT,), f32),
        down_bn_beta=jnp.zeros((OUT,), f32),
        w_sa=nrm(next(ks), (1, OUT, K_sa), math.sqrt(2.0 / ((OUT + 1) * K_sa))),
        b_sa=jnp.zeros((1,), f32),
        # conv_ta / fc2c are zero-initialised by the module; use small random
        # values so these compute paths are actually exercised.
        w_ta=nrm(next(ks), (1, OUT, K_ta), 0.05),
        b_ta=jnp.zeros((1,), f32),
        w1=nrm(next(ks), (OUT // 2, OUT), math.sqrt(2.0 / OUT)),
        b1=jnp.zeros((OUT // 2,), f32),
        w2=nrm(next(ks), (OUT, OUT // 2), 0.05),
        b2=jnp.zeros((OUT,), f32),
    )
    p['pad_sa'], p['pad_ta'] = pad_sa, pad_ta
    return p


def _band(w_ck, L, pad):
    # w_ck: (Cin, K) -> B (Cin, L, L) with B[c, u, v] = w_ck[c, u - v + pad]
    Cin, K = w_ck.shape
    k = jnp.arange(L)[:, None] - jnp.arange(L)[None, :] + pad
    valid = ((k >= 0) & (k < K)).astype(w_ck.dtype)
    return w_ck[:, jnp.clip(k, 0, K - 1)] * valid[None]


def derive_kernel_params(p, T, V):
    f32 = jnp.float32
    NS, IC, C = p['wa'].shape
    OUT = p['wd'].shape[1]
    H = OUT // 2
    eps = 1e-5
    eyeT = jnp.eye(T, dtype=f32)
    KSA = p['w_sa'].shape[-1]
    PADSA = p['pad_sa']
    PADTA = p['pad_ta']

    rep = lambda v: jnp.repeat(v, T)                 # per-channel -> per-(o,t)
    kT = lambda w: jnp.kron(w.T, eyeT)               # (O,I) -> (I*T, O*T)

    bn_s = p['bn_gamma'] / jnp.sqrt(1.0 + eps)       # eval-mode BN fold
    d_s = p['down_bn_gamma'] / jnp.sqrt(1.0 + eps)
    w_down_eff = p['w_down'] * d_s[:, None]
    b_down_eff = p['b_down'] * d_s + p['down_bn_beta']

    # Fold the 1/(IC*T) adjacency-embedding normalisation symmetrically into
    # conv_a / conv_b weights+biases (constant fold -> no in-kernel scale mul).
    sc = 1.0 / math.sqrt(float(IC * T))
    wa_eff = p['wa'] * sc
    wb_eff = p['wb'] * sc
    ba_eff = p['ba'] * sc
    bb_eff = p['bb'] * sc

    # packed weight slab: [wd_0..2 | down | wa_0 wb_0 | wa_1 wb_1 | wa_2 wb_2]
    wbig = jnp.concatenate(
        [kT(p['wd'][i]) for i in range(NS)] + [kT(w_down_eff)]
        + sum([[kT(wa_eff[i]), kT(wb_eff[i])] for i in range(NS)], []),
        axis=1)                                      # (C*T, 704)

    biasp = jnp.concatenate(
        [jnp.zeros(((NS + 1) * OUT * T,), f32)]
        + sum([[rep(ba_eff[i]), rep(bb_eff[i])] for i in range(NS)], []),
        axis=0)[None, :]                             # (1, 704)

    bias_row = rep(jnp.sum(p['bd'], axis=0) * bn_s + p['bn_beta'] + b_down_eff)
    rows = jnp.stack([rep(bn_s), bias_row, rep(p['b2'])], axis=0)     # (3, OUT*T)

    wsa = jnp.repeat(p['w_sa'][0], T, axis=0) / T    # (OUT*T, KSA), T-mean folded

    band_ta = _band(p['w_ta'][0], T, PADTA)          # (OUT, T, T)
    bandta = jnp.tile(band_ta.reshape(OUT * T, T), (1, OUT))          # (OUT*T, OUT*T)

    w1big = jnp.repeat(p['w1'].T, T, axis=0) / T     # (OUT*T, H), T-mean folded
    w2t = jnp.repeat(p['w2'], T, axis=0).T           # (H, OUT*T), tiled over t

    smalls = jnp.zeros((1, 8 + H), f32)
    smalls = smalls.at[0, 0].set(p['alpha'])
    smalls = smalls.at[0, 1].set(p['b_sa'][0])
    smalls = smalls.at[0, 2].set(p['b_ta'][0])
    smalls = smalls.at[0, 8:].set(p['b1'])

    return dict(wbig=wbig, biasp=biasp, pa=p['pa'], rows=rows, wsa=wsa,
                bandta=bandta, w1big=w1big, w2t=w2t, smalls=smalls,
                dims=(NS, IC, OUT, KSA, PADSA))


# ----------------------- pure-JAX reference (NCHW) ------------------------- #
def reference_forward(x, p):
    N, C, T, V = x.shape
    NS, IC, _ = p['wa'].shape
    OUT = p['wd'].shape[1]
    hi = jax.lax.Precision.HIGHEST
    eps = 1e-5

    def conv1x1(w, b, inp):
        return jnp.einsum('oc,nctv->notv', w, inp, precision=hi) + b[None, :, None, None]

    y = None
    for i in range(NS):
        a = conv1x1(p['wa'][i], p['ba'][i], x)
        b = conv1x1(p['wb'][i], p['bb'][i], x)
        A1 = a.transpose(0, 3, 1, 2).reshape(N, V, IC * T)
        A2 = b.reshape(N, IC * T, V)
        g = jnp.tanh(jnp.einsum('nvk,nkw->nvw', A1, A2, precision=hi) / (IC * T))
        adj = p['pa'][i][None] + g * p['alpha']
        m = jnp.einsum('nkv,nvw->nkw', x.reshape(N, C * T, V), adj,
                       precision=hi).reshape(N, C, T, V)
        z = conv1x1(p['wd'][i], p['bd'][i], m)
        y = z if y is None else y + z

    y = y * (p['bn_gamma'] / jnp.sqrt(1.0 + eps))[None, :, None, None] \
        + p['bn_beta'][None, :, None, None]
    down = conv1x1(p['w_down'], p['b_down'], x)
    down = down * (p['down_bn_gamma'] / jnp.sqrt(1.0 + eps))[None, :, None, None] \
        + p['down_bn_beta'][None, :, None, None]
    y = jax.nn.relu(y + down)

    def conv1d(se, w, b, pad):                       # se: (N, Cin, L), w: (1, Cin, K)
        K, L = w.shape[-1], se.shape[-1]
        se_p = jnp.pad(se, ((0, 0), (0, 0), (pad, pad)))
        out = jnp.zeros((N, 1, L), se.dtype)
        for k in range(K):
            out = out + jnp.einsum('c,ncl->nl', w[0, :, k],
                                   se_p[:, :, k:k + L], precision=hi)[:, None, :]
        return out + b[None, :, None]

    se = y.mean(-2)
    s1 = jax.nn.sigmoid(conv1d(se, p['w_sa'], p['b_sa'], p['pad_sa']))
    y = y * s1[:, :, None, :] + y
    se = y.mean(-1)
    t1 = jax.nn.sigmoid(conv1d(se, p['w_ta'], p['b_ta'], p['pad_ta']))
    y = y * t1[:, :, :, None] + y
    se = y.mean(-1).mean(-1)
    h = jax.nn.relu(se @ p['w1'].T + p['b1'][None])
    c = jax.nn.sigmoid(h @ p['w2'].T + p['b2'][None])
    y = y * c[:, :, None, None] + y
    return y


# ---------------------------------- main ----------------------------------- #
if __name__ == "__main__":
    # in_channels=4, out_channels=16, T=8 frames, V=16 joints, batch=2
    N, C, OUT, T, V = 2, 4, 16, 8, 16
    key = jax.random.PRNGKey(0)
    kx, kp = jax.random.split(key)
    x = jax.random.normal(kx, (N, C, T, V), dtype=jnp.float32)

    raw = make_raw_params(kp, C, OUT, V)
    kparams = derive_kernel_params(raw, T, V)

    y = jax.block_until_ready(unit_gcn_forward(x, kparams))
    y_ref = reference_forward(x, raw)

    assert y.shape == (N, OUT, T, V)
    err = float(jnp.max(jnp.abs(y - y_ref)))
    assert err < 1e-3, f"max abs error {err}"
    print("KERNEL_OK")
</pallas_src>

<mosaic_0001>
module attributes {stable_mosaic.version = 11 : i64} {
  func.func @_unit_gcn_kernel(%arg0: i32, %arg1: memref<1x16x32xf32, #tpu.memory_space<vmem>>, %arg2: memref<32x704xf32, #tpu.memory_space<vmem>>, %arg3: memref<1x704xf32, #tpu.memory_space<vmem>>, %arg4: memref<3x16x16xf32, #tpu.memory_space<vmem>>, %arg5: memref<3x128xf32, #tpu.memory_space<vmem>>, %arg6: memref<128x15xf32, #tpu.memory_space<vmem>>, %arg7: memref<128x128xf32, #tpu.memory_space<vmem>>, %arg8: memref<128x8xf32, #tpu.memory_space<vmem>>, %arg9: memref<8x128xf32, #tpu.memory_space<vmem>>, %arg10: memref<1x16xf32, #tpu.memory_space<vmem>>, %arg11: memref<1x16x128xf32, #tpu.memory_space<vmem>>) attributes {dimension_semantics = [#tpu.dimension_semantics<parallel>], iteration_bounds = array<i64: 2>, scalar_prefetch = 0 : i64, scratch_operands = 0 : i64, tpu.core_type = #tpu.core_type<tc>, window_params = [{transform_indices = @transform_0, window_bounds = array<i64: 1, 16, 32>}, {pipeline_mode = #tpu.pipeline_mode<synchronous>, transform_indices = @transform_1, window_bounds = array<i64: 32, 704>}, {pipeline_mode = #tpu.pipeline_mode<synchronous>, transform_indices = @transform_2, window_bounds = array<i64: 1, 704>}, {pipeline_mode = #tpu.pipeline_mode<synchronous>, transform_indices = @transform_3, window_bounds = array<i64: 3, 16, 16>}, {pipeline_mode = #tpu.pipeline_mode<synchronous>, transform_indices = @transform_4, window_bounds = array<i64: 3, 128>}, {pipeline_mode = #tpu.pipeline_mode<synchronous>, transform_indices = @transform_5, window_bounds = array<i64: 128, 15>}, {pipeline_mode = #tpu.pipeline_mode<synchronous>, transform_indices = @transform_6, window_bounds = array<i64: 128, 128>}, {pipeline_mode = #tpu.pipeline_mode<synchronous>, transform_indices = @transform_7, window_bounds = array<i64: 128, 8>}, {pipeline_mode = #tpu.pipeline_mode<synchronous>, transform_indices = @transform_8, window_bounds = array<i64: 8, 128>}, {pipeline_mode = #tpu.pipeline_mode<synchronous>, transform_indices = @transform_9, window_bounds = array<i64: 1, 16>}, {transform_indices = @transform_10, window_bounds = array<i64: 1, 16, 128>}]} {
    %c0 = arith.constant 0 : index
    %c0_0 = arith.constant 0 : index
    %c0_1 = arith.constant 0 : index
    %0 = vector.load %arg1[%c0, %c0_0, %c0_1] : memref<1x16x32xf32, #tpu.memory_space<vmem>>, vector<1x16x32xf32>
    %1 = vector.shape_cast %0 : vector<1x16x32xf32> to vector<16x32xf32>
    %c0_2 = arith.constant 0 : index
    %c0_3 = arith.constant 0 : index
    %2 = vector.load %arg2[%c0_2, %c0_3] : memref<32x704xf32, #tpu.memory_space<vmem>>, vector<32x704xf32>
    %cst = arith.constant dense<0.000000e+00> : vector<16x704xf32>
    %3 = tpu.matmul %1, %2, %cst {dimension_numbers = #tpu.dot_dimension_numbers<[1], [0], [0], [1], [0, 0, 1, 1], [], []>, precision = #tpu.contract_precision<fp32>} : vector<16x32xf32>, vector<32x704xf32>, vector<16x704xf32> -> vector<16x704xf32>
    %c0_4 = arith.constant 0 : index
    %c0_5 = arith.constant 0 : index
    %4 = vector.load %arg3[%c0_4, %c0_5] : memref<1x704xf32, #tpu.memory_space<vmem>>, vector<1x704xf32>
    %5 = vector.broadcast %4 : vector<1x704xf32> to vector<16x704xf32>
    %6 = arith.addf %3, %5 : vector<16x704xf32>
    %c0_6 = arith.constant 0 : index
    %c0_7 = arith.constant 0 : index
    %7 = vector.load %arg10[%c0_6, %c0_7] : memref<1x16xf32, #tpu.memory_space<vmem>>, vector<1x1xf32>
    %c0_8 = arith.constant 0 : index
    %c1 = arith.constant 1 : index
    %8 = vector.load %arg10[%c0_8, %c1] : memref<1x16xf32, #tpu.memory_space<vmem>>, vector<1x1xf32>
    %c0_9 = arith.constant 0 : index
    %c2 = arith.constant 2 : index
    %9 = vector.load %arg10[%c0_9, %c2] : memref<1x16xf32, #tpu.memory_space<vmem>>, vector<1x1xf32>
    %cst_10 = arith.constant 0.000000e+00 : f32
    %10 = vector.broadcast %cst_10 : f32 to vector<16x128xf32>
    %11 = vector.extract_strided_slice %6 {offsets = [0, 0], sizes = [16, 128], strides = [1, 1]} : vector<16x704xf32> to vector<16x128xf32>
    %12 = vector.extract_strided_slice %6 {offsets = [0, 512], sizes = [16, 32], strides = [1, 1]} : vector<16x704xf32> to vector<16x32xf32>
    %13 = vector.extract_strided_slice %6 {offsets = [0, 544], sizes = [16, 32], strides = [1, 1]} : vector<16x704xf32> to vector<16x32xf32>
    %cst_11 = arith.constant dense<0.000000e+00> : vector<16x16xf32>
    %14 = tpu.matmul %12, %13, %cst_11 {dimension_numbers = #tpu.dot_dimension_numbers<[1], [1], [0], [0], [0, 0, 1, 0], [], []>, precision = #tpu.contract_precision<fp32>} : vector<16x32xf32>, vector<16x32xf32>, vector<16x16xf32> -> vector<16x16xf32>
    %15 = math.tanh %14 : vector<16x16xf32>
    %c0_12 = arith.constant 0 : index
    %c0_13 = arith.constant 0 : index
    %c0_14 = arith.constant 0 : index
    %16 = vector.load %arg4[%c0_12, %c0_13, %c0_14] : memref<3x16x16xf32, #tpu.memory_space<vmem>>, vector<1x16x16xf32>
    %17 = vector.shape_cast %16 : vector<1x16x16xf32> to vector<16x16xf32>
    %18 = vector.broadcast %7 : vector<1x1xf32> to vector<16x16xf32>
    %19 = arith.mulf %18, %15 : vector<16x16xf32>
    %20 = arith.addf %17, %19 : vector<16x16xf32>
    %cst_15 = arith.constant dense<0.000000e+00> : vector<16x128xf32>
    %21 = tpu.matmul %20, %11, %cst_15 {dimension_numbers = #tpu.dot_dimension_numbers<[0], [0], [1], [1], [0, 1, 1, 1], [], []>, precision = #tpu.contract_precision<fp32>} : vector<16x16xf32>, vector<16x128xf32>, vector<16x128xf32> -> vector<16x128xf32>
    %22 = arith.addf %10, %21 : vector<16x128xf32>
    %23 = vector.extract_strided_slice %6 {offsets = [0, 128], sizes = [16, 128], strides = [1, 1]} : vector<16x704xf32> to vector<16x128xf32>
    %24 = vector.extract_strided_slice %6 {offsets = [0, 576], sizes = [16, 32], strides = [1, 1]} : vector<16x704xf32> to vector<16x32xf32>
    %25 = vector.extract_strided_slice %6 {offsets = [0, 608], sizes = [16, 32], strides = [1, 1]} : vector<16x704xf32> to vector<16x32xf32>
    %cst_16 = arith.constant dense<0.000000e+00> : vector<16x16xf32>
    %26 = tpu.matmul %24, %25, %cst_16 {dimension_numbers = #tpu.dot_dimension_numbers<[1], [1], [0], [0], [0, 0, 1, 0], [], []>, precision = #tpu.contract_precision<fp32>} : vector<16x32xf32>, vector<16x32xf32>, vector<16x16xf32> -> vector<16x16xf32>
    %27 = math.tanh %26 : vector<16x16xf32>
    %c1_17 = arith.constant 1 : index
    %c0_18 = arith.constant 0 : index
    %c0_19 = arith.constant 0 : index
    %28 = vector.load %arg4[%c1_17, %c0_18, %c0_19] : memref<3x16x16xf32, #tpu.memory_space<vmem>>, vector<1x16x16xf32>
    %29 = vector.shape_cast %28 : vector<1x16x16xf32> to vector<16x16xf32>
    %30 = vector.broadcast %7 : vector<1x1xf32> to vector<16x16xf32>
    %31 = arith.mulf %30, %27 : vector<16x16xf32>
    %32 = arith.addf %29, %31 : vector<16x16xf32>
    %cst_20 = arith.constant dense<0.000000e+00> : vector<16x128xf32>
    %33 = tpu.matmul %32, %23, %cst_20 {dimension_numbers = #tpu.dot_dimension_numbers<[0], [0], [1], [1], [0, 1, 1, 1], [], []>, precision = #tpu.contract_precision<fp32>} : vector<16x16xf32>, vector<16x128xf32>, vector<16x128xf32> -> vector<16x128xf32>
    %34 = arith.addf %22, %33 : vector<16x128xf32>
    %35 = vector.extract_strided_slice %6 {offsets = [0, 256], sizes = [16, 128], strides = [1, 1]} : vector<16x704xf32> to vector<16x128xf32>
    %36 = vector.extract_strided_slice %6 {offsets = [0, 640], sizes = [16, 32], strides = [1, 1]} : vector<16x704xf32> to vector<16x32xf32>
    %37 = vector.extract_strided_slice %6 {offsets = [0, 672], sizes = [16, 32], strides = [1, 1]} : vector<16x704xf32> to vector<16x32xf32>
    %cst_21 = arith.constant dense<0.000000e+00> : vector<16x16xf32>
    %38 = tpu.matmul %36, %37, %cst_21 {dimension_numbers = #tpu.dot_dimension_numbers<[1], [1], [0], [0], [0, 0, 1, 0], [], []>, precision = #tpu.contract_precision<fp32>} : vector<16x32xf32>, vector<16x32xf32>, vector<16x16xf32> -> vector<16x16xf32>
    %39 = math.tanh %38 : vector<16x16xf32>
    %c2_22 = arith.constant 2 : index
    %c0_23 = arith.constant 0 : index
    %c0_24 = arith.constant 0 : index
    %40 = vector.load %arg4[%c2_22, %c0_23, %c0_24] : memref<3x16x16xf32, #tpu.memory_space<vmem>>, vector<1x16x16xf32>
    %41 = vector.shape_cast %40 : vector<1x16x16xf32> to vector<16x16xf32>
    %42 = vector.broadcast %7 : vector<1x1xf32> to vector<16x16xf32>
    %43 = arith.mulf %42, %39 : vector<16x16xf32>
    %44 = arith.addf %41, %43 : vector<16x16xf32>
    %cst_25 = arith.constant dense<0.000000e+00> : vector<16x128xf32>
    %45 = tpu.matmul %44, %35, %cst_25 {dimension_numbers = #tpu.dot_dimension_numbers<[0], [0], [1], [1], [0, 1, 1, 1], [], []>, precision = #tpu.contract_precision<fp32>} : vector<16x16xf32>, vector<16x128xf32>, vector<16x128xf32> -> vector<16x128xf32>
    %46 = arith.addf %34, %45 : vector<16x128xf32>
    %47 = vector.extract_strided_slice %6 {offsets = [0, 384], sizes = [16, 128], strides = [1, 1]} : vector<16x704xf32> to vector<16x128xf32>
    %c0_26 = arith.constant 0 : index
    %c0_27 = arith.constant 0 : index
    %48 = vector.load %arg5[%c0_26, %c0_27] : memref<3x128xf32, #tpu.memory_space<vmem>>, vector<1x128xf32>
    %49 = vector.broadcast %48 : vector<1x128xf32> to vector<16x128xf32>
    %50 = arith.mulf %46, %49 : vector<16x128xf32>
    %51 = arith.addf %50, %47 : vector<16x128xf32>
    %c1_28 = arith.constant 1 : index
    %c0_29 = arith.constant 0 : index
    %52 = vector.load %arg5[%c1_28, %c0_29] : memref<3x128xf32, #tpu.memory_space<vmem>>, vector<1x128xf32>
    %53 = vector.broadcast %52 : vector<1x128xf32> to vector<16x128xf32>
    %54 = arith.addf %51, %53 : vector<16x128xf32>
    %cst_30 = arith.constant 0.000000e+00 : f32
    %55 = vector.broadcast %cst_30 : f32 to vector<16x128xf32>
    %56 = arith.maximumf %54, %55 : vector<16x128xf32>
    %c0_31 = arith.constant 0 : index
    %c0_32 = arith.constant 0 : index
    %57 = vector.load %arg6[%c0_31, %c0_32] : memref<128x15xf32, #tpu.memory_space<vmem>>, vector<128x15xf32>
    %cst_33 = arith.constant dense<0.000000e+00> : vector<16x15xf32>
    %58 = tpu.matmul %56, %57, %cst_33 {dimension_numbers = #tpu.dot_dimension_numbers<[1], [0], [0], [1], [0, 0, 1, 1], [], []>, precision = #tpu.contract_precision<fp32>} : vector<16x128xf32>, vector<128x15xf32>, vector<16x15xf32> -> vector<16x15xf32>
    %cst_34 = arith.constant 0.000000e+00 : f32
    %59 = vector.broadcast %cst_34 : f32 to vector<7x15xf32>
    %60 = tpu.concatenate %59, %58, %59 in 0 : vector<7x15xf32>, vector<16x15xf32>, vector<7x15xf32> -> vector<30x15xf32>
    %cst_35 = arith.constant 0.000000e+00 : f32
    %61 = vector.broadcast %cst_35 : f32 to vector<16x1xf32>
    %62 = vector.broadcast %8 : vector<1x1xf32> to vector<16x1xf32>
    %63 = arith.addf %61, %62 : vector<16x1xf32>
    %64 = vector.extract_strided_slice %60 {offsets = [0, 0], sizes = [16, 1], strides = [1, 1]} : vector<30x15xf32> to vector<16x1xf32>
    %65 = arith.addf %63, %64 : vector<16x1xf32>
    %66 = vector.extract_strided_slice %60 {offsets = [1, 1], sizes = [16, 1], strides = [1, 1]} : vector<30x15xf32> to vector<16x1xf32>
    %67 = arith.addf %65, %66 : vector<16x1xf32>
    %68 = vector.extract_strided_slice %60 {offsets = [2, 2], sizes = [16, 1], strides = [1, 1]} : vector<30x15xf32> to vector<16x1xf32>
    %69 = arith.addf %67, %68 : vector<16x1xf32>
    %70 = vector.extract_strided_slice %60 {offsets = [3, 3], sizes = [16, 1], strides = [1, 1]} : vector<30x15xf32> to vector<16x1xf32>
    %71 = arith.addf %69, %70 : vector<16x1xf32>
    %72 = vector.extract_strided_slice %60 {offsets = [4, 4], sizes = [16, 1], strides = [1, 1]} : vector<30x15xf32> to vector<16x1xf32>
    %73 = arith.addf %71, %72 : vector<16x1xf32>
    %74 = vector.extract_strided_slice %60 {offsets = [5, 5], sizes = [16, 1], strides = [1, 1]} : vector<30x15xf32> to vector<16x1xf32>
    %75 = arith.addf %73, %74 : vector<16x1xf32>
    %76 = vector.extract_strided_slice %60 {offsets = [6, 6], sizes = [16, 1], strides = [1, 1]} : vector<30x15xf32> to vector<16x1xf32>
    %77 = arith.addf %75, %76 : vector<16x1xf32>
    %78 = vector.extract_strided_slice %60 {offsets = [7, 7], sizes = [16, 1], strides = [1, 1]} : vector<30x15xf32> to vector<16x1xf32>
    %79 = arith.addf %77, %78 : vector<16x1xf32>
    %80 = vector.extract_strided_slice %60 {offsets = [8, 8], sizes = [16, 1], strides = [1, 1]} : vector<30x15xf32> to vector<16x1xf32>
    %81 = arith.addf %79, %80 : vector<16x1xf32>
    %82 = vector.extract_strided_slice %60 {offsets = [9, 9], sizes = [16, 1], strides = [1, 1]} : vector<30x15xf32> to vector<16x1xf32>
    %83 = arith.addf %81, %82 : vector<16x1xf32>
    %84 = vector.extract_strided_slice %60 {offsets = [10, 10], sizes = [16, 1], strides = [1, 1]} : vector<30x15xf32> to vector<16x1xf32>
    %85 = arith.addf %83, %84 : vector<16x1xf32>
    %86 = vector.extract_strided_slice %60 {offsets = [11, 11], sizes = [16, 1], strides = [1, 1]} : vector<30x15xf32> to vector<16x1xf32>
    %87 = arith.addf %85, %86 : vector<16x1xf32>
    %88 = vector.extract_strided_slice %60 {offsets = [12, 12], sizes = [16, 1], strides = [1, 1]} : vector<30x15xf32> to vector<16x1xf32>
    %89 = arith.addf %87, %88 : vector<16x1xf32>
    %90 = vector.extract_strided_slice %60 {offsets = [13, 13], sizes = [16, 1], strides = [1, 1]} : vector<30x15xf32> to vector<16x1xf32>
    %91 = arith.addf %89, %90 : vector<16x1xf32>
    %92 = vector.extract_strided_slice %60 {offsets = [14, 14], sizes = [16, 1], strides = [1, 1]} : vector<30x15xf32> to vector<16x1xf32>
    %93 = arith.addf %91, %92 : vector<16x1xf32>
    %94 = arith.negf %93 : vector<16x1xf32>
    %95 = math.exp %94 : vector<16x1xf32>
    %cst_36 = arith.constant 1.000000e+00 : f32
    %96 = vector.broadcast %cst_36 : f32 to vector<16x1xf32>
    %97 = arith.addf %96, %95 : vector<16x1xf32>
    %98 = arith.divf %96, %97 : vector<16x1xf32>
    %99 = vector.broadcast %98 : vector<16x1xf32> to vector<16x128xf32>
    %100 = arith.mulf %56, %99 : vector<16x128xf32>
    %101 = arith.addf %100, %56 : vector<16x128xf32>
    %cst_37 = arith.constant dense<0.000000e+00> : vector<128xf32>
    %102 = vector.multi_reduction <add>, %101, %cst_37 [0] : vector<16x128xf32> to vector<128xf32>
    %103 = vector.shape_cast %102 : vector<128xf32> to vector<1x128xf32>
    %cst_38 = arith.constant 1.600000e+01 : f32
    %104 = vector.broadcast %cst_38 : f32 to vector<1x128xf32>
    %105 = arith.divf %103, %104 : vector<1x128xf32>
    %c0_39 = arith.constant 0 : index
    %c0_40 = arith.constant 0 : index
    %106 = vector.load %arg7[%c0_39, %c0_40] : memref<128x128xf32, #tpu.memory_space<vmem>>, vector<128x128xf32>
    %cst_41 = arith.constant dense<0.000000e+00> : vector<1x128xf32>
    %107 = tpu.matmul %105, %106, %cst_41 {dimension_numbers = #tpu.dot_dimension_numbers<[1], [0], [0], [1], [0, 0, 1, 1], [], []>, precision = #tpu.contract_precision<fp32>} : vector<1x128xf32>, vector<128x128xf32>, vector<1x128xf32> -> vector<1x128xf32>
    %108 = vector.broadcast %9 : vector<1x1xf32> to vector<1x128xf32>
    %109 = arith.addf %107, %108 : vector<1x128xf32>
    %110 = arith.negf %109 : vector<1x128xf32>
    %111 = math.exp %110 : vector<1x128xf32>
    %cst_42 = arith.constant 1.000000e+00 : f32
    %112 = vector.broadcast %cst_42 : f32 to vector<1x128xf32>
    %113 = arith.addf %112, %111 : vector<1x128xf32>
    %114 = arith.divf %112, %113 : vector<1x128xf32>
    %115 = vector.broadcast %114 : vector<1x128xf32> to vector<16x128xf32>
    %116 = arith.mulf %101, %115 : vector<16x128xf32>
    %117 = arith.addf %116, %101 : vector<16x128xf32>
    %cst_43 = arith.constant dense<0.000000e+00> : vector<128xf32>
    %118 = vector.multi_reduction <add>, %117, %cst_43 [0] : vector<16x128xf32> to vector<128xf32>
    %119 = vector.shape_cast %118 : vector<128xf32> to vector<1x128xf32>
    %cst_44 = arith.constant 1.600000e+01 : f32
    %120 = vector.broadcast %cst_44 : f32 to vector<1x128xf32>
    %121 = arith.divf %119, %120 : vector<1x128xf32>
    %c0_45 = arith.constant 0 : index
    %c0_46 = arith.constant 0 : index
    %122 = vector.load %arg8[%c0_45, %c0_46] : memref<128x8xf32, #tpu.memory_space<vmem>>, vector<128x8xf32>
    %cst_47 = arith.constant dense<0.000000e+00> : vector<1x8xf32>
    %123 = tpu.matmul %121, %122, %cst_47 {dimension_numbers = #tpu.dot_dimension_numbers<[1], [0], [0], [1], [0, 0, 1, 1], [], []>, precision = #tpu.contract_precision<fp32>} : vector<1x128xf32>, vector<128x8xf32>, vector<1x8xf32> -> vector<1x8xf32>
    %c0_48 = arith.constant 0 : index
    %c8 = arith.constant 8 : index
    %124 = vector.load %arg10[%c0_48, %c8] : memref<1x16xf32, #tpu.memory_space<vmem>>, vector<1x8xf32>
    %125 = arith.addf %123, %124 : vector<1x8xf32>
    %cst_49 = arith.constant 0.000000e+00 : f32
    %126 = vector.broadcast %cst_49 : f32 to vector<1x8xf32>
    %127 = arith.maximumf %125, %126 : vector<1x8xf32>
    %c0_50 = arith.constant 0 : index
    %c0_51 = arith.constant 0 : index
    %128 = vector.load %arg9[%c0_50, %c0_51] : memref<8x128xf32, #tpu.memory_space<vmem>>, vector<8x128xf32>
    %cst_52 = arith.constant dense<0.000000e+00> : vector<1x128xf32>
    %129 = tpu.matmul %127, %128, %cst_52 {dimension_numbers = #tpu.dot_dimension_numbers<[1], [0], [0], [1], [0, 0, 1, 1], [], []>, precision = #tpu.contract_precision<fp32>} : vector<1x8xf32>, vector<8x128xf32>, vector<1x128xf32> -> vector<1x128xf32>
    %c2_53 = arith.constant 2 : index
    %c0_54 = arith.constant 0 : index
    %130 = vector.load %arg5[%c2_53, %c0_54] : memref<3x128xf32, #tpu.memory_space<vmem>>, vector<1x128xf32>
    %131 = arith.addf %129, %130 : vector<1x128xf32>
    %132 = arith.negf %131 : vector<1x128xf32>
    %133 = math.exp %132 : vector<1x128xf32>
    %cst_55 = arith.constant 1.000000e+00 : f32
    %134 = vector.broadcast %cst_55 : f32 to vector<1x128xf32>
    %135 = arith.addf %134, %133 : vector<1x128xf32>
    %136 = arith.divf %134, %135 : vector<1x128xf32>
    %137 = vector.broadcast %136 : vector<1x128xf32> to vector<16x128xf32>
    %138 = arith.mulf %117, %137 : vector<16x128xf32>
    %139 = arith.addf %138, %117 : vector<16x128xf32>
    %c0_56 = arith.constant 0 : index
    %c0_57 = arith.constant 0 : index
    %c0_58 = arith.constant 0 : index
    %140 = vector.load %arg11[%c0_56, %c0_57, %c0_58] : memref<1x16x128xf32, #tpu.memory_space<vmem>>, vector<1x16x128xf32>
    %141 = vector.shape_cast %140 : vector<1x16x128xf32> to vector<16x128xf32>
    %142 = vector.shape_cast %139 : vector<16x128xf32> to vector<1x16x128xf32>
    tpu.vector_store %arg11[%c0_56, %c0_57, %c0_58], %142 {strides = array<i32>} : memref<1x16x128xf32, #tpu.memory_space<vmem>>, vector<1x16x128xf32>,
    return
  }
  func.func @transform_0(%arg0: i32) -> (i32, i32, i32) {
    %c0_i32 = arith.constant 0 : i32
    %c0_i32_0 = arith.constant 0 : i32
    %c0_i32_1 = arith.constant 0 : i32
    return %arg0, %c0_i32, %c0_i32_0 : i32, i32, i32
  }
  func.func @transform_1(%arg0: i32) -> (i32, i32) {
    %c0_i32 = arith.constant 0 : i32
    %c0_i32_0 = arith.constant 0 : i32
    %c0_i32_1 = arith.constant 0 : i32
    return %c0_i32, %c0_i32_0 : i32, i32
  }
  func.func @transform_2(%arg0: i32) -> (i32, i32) {
    %c0_i32 = arith.constant 0 : i32
    %c0_i32_0 = arith.constant 0 : i32
    %c0_i32_1 = arith.constant 0 : i32
    return %c0_i32, %c0_i32_0 : i32, i32
  }
  func.func @transform_3(%arg0: i32) -> (i32, i32, i32) {
    %c0_i32 = arith.constant 0 : i32
    %c0_i32_0 = arith.constant 0 : i32
    %c0_i32_1 = arith.constant 0 : i32
    %c0_i32_2 = arith.constant 0 : i32
    return %c0_i32, %c0_i32_0, %c0_i32_1 : i32, i32, i32
  }
  func.func @transform_4(%arg0: i32) -> (i32, i32) {
    %c0_i32 = arith.constant 0 : i32
    %c0_i32_0 = arith.constant 0 : i32
    %c0_i32_1 = arith.constant 0 : i32
    return %c0_i32, %c0_i32_0 : i32, i32
  }
  func.func @transform_5(%arg0: i32) -> (i32, i32) {
    %c0_i32 = arith.constant 0 : i32
    %c0_i32_0 = arith.constant 0 : i32
    %c0_i32_1 = arith.constant 0 : i32
    return %c0_i32, %c0_i32_0 : i32, i32
  }
  func.func @transform_6(%arg0: i32) -> (i32, i32) {
    %c0_i32 = arith.constant 0 : i32
    %c0_i32_0 = arith.constant 0 : i32
    %c0_i32_1 = arith.constant 0 : i32
    return %c0_i32, %c0_i32_0 : i32, i32
  }
  func.func @transform_7(%arg0: i32) -> (i32, i32) {
    %c0_i32 = arith.constant 0 : i32
    %c0_i32_0 = arith.constant 0 : i32
    %c0_i32_1 = arith.constant 0 : i32
    return %c0_i32, %c0_i32_0 : i32, i32
  }
  func.func @transform_8(%arg0: i32) -> (i32, i32) {
    %c0_i32 = arith.constant 0 : i32
    %c0_i32_0 = arith.constant 0 : i32
    %c0_i32_1 = arith.constant 0 : i32
    return %c0_i32, %c0_i32_0 : i32, i32
  }
  func.func @transform_9(%arg0: i32) -> (i32, i32) {
    %c0_i32 = arith.constant 0 : i32
    %c0_i32_0 = arith.constant 0 : i32
    %c0_i32_1 = arith.constant 0 : i32
    return %c0_i32, %c0_i32_0 : i32, i32
  }
  func.func @transform_10(%arg0: i32) -> (i32, i32, i32) {
    %c0_i32 = arith.constant 0 : i32
    %c0_i32_0 = arith.constant 0 : i32
    %c0_i32_1 = arith.constant 0 : i32
    return %arg0, %c0_i32, %c0_i32_0 : i32, i32, i32
  }
}

</mosaic_0001>

<bundles_post_ra>
// kernel: tpu_custom_call.1
= control target key start
LH: loop header
LB: loop body
LE: loop exit
PB: predicated region body
PF: predicated region fallthrough
CT: control target
= control target key end

     0   :  { %15 = vsyncpa [#allocation3], 0  ;;  %s12444_s0 = inlined_call_operand.vmem [shape: f32[2,16,32], index: 0, kind: input, shape index: {}]   ;;  %s12445_s1 = inlined_call_operand.vmem [shape: f32[32,704], index: 1, kind: input, shape index: {}]   ;;  %s12446_s2 = inlined_call_operand.hbm [shape: f32[1,704], index: 2, kind: input, shape index: {}]   ;;  %s12447_s3 = inlined_call_operand.vmem [shape: f32[3,16,16], index: 3, kind: input, shape index: {}]   ;;  %s12448_s4 = inlined_call_operand.hbm [shape: f32[3,128], index: 4, kind: input, shape index: {}]   ;;  %s12449_s5 = inlined_call_operand.vmem [shape: f32[128,15], index: 5, kind: input, shape index: {}]   ;;  %s12450_s6 = inlined_call_operand.hbm [shape: f32[128,128], index: 6, kind: input, shape index: {}]   ;;  %s12451_s7 = inlined_call_operand.vmem [shape: f32[128,8], index: 7, kind: input, shape index: {}]   ;;  %s12452_s8 = inlined_call_operand.vmem [shape: f32[8,128], index: 8, kind: input, shape index: {}]   ;;  %s12453_s9 = inlined_call_operand.vmem [shape: f32[1,16], index: 9, kind: input, shape index: {}]   ;;  %s12454_s10 = inlined_call_operand.hbm [shape: f32[2,16,128], index: 10, kind: output, shape index: {}]  }
   0x1   :  { %16 = vsyncpa [#allocation6], 0 }
   0x2   :  { %17 = vsyncpa [#allocation4], 0 }
   0x3   :  { %19 = vsyncpa [#allocation4 + $0x1], 0  ;;  %s10082_s13 = smov 0   ;;  %s10084_s14 = smov 0  }
   0x4   :  { %s10086_s15 = smov 0   ;;  %s10088_s16 = smov 0  }
   0x5 LB: > { %s10103_s17 = sadd.s32 4294967295, %s9995_s16   ;;  %s8308_s18 = sadd.s32 4294967294, %s9995_s16   ;;  %s9995_s16 = sphi %s10088_s16, %s12551_s16   ;;  %s9991_s15 = sphi %s10086_s15, %s12550_s15   ;;  %s9987_s14 = sphi %s10084_s14, %s12549_s14   ;;  %s9983_s13 = sphi %s10082_s13, %s12548_s13  }
   0x6   : > { %s10107_s19 = sadd.s32 1, %s9995_s16   ;;  %s247_s20 = sadd.s32 1, %s9991_s15 }
   0x7   : > { %s244_s21 = ssub.s32 %s9995_s16, %s10107_s19  ;;  %p257_p0 = scmp.ne.s32.totalorder %s9991_s15, %s9987_s14 }
   0x8   : > { %p245_p1 = scmp.eq.s32.totalorder %s244_s21, 0  ;;  %p258_p2 = scmp.eq.s32.totalorder %s10103_s17, 1 }
   0x9   : > { %p263_p3 = scmp.ne.s32.totalorder %s9987_s14, %s9983_s13  ;;  %p264_p4 = scmp.eq.s32.totalorder %s8308_s18, 1 }
   0xa   : > { %s10118_s22 = scalar_select %p245_p1, %s9991_s15, %s247_s20  }
   0xb   : > { %p10120_p5 = por %p258_p2, %p257_p0  ;;  %p10124_p6 = por %p264_p4, %p263_p3 }
   0xc   : > { %p8309_p7 = scmp.ge.s32.totalorder %s9995_s16, 1  ;;  %p271_p8 = scmp.lt.s32.totalorder %s9995_s16, 3 }
   0xd   : > { %s12498_s23 = scalar_select %p10120_p5, 1, 0 }
   0xe   : > { %s12499_s24 = scalar_select %p10124_p6, 1, 0 }
   0xf   : > { %p12455_p9 = scmp.eq.s32.totalorder %s10103_s17, 0  ;;  %p10131_p10 = pnand %p8309_p7, %p271_p8 }
  0x10   : > { %s9997_s26 = smov [#allocation5]   ;;  %s9998_s28 = smov [#allocation2]  }
  0x11   : > { %s12500_s25 = scalar_select %p10131_p10, 1, 0 }
  0x12   : > { %s301_s27 = sshll.u32 %s9997_s26, 4  ;;  %p9732_p11 = pneg %p10131_p10  ;;  %s302_s27 = int_to_ptr.vmem [resolvable:$true] %s301_s27 }
  0x13   : > { %s287_s29 = sshll.u32 %s9998_s28, 4  ;;  %s9999_s11 = smov [#allocation7]   ;;  %s288_s29 = int_to_ptr.vmem [resolvable:$true] %s287_s29 }
  0x14   : > { %p10139_p12 = pnand %p12455_p9, %p9732_p11  ;;  %s314_s12 = sshll.u32 %s9999_s11, 4  ;;  %s10143_s12 = int_to_ptr.vmem [resolvable:$true] %s314_s12 }
  0x15   : > { %s9860_s18 = scalar_lea.vmem %s302_s27, 64  ;;  %p9868_p3 = scmp.lt.s32.totalorder %s302_s27, %s302_s27 }
  0x16   : > { %p9851_p13 = pneg %p10139_p12  ;;  %p9861_p0 = scmp.ne.s32.totalorder %s302_s27, %s9860_s18 }
  0x17   : > { %p9869_p4 = scmp.lt.s32.totalorder %s9860_s18, %s9860_s18 }
  0x18   : > { %p9863_p1 = pnand %p9861_p0, %p9851_p13 }
  0x19   : > { %p9870_p7 = por %p9869_p4, %p9868_p3 }
  0x1a   : > { %p9864_p2 = pneg %p9863_p1 }
  0x1c   : > { %p9871_p8 = pnand %p9870_p7, %p9864_p2 }
  0x1e   : > { %9874 = shalt.err (!%p9871_p8)
}
  0x1f   : > { %9738 = dma.hbm_to_vmem [thread:$0]  (!%p10139_p12), %s12448_s4, 64, %s302_s27, [#allocation6]  }
  0x20   : > { %s9886_s26 = scalar_lea.vmem %s288_s29, 96  ;;  %p9894_p0 = scmp.lt.s32.totalorder %s288_s29, %s288_s29 }
  0x21   : > { %p9887_p11 = scmp.ne.s32.totalorder %s288_s29, %s9886_s26  ;;  %p9895_p1 = scmp.lt.s32.totalorder %s9886_s26, %s9886_s26 }
  0x23   : > { %p9889_p9 = pnand %p9887_p11, %p9851_p13  ;;  %p9896_p5 = por %p9895_p1, %p9894_p0 }
  0x25   : > { %p9890_p6 = pneg %p9889_p9 }
  0x27   : > { %p9897_p10 = pnand %p9896_p5, %p9890_p6 }
  0x29   : > { %9900 = shalt.err (!%p9897_p10)
}
  0x2a   : > { %9735 = dma.hbm_to_vmem [thread:$0]  (!%p10139_p12), %s12446_s2, 96, %s288_s29, [#allocation3]  }
  0x2b   : > { %s9912_s27 = scalar_lea.vmem %s10143_s12, 2048  ;;  %p9920_p4 = scmp.lt.s32.totalorder %s10143_s12, %s10143_s12 }
  0x2c   : > { %p9913_p2 = scmp.ne.s32.totalorder %s10143_s12, %s9912_s27  ;;  %p9921_p5 = scmp.lt.s32.totalorder %s9912_s27, %s9912_s27 }
  0x2e   : > { %p9915_p9 = pnand %p9913_p2, %p9851_p13  ;;  %p9922_p6 = por %p9921_p5, %p9920_p4 }
  0x30   : > { %p9916_p3 = pneg %p9915_p9 }
  0x32   : > { %p9923_p10 = pnand %p9922_p6, %p9916_p3 }
  0x34   : > { %9926 = shalt.err (!%p9923_p10)
}
  0x35   : > { %s10000_s18 = smov 128   ;;  %s10001_s20 = smov 8  }
  0x36   : > { %9741 = dma.hbm_to_vmem [thread:$0]  (!%p10139_p12), %s12450_s6, 2048, %s10143_s12, [#allocation6], %s10000_s18, %s10000_s18, %s10001_s20  }
  0x37   : > { %p12502_p7 = scmp.ne.s32.totalorder %s12500_s25, 0 }
  0x39   : > { %347 = sbr.rel (%p12502_p7) target bundleno = 3040 (0xbe0), region = 60 }
  0x3e   : > { %p12503_p13 = scmp.eq.s32.totalorder %s10103_s17, 0 }
  0x40   : > { %9970 = dma.done.wait (%p12503_p13), [#allocation3], 96   ;;  %p12504_p8 = pmov %p12503_p13 }
  0x42   : > { %9972 = vsyncadd (%p12504_p8), [#allocation3], 4294967200  ;;  %p12505_p11 = pmov %p12504_p8 }
  0x43   : > { %p12506_p0 = pmov %p12504_p8 }
  0x44   : > { %9974 = dma.done.wait (%p12505_p11), [#allocation6], 2112  }
  0x45   : > { %9976 = vsyncadd (%p12506_p0), [#allocation6], 4294965184  ;;  %p393_p1 = scmp.lt.s32.totalorder %s10103_s17, 1  ;;  %v12458_v0 = vmov 0.0   ;;  %v419_v1 = vld [vmem:[%s12445_s1 + $0x98] sm:$0xff]  ;;  %v418_v2 = vld [vmem:[%s12445_s1 + $0x90] sm:$0xff] }
  0x46   : > { %535 = vmatprep.mubr.f32.mxu0 %v12458_v0  ;;  %662 = vmatprep.mubr.f32.mxu1 %v12458_v0  ;;  %v413_v3 = vld [vmem:[%s12445_s1 + $0x68] sm:$0xff]  ;;  %vm456_vm0 = vcmask 261120   ;;  %v10202_v4 = vand.u32 4294901760, %v419_v1  ;;  %v10204_v5 = vand.u32 4294901760, %v418_v2  ;;  %v412_v7 = vld [vmem:[%s12445_s1 + $0x60] sm:$0xff]  ;;  %v407_v8 = vld [vmem:[%s12445_s1 + $0x38] sm:$0xff] }
  0x47   : > { %s394_s25 = scalar_select %p393_p1, %s10103_s17, 1  ;;  %v10206_v6 = vand.u32 4294901760, %v413_v3  ;;  %v406_v9 = vld [vmem:[%s12445_s1 + $0x30] sm:$0xff]  ;;  %v10217_v10 = vand.u32 4294901760, %v412_v7  ;;  %v10219_v11 = vand.u32 4294901760, %v407_v8  ;;  %v401_v13 = vld [vmem:[%s12445_s1 + $0x8] sm:$0xff] }
  0x48   : > { %v10221_v12 = vand.u32 4294901760, %v406_v9  ;;  %v400_v14 = vld [vmem:[%s12445_s1] sm:$0xff]  ;;  %488 = vmatprep.subr.mxu0 %v10202_v4  ;;  %v10230_v16 = vand.u32 4294901760, %v401_v13  ;;  %v10233_v17 = vsub.f32 %v419_v1, %v10202_v4  ;;  %v10238_v19 = vsub.f32 %v418_v2, %v10204_v5  ;;  %v421_v63 = vld [vmem:[%s12445_s1 + $0xa8] sm:$0xff]  ;;  %s10004_s26 = smov 32   ;;  %s10006_s30 = smov 64  }
  0x49   : > { %s8336_s29 = sshll.u32 %s394_s25, 4  ;;  %v10235_v18 = vand.u32 4294901760, %v400_v14  ;;  %490 = vmatpush1.msra.mxu0 %v10204_v5  ;;  %v10243_v22 = vsub.f32 %v413_v3, %v10206_v6  ;;  %v10246_v23 = vsub.f32 %v412_v7, %v10217_v10  ;;  %v10249_v24 = vsub.f32 %v407_v8, %v10219_v11  ;;  %v420_v1 = vld [vmem:[%s12445_s1 + $0xa0] sm:$0xff]  ;;  %v415_v3 = vld [vmem:[%s12445_s1 + $0x78] sm:$0xff]  ;;  %v414_v7 = vld [vmem:[%s12445_s1 + $0x70] sm:$0xff]  ;;  %s10007_s12 = smov 121  }
  0x4a   : > { %s397_s28 = scalar_lea.vmem %s12444_s0, %s8336_s29  ;;  %492 = vmatprep.subr.mxu0 %v10206_v6  ;;  %v584_v25 = vand.u32 4294901760, %v10233_v17  ;;  %v590_v26 = vand.u32 4294901760, %v10238_v19  ;;  %v10257_v28 = vsub.f32 %v406_v9, %v10221_v12  ;;  %v10302_v50 = vsub.f32 %v401_v13, %v10230_v16  ;;  %v409_v13 = vld [vmem:[%s12445_s1 + $0x48] sm:$0xff]  ;;  %s10008_s11 = smov 1  }
  0x4b   : > { %v398_v15 = vld [vmem:[%s397_s28] sm:$0xff]  ;;  %v399_v20 = vld [vmem:[%s397_s28 + $0x8] sm:$0xff]  ;;  %494 = vmatpush1.msra.mxu0 %v10217_v10  ;;  %v596_v29 = vand.u32 4294901760, %v10243_v22  ;;  %v602_v30 = vand.u32 4294901760, %v10246_v23  ;;  %v608_v31 = vand.u32 4294901760, %v10249_v24  ;;  %v10305_v51 = vsub.f32 %v400_v14, %v10235_v18  ;;  %s10005_s28 = smov 96  }
  0x4c   : > { %v458_v21 = vsel %vm456_vm0, %v398_v15, 0  ;;  %v461_v32 = vsel %vm456_vm0, %v399_v20, 0  ;;  %496 = vmatprep.subr.mxu0 %v10219_v11  ;;  %v585_v33 = vsub.f32 %v10233_v17, %v584_v25  ;;  %v591_v34 = vsub.f32 %v10238_v19, %v590_v26  ;;  %v408_v15 = vld [vmem:[%s12445_s1 + $0x40] sm:$0xff]  ;;  %s10009_s27 = smov 120   ;;  %s10010_s18 = smov 125  }
  0x4d   : > { %v10254_v27 = vand.u32 4294901760, %v458_v21  ;;  %v614_v36 = vand.u32 4294901760, %v10257_v28  ;;  %498 = vmatpush1.msra.mxu0 %v10221_v12  ;;  %v597_v37 = vsub.f32 %v10243_v22, %v596_v29  ;;  %v603_v38 = vsub.f32 %v10246_v23, %v602_v30  ;;  %s10011_s20 = smov 119   ;;  %s10012_s21 = smov 124  }
  0x4e   : > { %v609_v39 = vsub.f32 %v10249_v24, %v608_v31  ;;  %v10285_v40 = vand.u32 4294901760, %v461_v32  ;;  %500 = vmatprep.subr.mxu0 %v10230_v16  ;;  %v586_v41 = vand.u32 4294901760, %v585_v33  ;;  %v592_v42 = vand.u32 4294901760, %v591_v34  ;;  %s10015_s25 = smov 122   ;;  %s10016_s29 = smov 126  }
  0x4f   : > { %v10272_v35 = vsub.f32 %v458_v21, %v10254_v27  ;;  %v615_v44 = vsub.f32 %v10257_v28, %v614_v36  ;;  %502 = vmatpush1.msra.mxu0 %v10235_v18  ;;  %v598_v45 = vand.u32 4294901760, %v597_v37  ;;  %v604_v46 = vand.u32 4294901760, %v603_v38  ;;  %p12546_p2 = scmp.ne.s32.totalorder %s12498_s23, 0 }
  0x50   : > { %v10296_v47 = vsub.f32 %v461_v32, %v10285_v40  ;;  %587 = vmatprep.subr.mxu1 %v586_v41  ;;  %703 = vmatprep.subr.mxu0 %v10233_v17  ;;  %v610_v49 = vand.u32 4294901760, %v609_v39  ;;  %v620_v55 = vand.u32 4294901760, %v10302_v50  ;;  %v626_v56 = vand.u32 4294901760, %v10305_v51 }
  0x51   : > { %v10289_v43 = vand.u32 4294901760, %v10272_v35  ;;  %593 = vmatpush1.msra.mxu1 %v592_v42  ;;  %v616_v54 = vand.u32 4294901760, %v615_v44  ;;  %v10350_v2 = vand.u32 4294901760, %v421_v63  ;;  %v10364_v8 = vand.u32 4294901760, %v420_v1 }
  0x52   : > { %v10308_v52 = vand.u32 4294901760, %v10296_v47  ;;  %599 = vmatprep.subr.mxu1 %v598_v45  ;;  %v621_v58 = vsub.f32 %v10302_v50, %v620_v55  ;;  %v627_v59 = vsub.f32 %v10305_v51, %v626_v56  ;;  %v10368_v9 = vand.u32 4294901760, %v415_v3 }
  0x53   : > { %v539_v48 = vsub.f32 %v10272_v35, %v10289_v43  ;;  %605 = vmatpush1.msra.mxu1 %v604_v46  ;;  %v10376_v14 = vand.u32 4294901760, %v414_v7  ;;  %v10382_v17 = vsub.f32 %v421_v63, %v10350_v2  ;;  %v10393_v20 = vsub.f32 %v420_v1, %v10364_v8  ;;  %v411_v63 = vld [vmem:[%s12445_s1 + $0x58] sm:$0xff] }
  0x54   : > { %v550_v57 = vsub.f32 %v10296_v47, %v10308_v52  ;;  %611 = vmatprep.subr.mxu1 %v610_v49  ;;  %v622_v61 = vand.u32 4294901760, %v621_v58  ;;  %v628_v62 = vand.u32 4294901760, %v627_v59  ;;  %v10395_v21 = vand.u32 4294901760, %v409_v13  ;;  %v417_v58 = vld [vmem:[%s12445_s1 + $0x88] sm:$0xff]  ;;  %v416_v59 = vld [vmem:[%s12445_s1 + $0x80] sm:$0xff] }
  0x55   : > { %v10310_v53 = vand.u32 4294901760, %v539_v48  ;;  %617 = vmatpush1.msra.mxu1 %v616_v54  ;;  %v10544_v1 = vand.u32 4294901760, %v416_v59  ;;  %vm3332_vm1 = vcmask 130048   ;;  %vm6168_vm2 = vcmask 1046528  }
  0x56   : > { %v10325_v60 = vand.u32 4294901760, %v550_v57  ;;  %623 = vmatprep.subr.mxu1 %v622_v61  ;;  %vm6225_vm3 = vcmask 1043456   ;;  %vm6197_vm4 = vcmask 1045504   ;;  %vm6239_vm5 = vcmask 1042432  }
  0x57   : > { %541 = vmatmul.mubr.f32.vlgmr.msra.gmra.mxu0 %v10310_v53  ;;  %629 = vmatpush1.msra.mxu1 %v628_v62  ;;  %v10536_v62 = vand.u32 4294901760, %v417_v58  ;;  %vm6253_vm6 = vcmask 1041408   ;;  %vm6267_vm7 = vcmask 1040384   ;;  %vm6211_vm8 = vcmask 1044480  }
  0x58   : > { %706 = vmatpush1.msra.mxu0 %v10238_v19  ;;  %546 = vmatprep.mubr.f32.mxu0 %v12458_v0  ;;  %v403_v19 = vld [vmem:[%s12445_s1 + $0x18] sm:$0xff]  ;;  %vm10022_vm9 = vmmov 0   ;;  %vm7735_vm10 = vcmask 64512  }
  0x59   : > { %709 = vmatprep.subr.mxu0 %v10243_v22  ;;  %664 = vmatmul.mubr.f32.vlgmr.msra.gmra.mxu1 %v10254_v27  ;;  %v10400_v22 = vand.u32 4294901760, %v408_v15 }
  0x5a   : > { %712 = vmatpush1.msra.mxu0 %v10246_v23  ;;  %799 = vmatprep.subr.mxu1 %v10202_v4  ;;  %v402_v23 = vld [vmem:[%s12445_s1 + $0x10] sm:$0xff] }
  0x5b   : > { %552 = vmatmul.mubr.f32.gmra.mxu0 %v10325_v60  ;;  %715 = vmatprep.subr.mxu0 %v10249_v24  ;;  %v10406_v24 = vsub.f32 %v415_v3, %v10368_v9  ;;  %v410_v3 = vld [vmem:[%s12445_s1 + $0x50] sm:$0xff] }
  0x5c   : > { %718 = vmatpush1.msra.mxu0 %v10257_v28  ;;  %757 = vmatprep.mubr.f32.mxu0 %v12458_v0  ;;  %v1176_v28 = vand.u32 4294901760, %v10382_v17 }
  0x5d   : > { %721 = vmatprep.subr.mxu0 %v10302_v50  ;;  %801 = vmatpush1.msra.mxu1 %v10204_v5  ;;  %v1188_v32 = vand.u32 4294901760, %v10406_v24 }
  0x5e   : > { %724 = vmatpush1.msra.mxu0 %v10305_v51  ;;  %803 = vmatprep.subr.mxu1 %v10206_v6 }
  0x5f   : > { %760 = vmatmul.mubr.f32.vlgmr.msra.gmra.mxu0 %v10272_v35  ;;  %892 = vmatprep.subr.mxu0 %v584_v25  ;;  %v10412_v25 = vsub.f32 %v414_v7, %v10376_v14  ;;  %v1189_v37 = vsub.f32 %v10406_v24, %v1188_v32 }
  0x60   : > { %669 = vmatprep.mubr.f32.mxu1 %v12458_v0  ;;  %805 = vmatpush1.msra.mxu1 %v10217_v10 }
  0x61   : > { %896 = vmatpush1.msra.mxu0 %v590_v26  ;;  %671 = vmatmul.mubr.f32.gmra.mxu1 %v10285_v40  ;;  %v10414_v26 = vand.u32 4294901760, %v403_v19  ;;  %v1194_v33 = vand.u32 4294901760, %v10412_v25  ;;  %v1190_v44 = vand.u32 4294901760, %v1189_v37 }
  0x62   : > { %807 = vmatprep.subr.mxu1 %v10219_v11  ;;  %900 = vmatprep.subr.mxu0 %v596_v29  ;;  %v10422_v29 = vand.u32 4294901760, %v402_v23 }
  0x63   : > { %765 = vmatprep.mubr.f32.mxu0 %v12458_v0  ;;  %809 = vmatpush1.msra.mxu1 %v10221_v12  ;;  %v10441_v34 = vsub.f32 %v403_v19, %v10414_v26  ;;  %v1195_v39 = vsub.f32 %v10412_v25, %v1194_v33  ;;  %v10568_v19 = vand.u32 4294901760, %v410_v3 }
  0x64   : > { %904 = vmatpush1.msra.mxu0 %v602_v30  ;;  %811 = vmatprep.subr.mxu1 %v10230_v16  ;;  %v10426_v30 = vsub.f32 %v409_v13, %v10395_v21  ;;  %v405_v13 = vld [vmem:[%s12445_s1 + $0x28] sm:$0xff] }
  0x65   : > { %768 = vmatmul.mubr.f32.gmra.mxu0 %v10296_v47  ;;  %908 = vmatprep.subr.mxu0 %v608_v31  ;;  %v10431_v31 = vsub.f32 %v408_v15, %v10400_v22  ;;  %v1212_v41 = vand.u32 4294901760, %v10441_v34 }
  0x66   : > { %813 = vmatpush1.msra.mxu1 %v10235_v18  ;;  %846 = vmatprep.mubr.f32.mxu1 %v12458_v0 }
  0x67   : > { %912 = vmatpush1.msra.mxu0 %v614_v36  ;;  %850 = vmatmul.mubr.f32.vlgmr.msra.gmra.mxu1 %v10289_v43  ;;  %v1200_v36 = vand.u32 4294901760, %v10426_v30  ;;  %v1213_v46 = vsub.f32 %v10441_v34, %v1212_v41 }
  0x68   : > { %916 = vmatprep.subr.mxu0 %v620_v55  ;;  %993 = vmatprep.subr.mxu1 %v10202_v4  ;;  %v1182_v4 = vand.u32 4294901760, %v10393_v20  ;;  %v423_v55 = vld [vmem:[%s12445_s1 + $0xb8] sm:$0xff] }
  0x69   : > { %920 = vmatpush1.msra.mxu0 %v626_v56  ;;  %953 = vmatprep.mubr.f32.mxu0 %v12458_v0  ;;  %v1214_v51 = vand.u32 4294901760, %v1213_v46  ;;  %v422_v56 = vld [vmem:[%s12445_s1 + $0xb0] sm:$0xff]  ;;  %v10518_v57 = vand.u32 4294901760, %v423_v55 }
  0x6a   : > { %995 = vmatpush1.msra.mxu1 %v10204_v5  ;;  %955 = vmatmul.mubr.f32.vlgmr.msra.gmra.mxu0 %v10254_v27  ;;  %v1177_v5 = vsub.f32 %v10382_v17, %v1176_v28  ;;  %v10532_v61 = vand.u32 4294901760, %v422_v56 }
  0x6b   : > { %997 = vmatprep.subr.mxu1 %v10206_v6  ;;  %1080 = vmatprep.subr.mxu0 %v10350_v2  ;;  %v10448_v6 = vsub.f32 %v402_v23, %v10422_v29  ;;  %v10550_v7 = vsub.f32 %v423_v55, %v10518_v57  ;;  %v10574_v23 = vsub.f32 %v417_v58, %v10536_v62 }
  0x6c   : > { %855 = vmatprep.mubr.f32.mxu1 %v12458_v0  ;;  %999 = vmatpush1.msra.mxu1 %v10217_v10  ;;  %v1183_v10 = vsub.f32 %v10393_v20, %v1182_v4  ;;  %v1178_v38 = vand.u32 4294901760, %v1177_v5  ;;  %v10561_v15 = vsub.f32 %v422_v56, %v10532_v61 }
  0x6d   : > { %1082 = vmatpush1.msra.mxu0 %v10364_v8  ;;  %859 = vmatmul.mubr.f32.gmra.mxu1 %v10308_v52  ;;  %v1218_v42 = vand.u32 4294901760, %v10448_v6 }
  0x6e   : > { %1001 = vmatprep.subr.mxu1 %v10219_v11  ;;  %1084 = vmatprep.subr.mxu0 %v10368_v9  ;;  %v1206_v11 = vand.u32 4294901760, %v10431_v31 }
  0x6f   : > { %960 = vmatprep.mubr.f32.mxu0 %v12458_v0  ;;  %1003 = vmatpush1.msra.mxu1 %v10221_v12  ;;  %v1184_v12 = vand.u32 4294901760, %v1183_v10  ;;  %v1219_v49 = vsub.f32 %v10448_v6, %v1218_v42 }
  0x70   : > { %1086 = vmatpush1.msra.mxu0 %v10376_v14  ;;  %1005 = vmatprep.subr.mxu1 %v10230_v16  ;;  %v1201_v16 = vsub.f32 %v10426_v30, %v1200_v36  ;;  %v1207_v45 = vsub.f32 %v10431_v31, %v1206_v11 }
  0x71   : > { %962 = vmatmul.mubr.f32.gmra.mxu0 %v10285_v40  ;;  %1088 = vmatprep.subr.mxu0 %v10395_v21  ;;  %v1220_v54 = vand.u32 4294901760, %v1219_v49 }
  0x72   : > { %1007 = vmatpush1.msra.mxu1 %v10235_v18  ;;  %1040 = vmatprep.mubr.f32.mxu1 %v12458_v0  ;;  %v1196_v18 = vand.u32 4294901760, %v1195_v39  ;;  %v1202_v48 = vand.u32 4294901760, %v1201_v16  ;;  %v1208_v50 = vand.u32 4294901760, %v1207_v45 }
  0x73   : > { %1090 = vmatpush1.msra.mxu0 %v10400_v22  ;;  %1042 = vmatmul.mubr.f32.vlgmr.msra.gmra.mxu1 %v10254_v27 }
  0x74   : > { %1092 = vmatprep.subr.mxu0 %v10414_v26  ;;  %1179 = vmatprep.subr.mxu1 %v1178_v38 }
  0x75   : > { %1094 = vmatpush1.msra.mxu0 %v10422_v29  ;;  %1127 = vmatprep.mubr.f32.mxu0 %v12458_v0 }
  0x76   : > { %1185 = vmatpush1.msra.mxu1 %v1184_v12  ;;  %1133 = vmatmul.mubr.f32.vlgmr.msra.gmra.mxu0 %v10310_v53 }
  0x77   : > { %1191 = vmatprep.subr.mxu1 %v1190_v44  ;;  %1295 = vmatprep.subr.mxu0 %v10382_v17  ;;  %v10563_v17 = vand.u32 4294901760, %v411_v63 }
  0x78   : > { %1047 = vmatprep.mubr.f32.mxu1 %v12458_v0  ;;  %1197 = vmatpush1.msra.mxu1 %v1196_v18 }
  0x79   : > { %1298 = vmatpush1.msra.mxu0 %v10393_v20  ;;  %1049 = vmatmul.mubr.f32.gmra.mxu1 %v10285_v40  ;;  %v404_v20 = vld [vmem:[%s12445_s1 + $0x20] sm:$0xff] }
  0x7a   : > { %1203 = vmatprep.subr.mxu1 %v1202_v48  ;;  %1301 = vmatprep.subr.mxu0 %v10406_v24  ;;  %v10580_v24 = vsub.f32 %v416_v59, %v10544_v1 }
  0x7b   : > { %1138 = vmatprep.mubr.f32.mxu0 %v12458_v0  ;;  %1209 = vmatpush1.msra.mxu1 %v1208_v50 }
  0x7c   : > { %1304 = vmatpush1.msra.mxu0 %v10412_v25  ;;  %1215 = vmatprep.subr.mxu1 %v1214_v51  ;;  %v10582_v25 = vand.u32 4294901760, %v405_v13  ;;  %v1786_v5 = vand.u32 4294901760, %v10580_v24 }
  0x7d   : > { %1144 = vmatmul.mubr.f32.gmra.mxu0 %v10325_v60  ;;  %1307 = vmatprep.subr.mxu0 %v10426_v30  ;;  %v10594_v30 = vsub.f32 %v411_v63, %v10563_v17 }
  0x7e   : > { %1221 = vmatpush1.msra.mxu1 %v1220_v54  ;;  %1254 = vmatprep.mubr.f32.mxu1 %v12458_v0 }
  0x7f   : > { %1310 = vmatpush1.msra.mxu0 %v10431_v31  ;;  %1256 = vmatmul.mubr.f32.vlgmr.msra.gmra.mxu1 %v10254_v27  ;;  %v10599_v31 = vsub.f32 %v410_v3, %v10568_v19 }
  0x80   : > { %1313 = vmatprep.subr.mxu0 %v10441_v34  ;;  %1391 = vmatprep.subr.mxu1 %v10350_v2  ;;  %v1792_v34 = vand.u32 4294901760, %v10594_v30 }
  0x81   : > { %1316 = vmatpush1.msra.mxu0 %v10448_v6  ;;  %1349 = vmatprep.mubr.f32.mxu0 %v12458_v0 }
  0x82   : > { %1393 = vmatpush1.msra.mxu1 %v10364_v8  ;;  %1352 = vmatmul.mubr.f32.vlgmr.msra.gmra.mxu0 %v10272_v35 }
  0x83   : > { %1395 = vmatprep.subr.mxu1 %v10368_v9  ;;  %1484 = vmatprep.subr.mxu0 %v1176_v28  ;;  %v1768_v28 = vand.u32 4294901760, %v10550_v7 }
  0x84   : > { %1261 = vmatprep.mubr.f32.mxu1 %v12458_v0  ;;  %1397 = vmatpush1.msra.mxu1 %v10376_v14 }
  0x85   : > { %1488 = vmatpush1.msra.mxu0 %v1182_v4  ;;  %1263 = vmatmul.mubr.f32.gmra.mxu1 %v10285_v40  ;;  %v10590_v4 = vand.u32 4294901760, %v404_v20 }
  0x86   : > { %1399 = vmatprep.subr.mxu1 %v10395_v21  ;;  %1492 = vmatprep.subr.mxu0 %v1188_v32  ;;  %v1780_v32 = vand.u32 4294901760, %v10574_v23 }
  0x87   : > { %1357 = vmatprep.mubr.f32.mxu0 %v12458_v0  ;;  %1401 = vmatpush1.msra.mxu1 %v10400_v22 }
  0x88   : > { %1496 = vmatpush1.msra.mxu0 %v1194_v33  ;;  %1403 = vmatprep.subr.mxu1 %v10414_v26  ;;  %v10609_v33 = vsub.f32 %v405_v13, %v10582_v25  ;;  %v1781_v6 = vsub.f32 %v10574_v23, %v1780_v32 }
  0x89   : > { %1360 = vmatmul.mubr.f32.gmra.mxu0 %v10296_v47  ;;  %1500 = vmatprep.subr.mxu0 %v1200_v36  ;;  %v1787_v36 = vsub.f32 %v10580_v24, %v1786_v5 }
  0x8a   : > { %1405 = vmatpush1.msra.mxu1 %v10422_v29  ;;  %1438 = vmatprep.mubr.f32.mxu1 %v12458_v0  ;;  %v1804_v37 = vand.u32 4294901760, %v10609_v33  ;;  %v1782_v38 = vand.u32 4294901760, %v1781_v6 }
  0x8b   : > { %1504 = vmatpush1.msra.mxu0 %v1206_v11  ;;  %1442 = vmatmul.mubr.f32.vlgmr.msra.gmra.mxu1 %v10289_v43 }
  0x8c   : > { %1508 = vmatprep.subr.mxu0 %v1212_v41  ;;  %1585 = vmatprep.subr.mxu1 %v10350_v2  ;;  %v1774_v2 = vand.u32 4294901760, %v10561_v15  ;;  %v1805_v41 = vsub.f32 %v10609_v33, %v1804_v37 }
  0x8d   : > { %1512 = vmatpush1.msra.mxu0 %v1218_v42  ;;  %1545 = vmatprep.mubr.f32.mxu0 %v12458_v0 }
  0x8e   : > { %1587 = vmatpush1.msra.mxu1 %v10364_v8  ;;  %1547 = vmatmul.mubr.f32.vlgmr.msra.gmra.mxu0 %v10254_v27  ;;  %v1769_v8 = vsub.f32 %v10550_v7, %v1768_v28  ;;  %v1806_v44 = vand.u32 4294901760, %v1805_v41 }
  0x8f   : > { %1589 = vmatprep.subr.mxu1 %v10368_v9  ;;  %1672 = vmatprep.subr.mxu0 %v10518_v57  ;;  %v10616_v9 = vsub.f32 %v404_v20, %v10590_v4 }
  0x90   : > { %1447 = vmatprep.mubr.f32.mxu1 %v12458_v0  ;;  %1591 = vmatpush1.msra.mxu1 %v10376_v14  ;;  %v1775_v14 = vsub.f32 %v10561_v15, %v1774_v2  ;;  %v1770_v10 = vand.u32 4294901760, %v1769_v8 }
  0x91   : > { %1674 = vmatpush1.msra.mxu0 %v10532_v61  ;;  %1451 = vmatmul.mubr.f32.gmra.mxu1 %v10308_v52  ;;  %v1810_v11 = vand.u32 4294901760, %v10616_v9 }
  0x92   : > { %1593 = vmatprep.subr.mxu1 %v10395_v21  ;;  %1676 = vmatprep.subr.mxu0 %v10536_v62  ;;  %v1798_v21 = vand.u32 4294901760, %v10599_v31 }
  0x93   : > { %1552 = vmatprep.mubr.f32.mxu0 %v12458_v0  ;;  %1595 = vmatpush1.msra.mxu1 %v10400_v22  ;;  %v1776_v22 = vand.u32 4294901760, %v1775_v14  ;;  %v1811_v16 = vsub.f32 %v10616_v9, %v1810_v11 }
  0x94   : > { %1678 = vmatpush1.msra.mxu0 %v10544_v1  ;;  %1597 = vmatprep.subr.mxu1 %v10414_v26  ;;  %v1793_v26 = vsub.f32 %v10594_v30, %v1792_v34  ;;  %v1799_v39 = vsub.f32 %v10599_v31, %v1798_v21 }
  0x95   : > { %1554 = vmatmul.mubr.f32.gmra.mxu0 %v10285_v40  ;;  %1680 = vmatprep.subr.mxu0 %v10563_v17  ;;  %v1812_v45 = vand.u32 4294901760, %v1811_v16 }
  0x96   : > { %1599 = vmatpush1.msra.mxu1 %v10422_v29  ;;  %1632 = vmatprep.mubr.f32.mxu1 %v12458_v0  ;;  %v1788_v29 = vand.u32 4294901760, %v1787_v36  ;;  %v1794_v12 = vand.u32 4294901760, %v1793_v26  ;;  %v1800_v42 = vand.u32 4294901760, %v1799_v39 }
  0x97   : > { %1682 = vmatpush1.msra.mxu0 %v10568_v19  ;;  %1634 = vmatmul.mubr.f32.vlgmr.msra.gmra.mxu1 %v10254_v27 }
  0x98   : > { %1684 = vmatprep.subr.mxu0 %v10582_v25  ;;  %1771 = vmatprep.subr.mxu1 %v1770_v10 }
  0x99   : > { %1686 = vmatpush1.msra.mxu0 %v10590_v4  ;;  %1719 = vmatprep.mubr.f32.mxu0 %v12458_v0 }
  0x9a   : > { %1777 = vmatpush1.msra.mxu1 %v1776_v22  ;;  %1725 = vmatmul.mubr.f32.vlgmr.msra.gmra.mxu0 %v10310_v53  ;;  %v10722_v53 = vld [vmem:[#allocation2] sm:$0x3f] }
  0x9b   : > { %1783 = vmatprep.subr.mxu1 %v1782_v38  ;;  %1887 = vmatprep.subr.mxu0 %v10550_v7 }
  0x9c   : > { %1639 = vmatprep.mubr.f32.mxu1 %v12458_v0  ;;  %1789 = vmatpush1.msra.mxu1 %v1788_v29 }
  0x9d   : > { %1890 = vmatpush1.msra.mxu0 %v10561_v15  ;;  %1641 = vmatmul.mubr.f32.gmra.mxu1 %v10285_v40 }
  0x9e   : > { %1795 = vmatprep.subr.mxu1 %v1794_v12  ;;  %1893 = vmatprep.subr.mxu0 %v10574_v23 }
  0x9f   : > { %1730 = vmatprep.mubr.f32.mxu0 %v12458_v0  ;;  %1801 = vmatpush1.msra.mxu1 %v1800_v42 }
  0xa0   : > { %1896 = vmatpush1.msra.mxu0 %v10580_v24  ;;  %1807 = vmatprep.subr.mxu1 %v1806_v44 }
  0xa1   : > { %1736 = vmatmul.mubr.f32.gmra.mxu0 %v10325_v60  ;;  %1899 = vmatprep.subr.mxu0 %v10594_v30 }
  0xa2   : > { %1813 = vmatpush1.msra.mxu1 %v1812_v45  ;;  %1846 = vmatprep.mubr.f32.mxu1 %v12458_v0 }
  0xa3   : > { %1902 = vmatpush1.msra.mxu0 %v10599_v31  ;;  %1848 = vmatmul.mubr.f32.vlgmr.msra.gmra.mxu1 %v10254_v27 }
  0xa4   : > { %1905 = vmatprep.subr.mxu0 %v10609_v33  ;;  %1983 = vmatprep.subr.mxu1 %v10518_v57 }
  0xa5   : > { %1908 = vmatpush1.msra.mxu0 %v10616_v9  ;;  %1941 = vmatprep.mubr.f32.mxu0 %v12458_v0 }
  0xa6   : > { %1985 = vmatpush1.msra.mxu1 %v10532_v61  ;;  %1944 = vmatmul.mubr.f32.vlgmr.msra.gmra.mxu0 %v10272_v35  ;;  %v426_v35 = vlaneseq }
  0xa7   : > { %1987 = vmatprep.subr.mxu1 %v10536_v62  ;;  %2076 = vmatprep.subr.mxu0 %v1768_v28 }
  0xa8   : > { %1853 = vmatprep.mubr.f32.mxu1 %v12458_v0  ;;  %1989 = vmatpush1.msra.mxu1 %v10544_v1 }
  0xa9   : > { %2080 = vmatpush1.msra.mxu0 %v1774_v2  ;;  %1855 = vmatmul.mubr.f32.gmra.mxu1 %v10285_v40 }
  0xaa   : > { %1991 = vmatprep.subr.mxu1 %v10563_v17  ;;  %2084 = vmatprep.subr.mxu0 %v1780_v32 }
  0xab   : > { %1949 = vmatprep.mubr.f32.mxu0 %v12458_v0  ;;  %1993 = vmatpush1.msra.mxu1 %v10568_v19 }
  0xac   : > { %2088 = vmatpush1.msra.mxu0 %v1786_v5  ;;  %1995 = vmatprep.subr.mxu1 %v10582_v25 }
  0xad   : > { %1952 = vmatmul.mubr.f32.gmra.mxu0 %v10296_v47  ;;  %2092 = vmatprep.subr.mxu0 %v1792_v34  ;;  %v10717_v47 = vshrl.u32 %v426_v35, 7 }
  0xae   : > { %1997 = vmatpush1.msra.mxu1 %v10590_v4  ;;  %2030 = vmatprep.mubr.f32.mxu1 %v12458_v0 }
  0xaf   : > { %2096 = vmatpush1.msra.mxu0 %v1798_v21  ;;  %2034 = vmatmul.mubr.f32.vlgmr.msra.gmra.mxu1 %v10289_v43  ;;  %v10003_v43 = vmov 0   ;;  %v432_v18 = vsub.s32 1, %v10717_v47  ;;  %v440_v39 = vsub.s32 3, %v10717_v47 }
  0xb0   : > { %2100 = vmatprep.subr.mxu0 %v1804_v37  ;;  %2177 = vmatprep.subr.mxu1 %v10518_v57  ;;  %v436_v37 = vsub.s32 2, %v10717_v47 }
  0xb1   : > { %2104 = vmatpush1.msra.mxu0 %v1810_v11  ;;  %2137 = vmatprep.mubr.f32.mxu0 %v12458_v0  ;;  %v441_v44 = vrot.slane %v10722_v53, %v440_v39 }
  0xb2   : > { %2179 = vmatpush1.msra.mxu1 %v10532_v61  ;;  %2139 = vmatmul.mubr.f32.vlgmr.msra.gmra.mxu0 %v10254_v27  ;;  %v437_v38 = vrot.slane %v10722_v53, %v436_v37 }
  0xb3   : > { %2181 = vmatprep.subr.mxu1 %v10536_v62  ;;  %2039 = vmatprep.mubr.f32.mxu1 %v12458_v0 }
  0xb4   : > { %2183 = vmatpush1.msra.mxu1 %v10544_v1  ;;  %2144 = vmatprep.mubr.f32.mxu0 %v12458_v0 }
  0xb5   : > { %2043 = vmatmul.mubr.f32.gmra.mxu1 %v10308_v52  ;;  %2185 = vmatprep.subr.mxu1 %v10563_v17  ;;  %v10720_v52 = vsub.s32 0, %v10717_v47 }
  0xb6   : > { %2187 = vmatpush1.msra.mxu1 %v10568_v19  ;;  %2146 = vmatmul.mubr.f32.gmra.mxu0 %v10285_v40 }
  0xb7   : > { %2189 = vmatprep.subr.mxu1 %v10582_v25  ;;  %2224 = vmatprep.mubr.f32.mxu1 %v12458_v0  ;;  %12507 = vst [vmem:[#allocation12_spill] sm:$0xff] %v10720_v52  ;;  %v429_v60 = vrot.slane %v10722_v53, %v10720_v52 }
  0xb8   : > { %2191 = vmatpush1.msra.mxu1 %v10590_v4  ;;  %9814 = vset.pattern.permute.xlu0 %v10003_v43 }
  0xb9   : > { %2226 = vmatmul.mubr.f32.vlgmr.msra.gmra.mxu1 %v10254_v27 }
  0xba   : > { %2231 = vmatprep.mubr.f32.mxu1 %v12458_v0 }
  0xbd   : > { %2233 = vmatmul.mubr.f32.gmra.mxu1 %v10285_v40  ;;  %v433_v40 = vrot.slane %v10722_v53, %v432_v18 }
 0x117   : > { %v542_v27 = vpop.f32.mrf.mxu0 }
 0x118   : > { %v543_v48 = vadd.f32 %v542_v27, %v429_v60 }
 0x119   : > { %v544_v46 = vpop.f32.mrf.mxu0  ;;  %v665_v51 = vpop.f32.mrf.mxu1 }
 0x11a   : > { %v545_v54 = vadd.f32 %v544_v46, %v433_v40  ;;  %v666_v55 = vadd.f32 %v665_v51, %v543_v48 }
 0x11b   : > { %v553_v49 = vpop.f32.mrf.mxu0  ;;  %v667_v56 = vpop.f32.mrf.mxu1 }
 0x11c   : > { %v554_v57 = vadd.f32 %v553_v49, %v429_v60  ;;  %v668_v58 = vadd.f32 %v667_v56, %v545_v54 }
 0x11d   : > { %v555_v50 = vpop.f32.mrf.mxu0 }
 0x11e   : > { %v556_v3 = vadd.f32 %v555_v50, %v433_v40 }
 0x11f   : > { %v761_v59 = vpop.f32.mrf.mxu0 }
 0x120   : > { %v762_v61 = vadd.f32 %v761_v59, %v666_v55 }
 0x121   : > { %v763_v62 = vpop.f32.mrf.mxu0  ;;  %v672_v63 = vpop.f32.mrf.mxu1 }
 0x122   : > { %v764_v1 = vadd.f32 %v763_v62, %v668_v58  ;;  %v673_v7 = vadd.f32 %v672_v63, %v554_v57 }
 0x123   : > { %v674_v13 = vpop.f32.mrf.mxu1 }
 0x124   : > { %v675_v15 = vadd.f32 %v674_v13, %v556_v3 }
 0x125   : > { %v769_v17 = vpop.f32.mrf.mxu0 }
 0x126   : > { %v770_v19 = vadd.f32 %v769_v17, %v673_v7 }
 0x127   : > { %v771_v20 = vpop.f32.mrf.mxu0  ;;  %v851_v23 = vpop.f32.mrf.mxu1 }
 0x128   : > { %v772_v24 = vadd.f32 %v771_v20, %v675_v15  ;;  %v852_v25 = vadd.f32 %v851_v23, %v762_v61 }
 0x129   : > { %v853_v28 = vpop.f32.mrf.mxu1 }
 0x12a   : > { %v854_v4 = vadd.f32 %v853_v28, %v764_v1  ;;  %v956_v2 = vpop.f32.mrf.mxu0 }
 0x12b   : > { %v957_v30 = vadd.f32 %v956_v2, %v852_v25 }
 0x12c   : > { %v958_v31 = vpop.f32.mrf.mxu0 }
 0x12d   : > { %v860_v32 = vpop.f32.mrf.mxu1  ;;  %v959_v8 = vadd.f32 %v958_v31, %v854_v4 }
 0x12e   : > { %v861_v5 = vadd.f32 %v860_v32, %v770_v19 }
 0x12f   : > { %v862_v33 = vpop.f32.mrf.mxu1 }
 0x130   : > { %v863_v9 = vadd.f32 %v862_v33, %v772_v24 }
 0x131   : > { %v963_v14 = vpop.f32.mrf.mxu0 }
 0x132   : > { %v964_v34 = vadd.f32 %v963_v14, %v861_v5 }
 0x133   : > { %v965_v6 = vpop.f32.mrf.mxu0  ;;  %v1043_v21 = vpop.f32.mrf.mxu1 }
 0x134   : > { %v966_v10 = vadd.f32 %v965_v6, %v863_v9  ;;  %v10728_v36 = vadd.f32 %v1043_v21, %v957_v30 }
 0x135   : > { %v1045_v22 = vpop.f32.mrf.mxu1 }
 0x136   : > { %v10731_v26 = vadd.f32 %v1045_v22, %v959_v8  ;;  %v1134_v11 = vpop.f32.mrf.mxu0 }
 0x137   : > { %v1135_v42 = vadd.f32 %v1134_v11, %v437_v38  ;;  %v444_v11 = vsub.s32 4, %v10717_v47 }
 0x138   : > { %v1136_v41 = vpop.f32.mrf.mxu0 }
 0x139   : > { %v1050_v29 = vpop.f32.mrf.mxu1  ;;  %v1137_v18 = vadd.f32 %v1136_v41, %v441_v44  ;;  %v445_v41 = vrot.slane %v10722_v53, %v444_v11 }
 0x13a   : > { %v10735_v12 = vadd.f32 %v1050_v29, %v964_v34 }
 0x13b   : > { %v1052_v16 = vpop.f32.mrf.mxu1 }
 0x13c   : > { %v10738_v45 = vadd.f32 %v1052_v16, %v966_v10 }
 0x13d   : > { %v1145_v35 = vpop.f32.mrf.mxu0 }
 0x13e   : > { %v1146_v48 = vadd.f32 %v1145_v35, %v437_v38 }
 0x13f   : > { %v1147_v43 = vpop.f32.mrf.mxu0  ;;  %v1257_v60 = vpop.f32.mrf.mxu1 }
 0x140   : > { %v1258_v27 = vadd.f32 %v1257_v60, %v1135_v42  ;;  %v1148_v56 = vadd.f32 %v1147_v43, %v441_v44 }
 0x141   : > { %v1259_v46 = vpop.f32.mrf.mxu1 }
 0x142   : > { %v1260_v40 = vadd.f32 %v1259_v46, %v1137_v18  ;;  %v1353_v49 = vpop.f32.mrf.mxu0 }
 0x143   : > { %v1354_v50 = vadd.f32 %v1353_v49, %v1258_v27 }
 0x144   : > { %v1355_v51 = vpop.f32.mrf.mxu0 }
 0x145   : > { %v1264_v54 = vpop.f32.mrf.mxu1  ;;  %v1356_v55 = vadd.f32 %v1355_v51, %v1260_v40 }
 0x146   : > { %v1265_v57 = vadd.f32 %v1264_v54, %v1146_v48 }
 0x147   : > { %v1266_v58 = vpop.f32.mrf.mxu1 }
 0x148   : > { %v1267_v59 = vadd.f32 %v1266_v58, %v1148_v56 }
 0x149   : > { %v1361_v61 = vpop.f32.mrf.mxu0 }
 0x14a   : > { %v1362_v62 = vadd.f32 %v1361_v61, %v1265_v57  ;;  %v448_v57 = vsub.s32 5, %v10717_v47 }
 0x14b   : > { %v1363_v63 = vpop.f32.mrf.mxu0  ;;  %v1443_v1 = vpop.f32.mrf.mxu1 }
 0x14c   : > { %v1364_v3 = vadd.f32 %v1363_v63, %v1267_v59  ;;  %v1444_v7 = vadd.f32 %v1443_v1, %v1354_v50 }
 0x14d   : > { %v1445_v13 = vpop.f32.mrf.mxu1 }
 0x14e   : > { %v1446_v15 = vadd.f32 %v1445_v13, %v1356_v55  ;;  %v1548_v17 = vpop.f32.mrf.mxu0 }
 0x14f   : > { %v1549_v19 = vadd.f32 %v1548_v17, %v1444_v7 }
 0x150   : > { %v1550_v20 = vpop.f32.mrf.mxu0 }
 0x151   : > { %v1452_v23 = vpop.f32.mrf.mxu1  ;;  %v1551_v24 = vadd.f32 %v1550_v20, %v1446_v15 }
 0x152   : > { %v1453_v25 = vadd.f32 %v1452_v23, %v1362_v62 }
 0x153   : > { %v1454_v28 = vpop.f32.mrf.mxu1 }
 0x154   : > { %v1455_v4 = vadd.f32 %v1454_v28, %v1364_v3  ;;  %v449_v3 = vrot.slane %v10722_v53, %v448_v57 }
 0x155   : > { %v1555_v2 = vpop.f32.mrf.mxu0 }
 0x156   : > { %v1556_v30 = vadd.f32 %v1555_v2, %v1453_v25 }
 0x157   : > { %v1557_v31 = vpop.f32.mrf.mxu0  ;;  %v1635_v32 = vpop.f32.mrf.mxu1 }
 0x158   : > { %v1558_v8 = vadd.f32 %v1557_v31, %v1455_v4  ;;  %v10740_v5 = vadd.f32 %v1635_v32, %v1549_v19 }
 0x159   : > { %v1637_v33 = vpop.f32.mrf.mxu1 }
 0x15a   : > { %v10742_v9 = vadd.f32 %v1637_v33, %v1551_v24  ;;  %v1726_v14 = vpop.f32.mrf.mxu0  ;;  %v10766_v33 = vld [vmem:[%s12453_s9] ss:$0 sm:$0xff] }
 0x15b   : > { %v1727_v35 = vadd.f32 %v1726_v14, %v445_v41  ;;  %12508 = vst [vmem:[#allocation13_spill] sm:$0xff] %v10766_v33 }
 0x15c   : > { %v1728_v6 = vpop.f32.mrf.mxu0 }
 0x15d   : > { %v1642_v34 = vpop.f32.mrf.mxu1  ;;  %v1729_v28 = vadd.f32 %v1728_v6, %v449_v3 }
 0x15e   : > { %v10744_v21 = vadd.f32 %v1642_v34, %v1556_v30 }
 0x15f   : > { %v1644_v10 = vpop.f32.mrf.mxu1 }
 0x160   : > { %v10746_v37 = vadd.f32 %v1644_v10, %v1558_v8 }
 0x161   : > { %v1737_v22 = vpop.f32.mrf.mxu0 }
 0x162   : > { %v1738_v18 = vadd.f32 %v1737_v22, %v445_v41 }
 0x163   : > { %v1739_v38 = vpop.f32.mrf.mxu0  ;;  %v1849_v39 = vpop.f32.mrf.mxu1 }
 0x164   : > { %v1850_v27 = vadd.f32 %v1849_v39, %v1727_v35  ;;  %v1740_v15 = vadd.f32 %v1739_v38, %v449_v3 }
 0x165   : > { %v1851_v29 = vpop.f32.mrf.mxu1 }
 0x166   : > { %v1945_v16 = vpop.f32.mrf.mxu0  ;;  %v1852_v4 = vadd.f32 %v1851_v29, %v1729_v28 }
 0x167   : > { %v1946_v49 = vadd.f32 %v1945_v16, %v1850_v27 }
 0x168   : > { %v1947_v44 = vpop.f32.mrf.mxu0 }
 0x169   : > { %v1856_v42 = vpop.f32.mrf.mxu1  ;;  %v1948_v14 = vadd.f32 %v1947_v44, %v1852_v4 }
 0x16a   : > { %v1857_v50 = vadd.f32 %v1856_v42, %v1738_v18 }
 0x16b   : > { %v1858_v43 = vpop.f32.mrf.mxu1 }
 0x16c   : > { %v1859_v24 = vadd.f32 %v1858_v43, %v1740_v15 }
 0x16d   : > { %v1953_v60 = vpop.f32.mrf.mxu0 }
 0x16e   : > { %v1954_v58 = vadd.f32 %v1953_v60, %v1857_v50 }
 0x16f   : > { %v1955_v46 = vpop.f32.mrf.mxu0  ;;  %v2035_v48 = vpop.f32.mrf.mxu1 }
 0x170   : > { %v2036_v54 = vadd.f32 %v2035_v48, %v1946_v49  ;;  %v1956_v2 = vadd.f32 %v1955_v46, %v1859_v24 }
 0x171   : > { %v2037_v40 = vpop.f32.mrf.mxu1 }
 0x172   : > { %v2140_v51 = vpop.f32.mrf.mxu0  ;;  %v2038_v6 = vadd.f32 %v2037_v40, %v1948_v14 }
 0x173   : > { %v2141_v61 = vadd.f32 %v2140_v51, %v2036_v54 }
 0x174   : > { %v2142_v56 = vpop.f32.mrf.mxu0 }
 0x175   : > { %v2044_v55 = vpop.f32.mrf.mxu1  ;;  %v2143_v11 = vadd.f32 %v2142_v56, %v2038_v6  ;;  %v10839_v6 = vand.u32 4294901760, %v10738_v45 }
 0x176   : > { %v2045_v62 = vadd.f32 %v2044_v55, %v1954_v58  ;;  %v2147_v63 = vpop.f32.mrf.mxu0 }
 0x177   : > { %v2046_v59 = vpop.f32.mrf.mxu1 }
 0x178   : > { %v2148_v17 = vadd.f32 %v2147_v63, %v2045_v62  ;;  %v2047_v31 = vadd.f32 %v2046_v59, %v1956_v2  ;;  %v2149_v32 = vpop.f32.mrf.mxu0 }
 0x179   : > { %v2227_v1 = vpop.f32.mrf.mxu1 }
 0x17a   : > { %v2228_v7 = vadd.f32 %v2227_v1, %v2141_v61  ;;  %v2150_v10 = vadd.f32 %v2149_v32, %v2047_v31 }
 0x17b   : > { %v2229_v13 = vpop.f32.mrf.mxu1 }
 0x17c   : > { %v2246_v19 = vsel %vm456_vm0, %v2228_v7, 0  ;;  %v10772_v38 = vadd.f32 %v2229_v13, %v2143_v11  ;;  %v10847_v11 = vsub.f32 %v10738_v45, %v10839_v6 }
 0x17d   : > { %v2234_v20 = vpop.f32.mrf.mxu1  ;;  %v10753_v23 = vand.u32 4294901760, %v2246_v19 }
 0x17e   : > { %v2235_v25 = vadd.f32 %v2234_v20, %v2148_v17 }
 0x17f   : > { %8817 = vmatprep.mubr.f32.mxu1 %v10753_v23  ;;  %v10757_v47 = vsub.f32 %v2246_v19, %v10753_v23  ;;  %v2236_v34 = vpop.f32.mrf.mxu1 }
 0x180   : > { %2779 = vrot.lane.b32.xlu1 %v2235_v25, %s10004_s26  ;;  %2244 = vrot.lane.b32.xlu0 %v2235_v25, %s10005_s28  ;;  %v10768_v22 = vadd.f32 %v2236_v34, %v2150_v10  ;;  %v2248_v39 = vsel %vm456_vm0, %v2235_v25, 0  ;;  %v10843_v10 = vand.u32 4294901760, %v10731_v26 }
 0x181   : > { %v2323_v53 = vand.u32 4294901760, %v10757_v47  ;;  %v10776_v29 = vand.u32 4294901760, %v2248_v39 }
 0x183   : > { %v2324_v30 = vsub.f32 %v10757_v47, %v2323_v53  ;;  %v10779_v41 = vsub.f32 %v2248_v39, %v10776_v29  ;;  %v10855_v39 = vsub.f32 %v10731_v26, %v10843_v10 }
 0x184   : > { %2777 = vrot.lane.b32.xlu1 %v2228_v7, %s10004_s26  ;;  %2242 = vrot.lane.b32.xlu0 %v2228_v7, %s10005_s28  ;;  %s10013_s26 = smov 127  }
 0x185   : > { %v2325_v8 = vand.u32 4294901760, %v2324_v30  ;;  %v2333_v35 = vand.u32 4294901760, %v10779_v41 }
 0x187   : > { %8810 = vmatprep.mubr.f32.mxu0 %v2325_v8  ;;  %v2334_v40 = vsub.f32 %v10779_v41, %v2333_v35 }
 0x188   : > { %2775 = vrot.lane.b32.xlu1 %v2235_v25, %s10006_s30  ;;  %2773 = vrot.lane.b32.xlu0 %v2228_v7, %s10006_s30  ;;  %s10017_s30 = smov 118  }
 0x189   : > { %v2335_v57 = vand.u32 4294901760, %v2334_v40 }
 0x18c   : > { %4385 = vrot.lane.b32.xlu1 %v10768_v22, %s10005_s28  ;;  %2766 = vperm.xlu0 %9814, %v10766_v33  }
 0x190   : > { %4383 = vrot.lane.b32.xlu0 %v10772_v38, %s10005_s28  ;;  %s10014_s28 = smov 123  }
 0x1f2   : > { %v2245_v16 = vpop.permute.xlu0 %2244  ;;  %v2780_v42 = vpop.permute.xlu1 %2779 }
 0x1f3   : > { %v2252_v44 = vsel %vm456_vm0, %v2245_v16, 0  ;;  %v2787_v61 = vsel %vm456_vm0, %v2780_v42, 0 }
 0x1f4   : > { %v10783_v43 = vand.u32 4294901760, %v2252_v44  ;;  %v10800_v3 = vand.u32 4294901760, %v2787_v61 }
 0x1f6   : > { %v2371_v60 = vsub.f32 %v2252_v44, %v10783_v43  ;;  %8806 = vmatprep.subr.mxu0 %v10783_v43  ;;  %v2243_v18 = vpop.permute.xlu0 %2242  ;;  %v2778_v49 = vpop.permute.xlu1 %2777  ;;  %v2906_v19 = vsub.f32 %v2787_v61, %v10800_v3 }
 0x1f7   : > { %v2250_v27 = vsel %vm456_vm0, %v2243_v18, 0  ;;  %8807 = vmatpush3.xpose.msra.mxu0 %v10783_v43  ;;  %v2785_v15 = vsel %vm456_vm0, %v2778_v49, 0 }
 0x1f8   : > { %v10789_v46 = vand.u32 4294901760, %v2250_v27  ;;  %v2372_v48 = vand.u32 4294901760, %v2371_v60  ;;  %v10813_v20 = vand.u32 4294901760, %v2785_v15  ;;  %v2907_v28 = vand.u32 4294901760, %v2906_v19 }
 0x1fa   : > { %v2378_v50 = vsub.f32 %v2250_v27, %v10789_v46  ;;  %8808 = vmatprep.subr.mxu0 %v10789_v46  ;;  %v2774_v51 = vpop.permute.xlu0 %2773  ;;  %v2373_v54 = vsub.f32 %v2371_v60, %v2372_v48  ;;  %v2776_v62 = vpop.permute.xlu1 %2775  ;;  %v2913_v4 = vsub.f32 %v2785_v15, %v10813_v20 }
 0x1fb   : > { %8809 = vmatpush3.xpose.msra.mxu0 %v10789_v46  ;;  %v2781_v55 = vsel %vm456_vm0, %v2774_v51, 0  ;;  %v2783_v7 = vsel %vm456_vm0, %v2776_v62, 0 }
 0x1fc   : > { %8820 = vmatprep.subr.mxu0 %v2371_v60  ;;  %v2374_v56 = vand.u32 4294901760, %v2373_v54  ;;  %v2379_v58 = vand.u32 4294901760, %v2378_v50  ;;  %v10797_v63 = vand.u32 4294901760, %v2781_v55  ;;  %v10808_v17 = vand.u32 4294901760, %v2783_v7 }
 0x1fd   : > { %v2914_v31 = vand.u32 4294901760, %v2913_v4 }
 0x1fe   : > { %8813 = vmatprep.subr.mxu1 %v2374_v56  ;;  %8811 = vmatmul.mubr.f32.vlgmr.msra.gmra.mxu0 %v2335_v57  ;;  %v2380_v59 = vsub.f32 %v2378_v50, %v2379_v58  ;;  %v10804_v13 = vsub.f32 %v2781_v55, %v10797_v63  ;;  %v2867_v25 = vsub.f32 %v2783_v7, %v10808_v17 }
 0x1ff   : > { %8814 = vmatpush3.xpose.msra.mxu1 %v2374_v56  ;;  %8821 = vmatpush3.xpose.msra.mxu0 %v2371_v60  ;;  %v2915_v14 = vsub.f32 %v2913_v4, %v2914_v31 }
 0x200   : > { %8824 = vmatprep.mubr.f32.mxu0 %v10757_v47  ;;  %8822 = vmatprep.subr.mxu0 %v2378_v50  ;;  %v2381_v1 = vand.u32 4294901760, %v2380_v59  ;;  %v2858_v24 = vand.u32 4294901760, %v10804_v13  ;;  %v2868_v47 = vand.u32 4294901760, %v2867_v25 }
 0x202   : > { %8815 = vmatprep.subr.mxu1 %v2381_v1  ;;  %v2859_v2 = vsub.f32 %v10804_v13, %v2858_v24  ;;  %v2869_v32 = vsub.f32 %v2867_v25, %v2868_v47 }
 0x203   : > { %8816 = vmatpush3.xpose.msra.mxu1 %v2381_v1  ;;  %8823 = vmatpush3.xpose.msra.mxu0 %v2378_v50 }
 0x204   : > { %8827 = vmatprep.subr.mxu1 %v10783_v43  ;;  %8834 = vmatprep.subr.mxu0 %v2372_v48  ;;  %v2860_v30 = vand.u32 4294901760, %v2859_v2  ;;  %v2870_v34 = vand.u32 4294901760, %v2869_v32 }
 0x206   : > { %8818 = vmatmul.mubr.f32.vlgmr.msra.gmra.mxu1 %v10776_v29  ;;  %8825 = vmatmul.mubr.f32.vlgmr.msra.gmra.mxu0 %v10779_v41  ;;  %v10866_v41 = vand.u32 4294901760, %v10855_v39 }
 0x207   : > { %8828 = vmatpush3.xpose.msra.mxu1 %v10783_v43  ;;  %8831 = vmatprep.mubr.f32.mxu1 %v2323_v53  ;;  %v2908_v53 = vsub.f32 %v2906_v19, %v2907_v28 }
 0x208   : > { %8835 = vmatpush3.xpose.msra.mxu0 %v2372_v48  ;;  %8838 = vmatprep.mubr.f32.mxu0 %v10753_v23  ;;  %v3465_v16 = vsub.f32 %v10855_v39, %v10866_v41 }
 0x209   : > { %8829 = vmatprep.subr.mxu1 %v10789_v46  ;;  %8836 = vmatprep.subr.mxu0 %v2379_v58  ;;  %v2909_v8 = vand.u32 4294901760, %v2908_v53 }
 0x20a   : > { %v3466_v42 = vand.u32 4294901760, %v3465_v16 }
 0x20b   : > { %8830 = vmatpush3.xpose.msra.mxu1 %v10789_v46 }
 0x20c   : > { %8837 = vmatpush3.xpose.msra.mxu0 %v2379_v58  ;;  %8841 = vmatprep.subr.mxu1 %v10783_v43 }
 0x20d   : > { %8848 = vmatprep.subr.mxu0 %v10800_v3 }
 0x20e   : > { %8832 = vmatmul.mubr.f32.vlgmr.msra.gmra.mxu1 %v2333_v35 }
 0x20f   : > { %8839 = vmatmul.mubr.f32.vlgmr.msra.gmra.mxu0 %v10776_v29  ;;  %8842 = vmatpush3.xpose.msra.mxu1 %v10783_v43 }
 0x210   : > { %8845 = vmatprep.mubr.f32.mxu1 %v10753_v23  ;;  %8849 = vmatpush3.xpose.msra.mxu0 %v10800_v3  ;;  %v2916_v23 = vand.u32 4294901760, %v2915_v14 }
 0x211   : > { %8852 = vmatprep.mubr.f32.mxu0 %v2860_v30  ;;  %8843 = vmatprep.subr.mxu1 %v10789_v46  ;;  %v2758_v30 = vld [vmem:[%s12447_s3] sm:$0xff] }
 0x212   : > { %8850 = vmatprep.subr.mxu0 %v10813_v20 }
 0x213   : > { %8844 = vmatpush3.xpose.msra.mxu1 %v10789_v46 }
 0x214   : > { %8851 = vmatpush3.xpose.msra.mxu0 %v10813_v20  ;;  %8855 = vmatprep.subr.mxu1 %v2909_v8 }
 0x215   : > { %8862 = vmatprep.subr.mxu0 %v2906_v19 }
 0x216   : > { %8846 = vmatmul.mubr.f32.vlgmr.msra.gmra.mxu1 %v10776_v29  ;;  %v10858_v29 = vand.u32 4294901760, %v10847_v11 }
 0x217   : > { %8853 = vmatmul.mubr.f32.vlgmr.msra.gmra.mxu0 %v2870_v34  ;;  %8856 = vmatpush3.xpose.msra.mxu1 %v2909_v8 }
 0x218   : > { %8859 = vmatprep.mubr.f32.mxu1 %v10797_v63  ;;  %8863 = vmatpush3.xpose.msra.mxu0 %v2906_v19  ;;  %v3458_v45 = vsub.f32 %v10847_v11, %v10858_v29 }
 0x219   : > { %8866 = vmatprep.mubr.f32.mxu0 %v10804_v13  ;;  %8857 = vmatprep.subr.mxu1 %v2916_v23 }
 0x21a   : > { %8864 = vmatprep.subr.mxu0 %v2913_v4  ;;  %v3459_v26 = vand.u32 4294901760, %v3458_v45 }
 0x21b   : > { %8858 = vmatpush3.xpose.msra.mxu1 %v2916_v23 }
 0x21c   : > { %8865 = vmatpush3.xpose.msra.mxu0 %v2913_v4  ;;  %8869 = vmatprep.subr.mxu1 %v10800_v3 }
 0x21d   : > { %8876 = vmatprep.subr.mxu0 %v2907_v28 }
 0x21e   : > { %8860 = vmatmul.mubr.f32.vlgmr.msra.gmra.mxu1 %v10808_v17 }
 0x21f   : > { %8867 = vmatmul.mubr.f32.vlgmr.msra.gmra.mxu0 %v2867_v25  ;;  %8870 = vmatpush3.xpose.msra.mxu1 %v10800_v3 }
 0x220   : > { %8873 = vmatprep.mubr.f32.mxu1 %v2858_v24  ;;  %8877 = vmatpush3.xpose.msra.mxu0 %v2907_v28  ;;  %v10881_v28 = vpop.permute.xlu0 %2766 }
 0x221   : > { %8880 = vmatprep.mubr.f32.mxu0 %v10797_v63  ;;  %8871 = vmatprep.subr.mxu1 %v10813_v20 }
 0x222   : > { %8878 = vmatprep.subr.mxu0 %v2914_v31 }
 0x223   : > { %8872 = vmatpush3.xpose.msra.mxu1 %v10813_v20 }
 0x224   : > { %8879 = vmatpush3.xpose.msra.mxu0 %v2914_v31  ;;  %8883 = vmatprep.subr.mxu1 %v10800_v3 }
 0x225   : > { %8890 = vmatprep.subr.mxu0 %v10839_v6 }
 0x226   : > { %8874 = vmatmul.mubr.f32.vlgmr.msra.gmra.mxu1 %v2868_v47 }
 0x227   : > { %8881 = vmatmul.mubr.f32.vlgmr.msra.gmra.mxu0 %v10808_v17  ;;  %8884 = vmatpush3.xpose.msra.mxu1 %v10800_v3 }
 0x228   : > { %8887 = vmatprep.mubr.f32.mxu1 %v10797_v63  ;;  %8891 = vmatpush3.msra.mxu0 %v10839_v6 }
 0x229   : > { %8885 = vmatprep.subr.mxu1 %v10813_v20  ;;  %8892 = vmatprep.subr.mxu0 %v10843_v10 }
 0x22a   : > { %8893 = vmatpush3.msra.mxu0 %v10843_v10 }
 0x22b   : > { %8904 = vmatprep.subr.mxu0 %v10847_v11  ;;  %8886 = vmatpush3.xpose.msra.mxu1 %v10813_v20 }
 0x22c   : > { %8897 = vmatprep.subr.mxu1 %v3459_v26 }
 0x22e   : > { %8888 = vmatmul.mubr.f32.vlgmr.msra.gmra.mxu1 %v10808_v17 }
 0x22f   : > { %8898 = vmatpush3.msra.mxu1 %v3459_v26  ;;  %v2759_v26 = vld [vmem:[%s12447_s3 + $0x8] sm:$0xff] }
 0x230   : > { %8899 = vmatprep.subr.mxu1 %v3466_v42 }
 0x231   : > { %8900 = vmatpush3.msra.mxu1 %v3466_v42 }
 0x232   : > { %8911 = vmatprep.subr.mxu1 %v10839_v6 }
 0x2be   : > { %v8812_v44 = vpop.f32.mrf.mxu0 }
 0x2c0   : > { %v2327_v43 = vpop.f32.mrf.mxu0 }
 0x2c6   : > { %v8819_v35 = vpop.f32.mrf.mxu1  ;;  %v8826_v27 = vpop.f32.mrf.mxu0 }
 0x2c7   : > { %v2425_v18 = vadd.f32 %v8819_v35, %v8812_v44 }
 0x2c8   : > { %v2418_v60 = vpop.f32.mrf.mxu1  ;;  %v2500_v49 = vpop.f32.mrf.mxu0 }
 0x2c9   : > { %v2419_v46 = vadd.f32 %v2418_v60, %v2327_v43  ;;  %v2508_v40 = vadd.f32 %v8826_v27, %v2425_v18 }
 0x2cb   : > { %v2501_v51 = vadd.f32 %v2500_v49, %v2419_v46 }
 0x2ce   : > { %v8833_v48 = vpop.f32.mrf.mxu1 }
 0x2cf   : > { %v2591_v54 = vadd.f32 %v8833_v48, %v2508_v40  ;;  %v8840_v55 = vpop.f32.mrf.mxu0  ;;  %v8321_v40 = vld [vmem:[%s12447_s3 + $0x10] sm:$0xff] }
 0x2d0   : > { %v2582_v50 = vpop.f32.mrf.mxu1 }
 0x2d1   : > { %v2583_v56 = vadd.f32 %v2582_v50, %v2501_v51  ;;  %v2674_v57 = vadd.f32 %v8840_v55, %v2591_v54  ;;  %v2667_v58 = vpop.f32.mrf.mxu0  ;;  %v8322_v54 = vld [vmem:[%s12447_s3 + $0x18] sm:$0xff] }
 0x2d3   : > { %v2668_v61 = vadd.f32 %v2667_v58, %v2583_v56  ;;  %v4386_v56 = vpop.permute.xlu1 %4385 }
 0x2d6   : > { %v8847_v59 = vpop.f32.mrf.mxu1 }
 0x2d7   : > { %v2753_v62 = vadd.f32 %v8847_v59, %v2674_v57  ;;  %v8854_v3 = vpop.f32.mrf.mxu0  ;;  %v10900_v57 = vand.u32 4294901760, %v10735_v12  ;;  %v4384_v59 = vpop.permute.xlu0 %4383 }
 0x2d8   : > { %v2746_v63 = vpop.f32.mrf.mxu1 }
 0x2d9   : > { %v2747_v1 = vadd.f32 %v2746_v63, %v2668_v61  ;;  %9819 = vtanh.f32 %v2753_v62  ;;  %v2862_v13 = vpop.f32.mrf.mxu0  ;;  %v10904_v62 = vand.u32 4294901760, %v10728_v36 }
 0x2db   : > { %9821 = vtanh.f32 %v2747_v1  ;;  %v10910_v1 = vsub.f32 %v10735_v12, %v10900_v57 }
 0x2de   : > { %v8861_v7 = vpop.f32.mrf.mxu1 }
 0x2df   : > { %v2960_v17 = vadd.f32 %v8861_v7, %v8854_v3  ;;  %v8868_v19 = vpop.f32.mrf.mxu0 }
 0x2e0   : > { %v2953_v15 = vpop.f32.mrf.mxu1 }
 0x2e1   : > { %v2954_v20 = vadd.f32 %v2953_v15, %v2862_v13  ;;  %v3043_v4 = vadd.f32 %v8868_v19, %v2960_v17  ;;  %v3035_v47 = vpop.f32.mrf.mxu0  ;;  %v10917_v17 = vsub.f32 %v10728_v36, %v10904_v62 }
 0x2e3   : > { %v3036_v31 = vadd.f32 %v3035_v47, %v2954_v20  ;;  %v10930_v47 = vand.u32 4294901760, %v10917_v17 }
 0x2e6   : > { %v8875_v24 = vpop.f32.mrf.mxu1  ;;  %v9820_v25 = vpop.eup %9819 }
 0x2e7   : > { %v3126_v32 = vadd.f32 %v8875_v24, %v3043_v4  ;;  %v8882_v14 = vpop.f32.mrf.mxu0  ;;  %v2770_v45 = vmul.f32 %v9820_v25, %v10881_v28  ;;  %v10922_v24 = vand.u32 4294901760, %v10910_v1 }
 0x2e8   : > { %v9822_v2 = vpop.eup %9821  ;;  %v3117_v53 = vpop.f32.mrf.mxu1 }
 0x2e9   : > { %v2769_v8 = vmul.f32 %v9822_v2, %v10881_v28  ;;  %v3118_v34 = vadd.f32 %v3117_v53, %v3036_v31  ;;  %v3209_v16 = vadd.f32 %v8882_v14, %v3126_v32  ;;  %v3202_v42 = vpop.f32.mrf.mxu0  ;;  %v2772_v60 = vadd.f32 %v2770_v45, %v2759_v26 }
 0x2ea   : > { %v4393_v32 = vsel %vm456_vm0, %v4386_v56, 0 }
 0x2eb   : > { %v2771_v23 = vadd.f32 %v2769_v8, %v2758_v30  ;;  %v3203_v35 = vadd.f32 %v3202_v42, %v3118_v34  ;;  %v3998_v30 = vsub.f32 %v10910_v1, %v10922_v24  ;;  %v10945_v26 = vand.u32 4294901760, %v4393_v32 }
 0x2ed   : > { %3841 = vxpose.xlu0.b32.start [1/2] (short) (narrow) %v2771_v23, 16  ;;  %v4005_v23 = vsub.f32 %v10917_v17, %v10930_v47  ;;  %v3999_v45 = vand.u32 4294901760, %v3998_v30 }
 0x2ee   : > { %v8889_v44 = vpop.f32.mrf.mxu1 }
 0x2ef   : > { %v3288_v43 = vadd.f32 %v8889_v44, %v3209_v16  ;;  %v4391_v16 = vsel %vm456_vm0, %v4384_v59, 0  ;;  %v4006_v44 = vand.u32 4294901760, %v4005_v23  ;;  %v11018_v59 = vand.u32 4294901760, %v10744_v21 }
 0x2f0   : > { %v3281_v18 = vpop.f32.mrf.mxu1 }
 0x2f1   : > { %v3282_v27 = vadd.f32 %v3281_v18, %v3203_v35  ;;  %3842 = vxpose.xlu0.b32.end [2/2] (short) (narrow) %v2772_v60, 16  ;;  %9823 = vtanh.f32 %v3288_v43  ;;  %v10960_v35 = vand.u32 4294901760, %v4391_v16 }
 0x2f3   : > { %9825 = vtanh.f32 %v3282_v27  ;;  %v10970_v60 = vsub.f32 %v4391_v16, %v10960_v35 }
 0x2fe   : > { %v9824_v46 = vpop.eup %9823 }
 0x2ff   : > { %v3297_v51 = vmul.f32 %v9824_v46, %v10881_v28  ;;  %v4387_v46 = vsel %vm456_vm0, %v10772_v38, 0 }
 0x300   : > { %v9826_v48 = vpop.eup %9825 }
 0x301   : > { %v3296_v49 = vmul.f32 %v9826_v48, %v10881_v28  ;;  %v3299_v55 = vadd.f32 %v8322_v54, %v3297_v51  ;;  %v10990_v48 = vand.u32 4294901760, %v10970_v60 }
 0x303   : > { %v3298_v50 = vadd.f32 %v8321_v40, %v3296_v49  ;;  %v10992_v40 = vand.u32 4294901760, %v4387_v46  ;;  %v4521_v51 = vsub.f32 %v10970_v60, %v10990_v48 }
 0x305   : > { %3300 = vxpose.xlu1.b32.start [1/2] (short) (narrow) %v3298_v50, 16  ;;  %v4463_v54 = vsub.f32 %v4387_v46, %v10992_v40 }
 0x309   : > { %3301 = vxpose.xlu1.b32.end [2/2] (short) (narrow) %v3299_v55, 16 }
 0x369   : > { %v3857_v15 = vpop.trf.xlu0 }
 0x36a   : > { %v3874_v2 = vsel %vm3332_vm1, %v3857_v15, 0 }
 0x36b   : > { %v10937_v8 = vand.u32 4294901760, %v3874_v2 }
 0x36d   : > { %v3858_v53 = vpop.trf.xlu0  ;;  %v10950_v42 = vsub.f32 %v3874_v2, %v10937_v8 }
 0x36e   : > { %v3877_v34 = vsel %vm3332_vm1, %v3858_v53, 0 }
 0x381   : > { %v3316_v58 = vpop.trf.xlu1 }
 0x382   : > { %v3334_v61 = vsel %vm3332_vm1, %v3316_v58, 0 }
 0x383   : > { %v10906_v63 = vand.u32 4294901760, %v3334_v61 }
 0x385   : > { %v3407_v3 = vsub.f32 %v3334_v61, %v10906_v63  ;;  %v3317_v7 = vpop.trf.xlu1  ;;  %8901 = vmatprep.mubr.f32.mxu1 %v10906_v63 }
 0x386   : > { %v3337_v13 = vsel %vm3332_vm1, %v3317_v7, 0 }
 0x387   : > { %v10919_v19 = vand.u32 4294901760, %v3337_v13  ;;  %v3408_v20 = vand.u32 4294901760, %v3407_v3 }
 0x389   : > { %v3417_v12 = vsub.f32 %v3337_v13, %v10919_v19  ;;  %8902 = vmatmul.mubr.f32.vlgmr.msra.gmra.mxu1 %v10919_v19  ;;  %v3409_v25 = vsub.f32 %v3407_v3, %v3408_v20 }
 0x38a   : > { %8912 = vmatpush3.msra.mxu1 %v10839_v6  ;;  %8915 = vmatprep.mubr.f32.mxu1 %v3408_v20 }
 0x38b   : > { %v3418_v4 = vand.u32 4294901760, %v3417_v12  ;;  %8913 = vmatprep.subr.mxu1 %v10843_v10  ;;  %v3410_v36 = vand.u32 4294901760, %v3409_v25 }
 0x38c   : > { %8914 = vmatpush3.msra.mxu1 %v10843_v10 }
 0x38d   : > { %v3419_v31 = vsub.f32 %v3417_v12, %v3418_v4  ;;  %8925 = vmatprep.subr.mxu1 %v10839_v6  ;;  %8894 = vmatprep.mubr.f32.mxu0 %v3410_v36 }
 0x38e   : > { %8916 = vmatmul.mubr.f32.vlgmr.msra.gmra.mxu1 %v3418_v4 }
 0x38f   : > { %v3420_v14 = vand.u32 4294901760, %v3419_v31  ;;  %8926 = vmatpush3.msra.mxu1 %v10839_v6  ;;  %8929 = vmatprep.mubr.f32.mxu1 %v10906_v63  ;;  %v10952_v6 = vand.u32 4294901760, %v3877_v34 }
 0x390   : > { %8927 = vmatprep.subr.mxu1 %v10843_v10 }
 0x391   : > { %8928 = vmatpush3.msra.mxu1 %v10843_v10  ;;  %8895 = vmatmul.mubr.f32.vlgmr.msra.gmra.mxu0 %v3420_v14  ;;  %v10958_v10 = vsub.f32 %v4393_v32, %v10945_v26  ;;  %v3957_v43 = vsub.f32 %v3877_v34, %v10952_v6 }
 0x392   : > { %8939 = vmatprep.subr.mxu1 %v3999_v45  ;;  %8905 = vmatpush3.msra.mxu0 %v10847_v11  ;;  %v3948_v11 = vand.u32 4294901760, %v10950_v42 }
 0x393   : > { %8930 = vmatmul.mubr.f32.vlgmr.msra.gmra.mxu1 %v10919_v19  ;;  %8906 = vmatprep.subr.mxu0 %v10855_v39  ;;  %v10975_v18 = vand.u32 4294901760, %v10958_v10 }
 0x394   : > { %8940 = vmatpush3.msra.mxu1 %v3999_v45  ;;  %8908 = vmatprep.mubr.f32.mxu0 %v3407_v3  ;;  %v3949_v27 = vsub.f32 %v10950_v42, %v3948_v11 }
 0x395   : > { %8941 = vmatprep.subr.mxu1 %v4006_v44  ;;  %8943 = vmatprep.mubr.f32.mxu1 %v10937_v8 }
 0x396   : > { %8907 = vmatpush3.msra.mxu0 %v10855_v39  ;;  %8942 = vmatpush3.msra.mxu1 %v4006_v44  ;;  %v3958_v39 = vand.u32 4294901760, %v3957_v43  ;;  %v3950_v49 = vand.u32 4294901760, %v3949_v27 }
 0x397   : > { %8918 = vmatprep.subr.mxu0 %v10858_v29  ;;  %8953 = vmatprep.subr.mxu1 %v10900_v57 }
 0x398   : > { %8909 = vmatmul.mubr.f32.vlgmr.msra.gmra.mxu0 %v3417_v12  ;;  %8944 = vmatmul.mubr.f32.vlgmr.msra.gmra.mxu1 %v10952_v6  ;;  %v3959_v38 = vsub.f32 %v3957_v43, %v3958_v39 }
 0x399   : > { %8919 = vmatpush3.msra.mxu0 %v10858_v29  ;;  %8954 = vmatpush3.msra.mxu1 %v10900_v57  ;;  %v4514_v29 = vsub.f32 %v10958_v10, %v10975_v18 }
 0x39a   : > { %8920 = vmatprep.subr.mxu0 %v10866_v41  ;;  %8922 = vmatprep.mubr.f32.mxu0 %v10906_v63  ;;  %v3960_v55 = vand.u32 4294901760, %v3959_v38  ;;  %v11028_v63 = vsub.f32 %v10744_v21, %v11018_v59 }
 0x39b   : > { %8955 = vmatprep.subr.mxu1 %v10904_v62  ;;  %8957 = vmatprep.mubr.f32.mxu1 %v3948_v11  ;;  %v4515_v50 = vand.u32 4294901760, %v4514_v29 }
 0x39c   : > { %8921 = vmatpush3.msra.mxu0 %v10866_v41  ;;  %8956 = vmatpush3.msra.mxu1 %v10904_v62  ;;  %v4389_v41 = vsel %vm456_vm0, %v10768_v22, 0  ;;  %v4522_v22 = vand.u32 4294901760, %v4521_v51  ;;  %v11041_v7 = vand.u32 4294901760, %v11028_v63 }
 0x39d   : > { %8932 = vmatprep.subr.mxu0 %v10900_v57  ;;  %8967 = vmatprep.subr.mxu1 %v10900_v57  ;;  %v11008_v56 = vand.u32 4294901760, %v4389_v41 }
 0x39e   : > { %8923 = vmatmul.mubr.f32.vlgmr.msra.gmra.mxu0 %v10919_v19  ;;  %8958 = vmatmul.mubr.f32.vlgmr.msra.gmra.mxu1 %v3958_v39 }
 0x39f   : > { %8933 = vmatpush3.msra.mxu0 %v10900_v57  ;;  %8968 = vmatpush3.msra.mxu1 %v10900_v57  ;;  %v4464_v57 = vand.u32 4294901760, %v4463_v54  ;;  %v4473_v58 = vsub.f32 %v4389_v41, %v11008_v56 }
 0x3a0   : > { %8934 = vmatprep.subr.mxu0 %v10904_v62  ;;  %8936 = vmatprep.mubr.f32.mxu0 %v3950_v49 }
 0x3a1   : > { %8969 = vmatprep.subr.mxu1 %v10904_v62  ;;  %8971 = vmatprep.mubr.f32.mxu1 %v10937_v8  ;;  %v4465_v61 = vsub.f32 %v4463_v54, %v4464_v57 }
 0x3a2   : > { %8935 = vmatpush3.msra.mxu0 %v10904_v62  ;;  %8970 = vmatpush3.msra.mxu1 %v10904_v62  ;;  %v4474_v62 = vand.u32 4294901760, %v4473_v58 }
 0x3a3   : > { %8946 = vmatprep.subr.mxu0 %v10910_v1  ;;  %8981 = vmatprep.subr.mxu1 %v4515_v50  ;;  %v4466_v3 = vand.u32 4294901760, %v4465_v61 }
 0x3a4   : > { %8937 = vmatmul.mubr.f32.vlgmr.msra.gmra.mxu0 %v3960_v55  ;;  %8972 = vmatmul.mubr.f32.vlgmr.msra.gmra.mxu1 %v10952_v6  ;;  %v4475_v21 = vsub.f32 %v4473_v58, %v4474_v62 }
 0x3a5   : > { %8947 = vmatpush3.msra.mxu0 %v10910_v1  ;;  %8982 = vmatpush3.xpose.msra.mxu1 %v4515_v50  ;;  %v11033_v1 = vand.u32 4294901760, %v10740_v5 }
 0x3a6   : > { %8948 = vmatprep.subr.mxu0 %v10917_v17  ;;  %8950 = vmatprep.mubr.f32.mxu0 %v10950_v42  ;;  %v4476_v15 = vand.u32 4294901760, %v4475_v21 }
 0x3a7   : > { %8983 = vmatprep.subr.mxu1 %v4522_v22  ;;  %8985 = vmatprep.mubr.f32.mxu1 %v10992_v40  ;;  %v11045_v13 = vsub.f32 %v10740_v5, %v11033_v1 }
 0x3a8   : > { %8949 = vmatpush3.msra.mxu0 %v10917_v17  ;;  %v5063_v17 = vsub.f32 %v11028_v63, %v11041_v7 }
 0x3a9   : > { %8960 = vmatprep.subr.mxu0 %v10922_v24  ;;  %8951 = vmatmul.mubr.f32.vlgmr.msra.gmra.mxu0 %v3957_v43  ;;  %v11055_v19 = vand.u32 4294901760, %v11045_v13 }
 0x3aa   : > { %8961 = vmatpush3.msra.mxu0 %v10922_v24  ;;  %8984 = vmatpush3.xpose.msra.mxu1 %v4522_v22  ;;  %v5064_v5 = vand.u32 4294901760, %v5063_v17 }
 0x3ab   : > { %8962 = vmatprep.subr.mxu0 %v10930_v47  ;;  %8964 = vmatprep.mubr.f32.mxu0 %v10937_v8  ;;  %v5070_v20 = vsub.f32 %v11045_v13, %v11055_v19 }
 0x3ac   : > { %8995 = vmatprep.subr.mxu1 %v10945_v26  ;;  %8963 = vmatpush3.msra.mxu0 %v10930_v47 }
 0x3ad   : > { %8974 = vmatprep.subr.mxu0 %v10945_v26  ;;  %8986 = vmatmul.mubr.f32.vlgmr.msra.gmra.mxu1 %v11008_v56  ;;  %v5071_v24 = vand.u32 4294901760, %v5070_v20 }
 0x3ae   : > { %8965 = vmatmul.mubr.f32.vlgmr.msra.gmra.mxu0 %v10952_v6  ;;  %8996 = vmatpush3.xpose.msra.mxu1 %v10945_v26 }
 0x3af   : > { %8975 = vmatpush3.xpose.msra.mxu0 %v10945_v26  ;;  %8999 = vmatprep.mubr.f32.mxu1 %v4464_v57 }
 0x3b0   : > { %8976 = vmatprep.subr.mxu0 %v10960_v35  ;;  %8978 = vmatprep.mubr.f32.mxu0 %v4466_v3 }
 0x3b1   : > { %8997 = vmatprep.subr.mxu1 %v10960_v35 }
 0x3b2   : > { %8998 = vmatpush3.xpose.msra.mxu1 %v10960_v35 }
 0x3b3   : > { %8977 = vmatpush3.xpose.msra.mxu0 %v10960_v35  ;;  %9009 = vmatprep.subr.mxu1 %v10945_v26 }
 0x3b4   : > { %8988 = vmatprep.subr.mxu0 %v10958_v10 }
 0x3b5   : > { %9000 = vmatmul.mubr.f32.vlgmr.msra.gmra.mxu1 %v4474_v62 }
 0x3b6   : > { %8979 = vmatmul.mubr.f32.vlgmr.msra.gmra.mxu0 %v4476_v15  ;;  %9010 = vmatpush3.xpose.msra.mxu1 %v10945_v26 }
 0x3b7   : > { %8989 = vmatpush3.xpose.msra.mxu0 %v10958_v10  ;;  %8992 = vmatprep.mubr.f32.mxu0 %v4463_v54 }
 0x3b8   : > { %9013 = vmatprep.mubr.f32.mxu1 %v10992_v40  ;;  %8990 = vmatprep.subr.mxu0 %v10970_v60 }
 0x3b9   : > { %9011 = vmatprep.subr.mxu1 %v10960_v35 }
 0x3ba   : > { %9012 = vmatpush3.xpose.msra.mxu1 %v10960_v35 }
 0x3bb   : > { %8991 = vmatpush3.xpose.msra.mxu0 %v10970_v60  ;;  %9023 = vmatprep.subr.mxu1 %v5064_v5 }
 0x3bc   : > { %9002 = vmatprep.subr.mxu0 %v10975_v18 }
 0x3bd   : > { %9014 = vmatmul.mubr.f32.vlgmr.msra.gmra.mxu1 %v11008_v56 }
 0x3be   : > { %8993 = vmatmul.mubr.f32.vlgmr.msra.gmra.mxu0 %v4473_v58  ;;  %9024 = vmatpush3.msra.mxu1 %v5064_v5 }
 0x3bf   : > { %9003 = vmatpush3.xpose.msra.mxu0 %v10975_v18  ;;  %9006 = vmatprep.mubr.f32.mxu0 %v10992_v40 }
 0x3c0   : > { %9004 = vmatprep.subr.mxu0 %v10990_v48  ;;  %9025 = vmatprep.subr.mxu1 %v5071_v24 }
 0x3c1   : > { %9026 = vmatpush3.msra.mxu1 %v5071_v24 }
 0x3c2   : > { %9037 = vmatprep.subr.mxu1 %v11018_v59 }
 0x3c3   : > { %9005 = vmatpush3.xpose.msra.mxu0 %v10990_v48 }
 0x3c4   : > { %9016 = vmatprep.subr.mxu0 %v11018_v59 }
 0x3c6   : > { %9007 = vmatmul.mubr.f32.vlgmr.msra.gmra.mxu0 %v11008_v56 }
 0x3c7   : > { %9017 = vmatpush3.msra.mxu0 %v11018_v59 }
 0x3c8   : > { %9018 = vmatprep.subr.mxu0 %v11033_v1 }
 0x3c9   : > { %9019 = vmatpush3.msra.mxu0 %v11033_v1 }
 0x3ca   : > { %9030 = vmatprep.subr.mxu0 %v11028_v63 }
 0x449   : > { %v8903_v12 = vpop.f32.mrf.mxu1 }
 0x44b   : > { %v3503_v25 = vpop.f32.mrf.mxu1 }
 0x44e   : > { %v8917_v4 = vpop.f32.mrf.mxu1 }
 0x450   : > { %v3667_v36 = vpop.f32.mrf.mxu1 }
 0x451   : > { %v8896_v2 = vpop.f32.mrf.mxu0 }
 0x452   : > { %v3510_v47 = vadd.f32 %v8903_v12, %v8896_v2 }
 0x453   : > { %v3412_v53 = vpop.f32.mrf.mxu0  ;;  %v8931_v31 = vpop.f32.mrf.mxu1 }
 0x454   : > { %v3504_v30 = vadd.f32 %v3503_v25, %v3412_v53 }
 0x455   : > { %v3831_v14 = vpop.f32.mrf.mxu1 }
 0x458   : > { %v8910_v32 = vpop.f32.mrf.mxu0  ;;  %v8945_v16 = vpop.f32.mrf.mxu1 }
 0x459   : > { %v3593_v8 = vadd.f32 %v8910_v32, %v3510_v47 }
 0x45a   : > { %v3585_v34 = vpop.f32.mrf.mxu0  ;;  %v4043_v43 = vpop.f32.mrf.mxu1 }
 0x45b   : > { %v3586_v23 = vadd.f32 %v3585_v34, %v3504_v30  ;;  %v3676_v45 = vadd.f32 %v8917_v4, %v3593_v8 }
 0x45d   : > { %v3668_v26 = vadd.f32 %v3667_v36, %v3586_v23 }
 0x45e   : > { %v8924_v42 = vpop.f32.mrf.mxu0  ;;  %v8959_v39 = vpop.f32.mrf.mxu1 }
 0x45f   : > { %v3759_v6 = vadd.f32 %v8924_v42, %v3676_v45 }
 0x460   : > { %v3752_v44 = vpop.f32.mrf.mxu0  ;;  %v4207_v38 = vpop.f32.mrf.mxu1 }
 0x461   : > { %v3753_v10 = vadd.f32 %v3752_v44, %v3668_v26  ;;  %v3838_v35 = vadd.f32 %v8931_v31, %v3759_v6  ;;  %v8323_v6 = vld [vmem:[%s12447_s3 + $0x20] sm:$0xff] }
 0x463   : > { %v3832_v11 = vadd.f32 %v3831_v14, %v3753_v10 }
 0x464   : > { %v8938_v60 = vpop.f32.mrf.mxu0  ;;  %v8973_v54 = vpop.f32.mrf.mxu1 }
 0x465   : > { %v3963_v18 = vadd.f32 %v8938_v60, %v3838_v35 }
 0x466   : > { %v3952_v27 = vpop.f32.mrf.mxu0  ;;  %v4371_v62 = vpop.f32.mrf.mxu1 }
 0x467   : > { %v3953_v46 = vadd.f32 %v3952_v27, %v3832_v11  ;;  %v4050_v29 = vadd.f32 %v8945_v16, %v3963_v18 }
 0x469   : > { %v8952_v48 = vpop.f32.mrf.mxu0  ;;  %v4044_v40 = vadd.f32 %v4043_v43, %v3953_v46  ;;  %v8324_v43 = vld [vmem:[%s12447_s3 + $0x28] sm:$0xff] }
 0x46a   : > { %v4133_v49 = vadd.f32 %v8952_v48, %v4050_v29 }
 0x46b   : > { %v4125_v41 = vpop.f32.mrf.mxu0 }
 0x46c   : > { %v4126_v50 = vadd.f32 %v4125_v41, %v4044_v40  ;;  %v4216_v51 = vadd.f32 %v8959_v39, %v4133_v49 }
 0x46d   : > { %v8987_v15 = vpop.f32.mrf.mxu1 }
 0x46e   : > { %v8966_v55 = vpop.f32.mrf.mxu0  ;;  %v4208_v56 = vadd.f32 %v4207_v38, %v4126_v50 }
 0x46f   : > { %v4299_v22 = vadd.f32 %v8966_v55, %v4216_v51  ;;  %v4559_v5 = vpop.f32.mrf.mxu1 }
 0x470   : > { %v4292_v57 = vpop.f32.mrf.mxu0 }
 0x471   : > { %v11078_v58 = vadd.f32 %v8973_v54, %v4299_v22  ;;  %v4293_v61 = vadd.f32 %v4292_v57, %v4208_v56  ;;  %v5478_v22 = vld [vmem:[%s12449_s5 + $0x60] sm:$0xff] }
 0x473   : > { %v11080_v3 = vadd.f32 %v4371_v62, %v4293_v61 }
 0x475   : > { %v9001_v12 = vpop.f32.mrf.mxu1 }
 0x476   : > { %v8980_v21 = vpop.f32.mrf.mxu0 }
 0x477   : > { %v4566_v24 = vadd.f32 %v8987_v15, %v8980_v21  ;;  %v4723_v47 = vpop.f32.mrf.mxu1  ;;  %v11145_v21 = vand.u32 4294901760, %v5478_v22  ;;  %v5477_v15 = vld [vmem:[%s12449_s5 + $0x58] sm:$0xff] }
 0x478   : > { %v4468_v17 = vpop.f32.mrf.mxu0 }
 0x479   : > { %v4560_v4 = vadd.f32 %v4559_v5, %v4468_v17 }
 0x47d   : > { %v9015_v30 = vpop.f32.mrf.mxu1 }
 0x47e   : > { %v8994_v20 = vpop.f32.mrf.mxu0 }
 0x47f   : > { %v4649_v2 = vadd.f32 %v8994_v20, %v4566_v24  ;;  %v4887_v45 = vpop.f32.mrf.mxu1  ;;  %v11158_v24 = vsub.f32 %v5478_v22, %v11145_v21 }
 0x480   : > { %v4641_v25 = vpop.f32.mrf.mxu0 }
 0x481   : > { %v4642_v36 = vadd.f32 %v4641_v25, %v4560_v4  ;;  %v4732_v53 = vadd.f32 %v9001_v12, %v4649_v2  ;;  %v11161_v12 = vand.u32 4294901760, %v5477_v15  ;;  %v5476_v25 = vld [vmem:[%s12449_s5 + $0x50] sm:$0xff] }
 0x483   : > { %v4724_v8 = vadd.f32 %v4723_v47, %v4642_v36  ;;  %v11170_v36 = vand.u32 4294901760, %v11158_v24  ;;  %v11172_v47 = vand.u32 4294901760, %v5476_v25 }
 0x486   : > { %v9008_v31 = vpop.f32.mrf.mxu0 }
 0x487   : > { %v4815_v32 = vadd.f32 %v9008_v31, %v4732_v53  ;;  %v11175_v53 = vsub.f32 %v5477_v15, %v11161_v12  ;;  %v5469_v15 = vld [vmem:[%s12449_s5 + $0x18] sm:$0xff] }
 0x488   : > { %v4808_v14 = vpop.f32.mrf.mxu0 }
 0x489   : > { %v4894_v34 = vadd.f32 %v9015_v30, %v4815_v32  ;;  %v4809_v23 = vadd.f32 %v4808_v14, %v4724_v8  ;;  %v5475_v30 = vld [vmem:[%s12449_s5 + $0x48] sm:$0xff]  ;;  %v5608_v32 = vsub.f32 %v11158_v24, %v11170_v36  ;;  %v11184_v8 = vsub.f32 %v5476_v25, %v11172_v47 }
 0x48a   : > { %v11186_v14 = vand.u32 4294901760, %v5475_v30 }
 0x48b   : > { %v4888_v26 = vadd.f32 %v4887_v45, %v4809_v23  ;;  %9827 = vtanh.f32 %v4894_v34  ;;  %v11190_v34 = vand.u32 4294901760, %v11175_v53  ;;  %v5474_v23 = vld [vmem:[%s12449_s5 + $0x40] sm:$0xff]  ;;  %v5609_v45 = vand.u32 4294901760, %v5608_v32 }
 0x48d   : > { %9829 = vtanh.f32 %v4888_v26  ;;  %12509 = vst [vmem:[#allocation14_spill] sm:$0xff] %v11190_v34  ;;  %v11197_v26 = vand.u32 4294901760, %v11184_v8 }
 0x48f   : > { %12510 = vst [vmem:[#allocation15_spill] sm:$0xff] %v11197_v26 }
 0x498   : > { %v9828_v16 = vpop.eup %9827 }
 0x499   : > { %v4903_v35 = vmul.f32 %v9828_v16, %v10881_v28  ;;  %v11200_v16 = vsub.f32 %v5475_v30, %v11186_v14  ;;  %v5468_v30 = vld [vmem:[%s12449_s5 + $0x10] sm:$0xff] }
 0x49a   : > { %v9830_v42 = vpop.eup %9829 }
 0x49b   : > { %v4902_v44 = vmul.f32 %v9830_v42, %v10881_v28  ;;  %v4905_v11 = vadd.f32 %v8324_v43, %v4903_v35  ;;  %v11202_v42 = vand.u32 4294901760, %v5474_v23  ;;  %v11214_v35 = vand.u32 4294901760, %v11200_v16 }
 0x49d   : > { %v4904_v10 = vadd.f32 %v8323_v6, %v4902_v44  ;;  %v5615_v6 = vsub.f32 %v11175_v53, %v11190_v34  ;;  %v5473_v44 = vld [vmem:[%s12449_s5 + $0x38] sm:$0xff]  ;;  %12511 = vst [vmem:[#allocation16_spill] sm:$0xff] %v11214_v35  ;;  %v11217_v43 = vsub.f32 %v5474_v23, %v11202_v42 }
 0x49f   : > { %4906 = vxpose.xlu0.b32.start [1/2] (short) (narrow) %v4904_v10, 16  ;;  %v5622_v10 = vsub.f32 %v11184_v8, %v11197_v26 }
 0x4a3   : > { %4907 = vxpose.xlu0.b32.end [2/2] (short) (narrow) %v4905_v11, 16  ;;  %v11219_v11 = vand.u32 4294901760, %v5473_v44 }
 0x51b   : > { %v4922_v60 = vpop.trf.xlu0 }
 0x51c   : > { %v4939_v18 = vsel %vm3332_vm1, %v4922_v60, 0  ;;  %v5616_v60 = vand.u32 4294901760, %v5615_v6 }
 0x51d   : > { %v5011_v39 = vand.u32 4294901760, %v4939_v18 }
 0x51f   : > { %v5012_v27 = vsub.f32 %v4939_v18, %v5011_v39  ;;  %v4923_v46 = vpop.trf.xlu0  ;;  %9027 = vmatprep.mubr.f32.mxu1 %v5011_v39  ;;  %v5472_v18 = vld [vmem:[%s12449_s5 + $0x30] sm:$0xff] }
 0x520   : > { %v4942_v29 = vsel %vm3332_vm1, %v4923_v46, 0  ;;  %v11229_v46 = vand.u32 4294901760, %v11217_v43 }
 0x521   : > { %v5021_v48 = vand.u32 4294901760, %v4942_v29  ;;  %v5013_v40 = vand.u32 4294901760, %v5012_v27 }
 0x522   : > { %12512 = vst [vmem:[#allocation17_spill] sm:$0xff] %v11229_v46 }
 0x523   : > { %v5022_v38 = vsub.f32 %v4942_v29, %v5021_v48  ;;  %9028 = vmatmul.mubr.f32.vlgmr.msra.gmra.mxu1 %v5021_v48  ;;  %v5014_v28 = vsub.f32 %v5012_v27, %v5013_v40  ;;  %v11232_v29 = vsub.f32 %v5473_v44, %v11219_v11  ;;  %v5467_v44 = vld [vmem:[%s12449_s5 + $0x8] sm:$0xff] }
 0x524   : > { %9038 = vmatpush3.msra.mxu1 %v11018_v59  ;;  %9041 = vmatprep.mubr.f32.mxu1 %v5013_v40  ;;  %v5471_v40 = vld [vmem:[%s12449_s5 + $0x28] sm:$0xff] }
 0x525   : > { %v5023_v49 = vand.u32 4294901760, %v5022_v38  ;;  %9039 = vmatprep.subr.mxu1 %v11033_v1  ;;  %v5015_v41 = vand.u32 4294901760, %v5014_v28  ;;  %v5636_v28 = vsub.f32 %v11217_v43, %v11229_v46 }
 0x526   : > { %9040 = vmatpush3.msra.mxu1 %v11033_v1 }
 0x527   : > { %v5024_v50 = vsub.f32 %v5022_v38, %v5023_v49  ;;  %9051 = vmatprep.subr.mxu1 %v11018_v59  ;;  %9020 = vmatprep.mubr.f32.mxu0 %v5015_v41  ;;  %v11246_v41 = vand.u32 4294901760, %v5471_v40 }
 0x528   : > { %9042 = vmatmul.mubr.f32.vlgmr.msra.gmra.mxu1 %v5023_v49  ;;  %v11244_v49 = vand.u32 4294901760, %v11232_v29 }
 0x529   : > { %v5025_v51 = vand.u32 4294901760, %v5024_v50  ;;  %9052 = vmatpush3.msra.mxu1 %v11018_v59  ;;  %9055 = vmatprep.mubr.f32.mxu1 %v5011_v39  ;;  %v5481_v59 = vld [vmem:[%s12449_s5 + $0x78] sm:$0xff] }
 0x52a   : > { %9053 = vmatprep.subr.mxu1 %v11033_v1  ;;  %12513 = vst [vmem:[#allocation18_spill] sm:$0xff] %v11244_v49 }
 0x52b   : > { %9054 = vmatpush3.msra.mxu1 %v11033_v1  ;;  %9021 = vmatmul.mubr.f32.vlgmr.msra.gmra.mxu0 %v5025_v51  ;;  %v5480_v1 = vld [vmem:[%s12449_s5 + $0x70] sm:$0xff]  ;;  %v5470_v51 = vld [vmem:[%s12449_s5 + $0x20] sm:$0xff] }
 0x52c   : > { %9031 = vmatpush3.msra.mxu0 %v11028_v63  ;;  %9056 = vmatmul.mubr.f32.vlgmr.msra.gmra.mxu1 %v5021_v48  ;;  %v11109_v63 = vand.u32 4294901760, %v5481_v59  ;;  %v11261_v22 = vand.u32 4294901760, %v5470_v51 }
 0x52d   : > { %9032 = vmatprep.subr.mxu0 %v11045_v13  ;;  %9034 = vmatprep.mubr.f32.mxu0 %v5012_v27  ;;  %v5629_v27 = vsub.f32 %v11200_v16, %v11214_v35  ;;  %v8325_v35 = vld [vmem:[#allocation5] ss:$0 sm:$0xff] }
 0x52e   : > { %9033 = vmatpush3.msra.mxu0 %v11045_v13  ;;  %v11115_v13 = vsub.f32 %v5481_v59, %v11109_v63  ;;  %v5637_v59 = vand.u32 4294901760, %v5636_v28  ;;  %v11275_v25 = vsub.f32 %v5470_v51, %v11261_v22 }
 0x52f   : > { %9044 = vmatprep.subr.mxu0 %v11041_v7  ;;  %9035 = vmatmul.mubr.f32.vlgmr.msra.gmra.mxu0 %v5022_v38  ;;  %v5630_v38 = vand.u32 4294901760, %v5629_v27  ;;  %v11310_v27 = vand.u32 4294901760, %v5467_v44 }
 0x530   : > { %9045 = vmatpush3.msra.mxu0 %v11041_v7  ;;  %9048 = vmatprep.mubr.f32.mxu0 %v5011_v39  ;;  %v11117_v7 = vand.u32 4294901760, %v5480_v1  ;;  %v11125_v54 = vand.u32 4294901760, %v11115_v13  ;;  %v5623_v39 = vand.u32 4294901760, %v5622_v10  ;;  %v11289_v32 = vand.u32 4294901760, %v11275_v25 }
 0x531   : > { %9046 = vmatprep.subr.mxu0 %v11055_v19 }
 0x532   : > { %9047 = vmatpush3.msra.mxu0 %v11055_v19  ;;  %v5479_v19 = vld [vmem:[%s12449_s5 + $0x68] sm:$0xff]  ;;  %v11128_v55 = vsub.f32 %v5480_v1, %v11117_v7  ;;  %v5587_v57 = vsub.f32 %v11115_v13, %v11125_v54  ;;  %v5643_v1 = vsub.f32 %v11232_v29, %v11244_v49  ;;  %12516 = vst [vmem:[#allocation21_spill] sm:$0xff] %v11289_v32 }
 0x533   : > { %9049 = vmatmul.mubr.f32.vlgmr.msra.gmra.mxu0 %v5021_v48  ;;  %9058 = vmatprep.subr.mxu0 %v11109_v63  ;;  %v11130_v56 = vand.u32 4294901760, %v5479_v19  ;;  %v11235_v48 = vand.u32 4294901760, %v5472_v18 }
 0x534   : > { %9059 = vmatpush3.msra.mxu0 %v11109_v63  ;;  %v11140_v61 = vand.u32 4294901760, %v11128_v55  ;;  %v5588_v17 = vand.u32 4294901760, %v5587_v57 }
 0x535   : > { %9060 = vmatprep.subr.mxu0 %v11117_v7  ;;  %v11143_v62 = vsub.f32 %v5479_v19, %v11130_v56  ;;  %v11250_v50 = vsub.f32 %v5472_v18, %v11235_v48  ;;  %v11259_v19 = vsub.f32 %v5471_v40, %v11246_v41  ;;  %v5466_v40 = vld [vmem:[%s12449_s5] sm:$0xff] }
 0x536   : > { %9061 = vmatpush3.msra.mxu0 %v11117_v7  ;;  %v5594_v5 = vsub.f32 %v11128_v55, %v11140_v61  ;;  %9093 = vmatprep.subr.mxu1 %v5588_v17 }
 0x537   : > { %9062 = vmatprep.subr.mxu0 %v11130_v56  ;;  %v11155_v20 = vand.u32 4294901760, %v11143_v62  ;;  %9094 = vmatpush3.msra.mxu1 %v5588_v17  ;;  %v11265_v57 = vand.u32 4294901760, %v11250_v50  ;;  %v5644_v17 = vand.u32 4294901760, %v5643_v1  ;;  %v11325_v1 = vsub.f32 %v5467_v44, %v11310_v27 }
 0x538   : > { %9063 = vmatpush3.msra.mxu0 %v11130_v56  ;;  %v5595_v4 = vand.u32 4294901760, %v5594_v5  ;;  %v11272_v5 = vand.u32 4294901760, %v11259_v19 }
 0x539   : > { %9064 = vmatprep.subr.mxu0 %v11145_v21  ;;  %v5601_v2 = vsub.f32 %v11143_v62, %v11155_v20  ;;  %12514 = vst [vmem:[#allocation19_spill] sm:$0xff] %v11265_v57 }
 0x53a   : > { %9065 = vmatpush3.msra.mxu0 %v11145_v21  ;;  %9095 = vmatprep.subr.mxu1 %v5595_v4  ;;  %12515 = vst [vmem:[#allocation20_spill] sm:$0xff] %v11272_v5 }
 0x53b   : > { %9066 = vmatprep.subr.mxu0 %v11161_v12  ;;  %v5602_v31 = vand.u32 4294901760, %v5601_v2  ;;  %9096 = vmatpush3.msra.mxu1 %v5595_v4  ;;  %v11277_v4 = vand.u32 4294901760, %v5469_v15  ;;  %v5650_v2 = vsub.f32 %v11250_v50, %v11265_v57 }
 0x53c   : > { %9067 = vmatpush3.msra.mxu0 %v11161_v12 }
 0x53d   : > { %9068 = vmatprep.subr.mxu0 %v11172_v47  ;;  %9097 = vmatprep.subr.mxu1 %v5602_v31  ;;  %v11292_v23 = vsub.f32 %v5469_v15, %v11277_v4  ;;  %v5651_v6 = vand.u32 4294901760, %v5650_v2 }
 0x53e   : > { %9069 = vmatpush3.msra.mxu0 %v11172_v47  ;;  %9098 = vmatpush3.msra.mxu1 %v5602_v31  ;;  %v5657_v31 = vsub.f32 %v11259_v19, %v11272_v5 }
 0x53f   : > { %9070 = vmatprep.subr.mxu0 %v11186_v14  ;;  %9099 = vmatprep.subr.mxu1 %v5609_v45  ;;  %v11304_v18 = vand.u32 4294901760, %v11292_v23 }
 0x540   : > { %9071 = vmatpush3.msra.mxu0 %v11186_v14  ;;  %9100 = vmatpush3.msra.mxu1 %v5609_v45  ;;  %v11294_v45 = vand.u32 4294901760, %v5468_v30  ;;  %v5658_v10 = vand.u32 4294901760, %v5657_v31 }
 0x541   : > { %9072 = vmatprep.subr.mxu0 %v11202_v42  ;;  %9101 = vmatprep.subr.mxu1 %v5616_v60  ;;  %12517 = vst [vmem:[#allocation22_spill] sm:$0xff] %v11304_v18  ;;  %v5671_v28 = vsub.f32 %v11292_v23, %v11304_v18 }
 0x542   : > { %9073 = vmatpush3.msra.mxu0 %v11202_v42  ;;  %9102 = vmatpush3.msra.mxu1 %v5616_v60  ;;  %v5664_v60 = vsub.f32 %v11275_v25, %v11289_v32 }
 0x543   : > { %9074 = vmatprep.subr.mxu0 %v11219_v11  ;;  %9103 = vmatprep.subr.mxu1 %v5623_v39  ;;  %v5672_v15 = vand.u32 4294901760, %v5671_v28 }
 0x544   : > { %9075 = vmatpush3.msra.mxu0 %v11219_v11  ;;  %9104 = vmatpush3.msra.mxu1 %v5623_v39  ;;  %v11307_v39 = vsub.f32 %v5468_v30, %v11294_v45  ;;  %v11335_v30 = vand.u32 4294901760, %v11325_v1 }
 0x545   : > { %9076 = vmatprep.subr.mxu0 %v11235_v48  ;;  %9105 = vmatprep.subr.mxu1 %v5630_v38 }
 0x546   : > { %9077 = vmatpush3.msra.mxu0 %v11235_v48  ;;  %9106 = vmatpush3.msra.mxu1 %v5630_v38  ;;  %v5665_v38 = vand.u32 4294901760, %v5664_v60  ;;  %v11319_v51 = vand.u32 4294901760, %v11307_v39  ;;  %12519 = vst [vmem:[#allocation24_spill] sm:$0xff] %v11335_v30  ;;  %v5685_v44 = vsub.f32 %v11325_v1, %v11335_v30 }
 0x547   : > { %9078 = vmatprep.subr.mxu0 %v11246_v41  ;;  %9107 = vmatprep.subr.mxu1 %v5637_v59 }
 0x548   : > { %9079 = vmatpush3.msra.mxu0 %v11246_v41  ;;  %9108 = vmatpush3.msra.mxu1 %v5637_v59  ;;  %12518 = vst [vmem:[#allocation23_spill] sm:$0xff] %v11319_v51  ;;  %v11321_v59 = vand.u32 4294901760, %v5466_v40  ;;  %v5686_v60 = vand.u32 4294901760, %v5685_v44 }
 0x549   : > { %9080 = vmatprep.subr.mxu0 %v11261_v22  ;;  %9109 = vmatprep.subr.mxu1 %v5644_v17 }
 0x54a   : > { %9081 = vmatpush3.msra.mxu0 %v11261_v22  ;;  %9110 = vmatpush3.msra.mxu1 %v5644_v17  ;;  %v5678_v17 = vsub.f32 %v11307_v39, %v11319_v51  ;;  %v11331_v2 = vsub.f32 %v5466_v40, %v11321_v59 }
 0x54b   : > { %9082 = vmatprep.subr.mxu0 %v11277_v4  ;;  %9111 = vmatprep.subr.mxu1 %v5651_v6 }
 0x54c   : > { %9083 = vmatpush3.msra.mxu0 %v11277_v4  ;;  %9112 = vmatpush3.msra.mxu1 %v5651_v6  ;;  %v5679_v31 = vand.u32 4294901760, %v5678_v17  ;;  %v11339_v6 = vand.u32 4294901760, %v11331_v2 }
 0x54d   : > { %9084 = vmatprep.subr.mxu0 %v11294_v45  ;;  %9113 = vmatprep.subr.mxu1 %v5658_v10 }
 0x54e   : > { %9085 = vmatpush3.msra.mxu0 %v11294_v45  ;;  %9114 = vmatpush3.msra.mxu1 %v5658_v10  ;;  %12520 = vst [vmem:[#allocation25_spill] sm:$0xff] %v11339_v6  ;;  %v5692_v10 = vsub.f32 %v11331_v2, %v11339_v6 }
 0x54f   : > { %9086 = vmatprep.subr.mxu0 %v11310_v27  ;;  %9115 = vmatprep.subr.mxu1 %v5665_v38 }
 0x550   : > { %9087 = vmatpush3.msra.mxu0 %v11310_v27  ;;  %9116 = vmatpush3.msra.mxu1 %v5665_v38  ;;  %v5693_v40 = vand.u32 4294901760, %v5692_v10 }
 0x551   : > { %9088 = vmatprep.subr.mxu0 %v11321_v59  ;;  %9117 = vmatprep.subr.mxu1 %v5672_v15 }
 0x552   : > { %9089 = vmatpush3.msra.mxu0 %v11321_v59  ;;  %9118 = vmatpush3.msra.mxu1 %v5672_v15 }
 0x553   : > { %9128 = vmatprep.subr.mxu0 %v11115_v13  ;;  %9119 = vmatprep.subr.mxu1 %v5679_v31 }
 0x554   : > { %9120 = vmatpush3.msra.mxu1 %v5679_v31 }
 0x555   : > { %9121 = vmatprep.subr.mxu1 %v5686_v60 }
 0x556   : > { %9122 = vmatpush3.msra.mxu1 %v5686_v60 }
 0x557   : > { %9123 = vmatprep.subr.mxu1 %v5693_v40 }
 0x558   : > { %9124 = vmatpush3.msra.mxu1 %v5693_v40 }
 0x559   : > { %9163 = vmatprep.subr.mxu1 %v11109_v63 }
 0x5e3   : > { %v9029_v38 = vpop.f32.mrf.mxu1 }
 0x5e5   : > { %v5108_v28 = vpop.f32.mrf.mxu1 }
 0x5e8   : > { %v9043_v17 = vpop.f32.mrf.mxu1 }
 0x5ea   : > { %v5272_v15 = vpop.f32.mrf.mxu1 }
 0x5eb   : > { %v9022_v0 = vpop.f32.mrf.mxu0 }
 0x5ec   : > { %v5115_v33 = vadd.f32 %v9029_v38, %v9022_v0  ;;  %v9057_v10 = vpop.f32.mrf.mxu1 }
 0x5ed   : > { %v5017_v52 = vpop.f32.mrf.mxu0 }
 0x5ee   : > { %v5109_v51 = vadd.f32 %v5108_v28, %v5017_v52  ;;  %v5436_v46 = vpop.f32.mrf.mxu1  ;;  %v8326_v52 = vld [vmem:[#allocation5 + $0x1] ss:$0 sm:$0xff] }
 0x5ef   : > { %v9036_v30 = vpop.f32.mrf.mxu0 }
 0x5f0   : > { %v5198_v6 = vadd.f32 %v9036_v30, %v5115_v33 }
 0x5f1   : > { %v5190_v18 = vpop.f32.mrf.mxu0 }
 0x5f2   : > { %v5191_v44 = vadd.f32 %v5190_v18, %v5109_v51  ;;  %v5281_v31 = vadd.f32 %v9043_v17, %v5198_v6 }
 0x5f3   : > { %v9050_v32 = vpop.f32.mrf.mxu0 }
 0x5f4   : > { %v5364_v60 = vadd.f32 %v9050_v32, %v5281_v31  ;;  %v5273_v5 = vadd.f32 %v5272_v15, %v5191_v44 }
 0x5f5   : > { %v5357_v40 = vpop.f32.mrf.mxu0 }
 0x5f6   : > { %v5443_v57 = vadd.f32 %v9057_v10, %v5364_v60  ;;  %v5358_v49 = vadd.f32 %v5357_v40, %v5273_v5 }
 0x5f8   : > { %v5447_v26 = vadd.f32 %v5443_v57, %v11078_v58  ;;  %v5437_v34 = vadd.f32 %v5436_v46, %v5358_v49 }
 0x5fa   : > { %v5454_v0 = vmul.f32 %v8325_v35, %v5447_v26  ;;  %v5446_v38 = vadd.f32 %v5437_v34, %v11080_v3 }
 0x5fc   : > { %v5456_v33 = vadd.f32 %v5454_v0, %v10746_v37  ;;  %v5453_v18 = vmul.f32 %v8325_v35, %v5446_v38 }
 0x5fe   : > { %v5463_v51 = vadd.f32 %v8326_v52, %v5456_v33  ;;  %v5455_v30 = vadd.f32 %v5453_v18, %v10742_v9 }
 0x600   : > { %v11352_v32 = vmax.f32 %v5463_v51, 0.0  ;;  %v5462_v6 = vadd.f32 %v8326_v52, %v5455_v30 }
 0x602   : > { %v11354_v28 = vmax.f32 %v5462_v6, 0.0  ;;  %v11357_v5 = vand.u32 4294901760, %v11352_v32 }
 0x604   : > { %v11360_v58 = vand.u32 4294901760, %v11354_v28  ;;  %v11364_v3 = vsub.f32 %v11352_v32, %v11357_v5 }
 0x606   : > { %9125 = vmatprep.mubr.f32.mxu1 %v11360_v58  ;;  %v5564_v9 = vsub.f32 %v11354_v28, %v11360_v58  ;;  %v5575_v37 = vand.u32 4294901760, %v11364_v3 }
 0x607   : > { %9126 = vmatmul.mubr.f32.vlgmr.msra.gmra.mxu1 %v11357_v5 }
 0x608   : > { %9164 = vmatpush3.msra.mxu1 %v11109_v63  ;;  %v5565_v34 = vand.u32 4294901760, %v5564_v9  ;;  %v5576_v26 = vsub.f32 %v11364_v3, %v5575_v37 }
 0x609   : > { %9165 = vmatprep.subr.mxu1 %v11117_v7 }
 0x60a   : > { %9166 = vmatpush3.msra.mxu1 %v11117_v7  ;;  %9195 = vmatprep.mubr.f32.mxu1 %v5565_v34  ;;  %v5566_v35 = vsub.f32 %v5564_v9, %v5565_v34  ;;  %v5577_v49 = vand.u32 4294901760, %v5576_v26 }
 0x60b   : > { %9167 = vmatprep.subr.mxu1 %v11130_v56 }
 0x60c   : > { %9168 = vmatpush3.msra.mxu1 %v11130_v56  ;;  %v5567_v46 = vand.u32 4294901760, %v5566_v35 }
 0x60d   : > { %9169 = vmatprep.subr.mxu1 %v11145_v21 }
 0x60e   : > { %9170 = vmatpush3.msra.mxu1 %v11145_v21  ;;  %9090 = vmatprep.mubr.f32.mxu0 %v5567_v46 }
 0x60f   : > { %9171 = vmatprep.subr.mxu1 %v11161_v12  ;;  %9091 = vmatmul.mubr.f32.vlgmr.msra.gmra.mxu0 %v5577_v49 }
 0x610   : > { %9129 = vmatpush3.msra.mxu0 %v11115_v13  ;;  %9172 = vmatpush3.msra.mxu1 %v11161_v12  ;;  %v12522_v13 = vld [vmem:[#allocation15_spill] sm:$0xff] }
 0x611   : > { %9130 = vmatprep.subr.mxu0 %v11128_v55  ;;  %9160 = vmatprep.mubr.f32.mxu0 %v5564_v9 }
 0x612   : > { %9173 = vmatprep.subr.mxu1 %v11172_v47  ;;  %9131 = vmatpush3.msra.mxu0 %v11128_v55  ;;  %v12525_v55 = vld [vmem:[#allocation18_spill] sm:$0xff] }
 0x613   : > { %9174 = vmatpush3.msra.mxu1 %v11172_v47  ;;  %9132 = vmatprep.subr.mxu0 %v11143_v62 }
 0x614   : > { %9175 = vmatprep.subr.mxu1 %v11186_v14  ;;  %9133 = vmatpush3.msra.mxu0 %v11143_v62  ;;  %v12528_v62 = vld [vmem:[#allocation21_spill] sm:$0xff] }
 0x615   : > { %9176 = vmatpush3.msra.mxu1 %v11186_v14  ;;  %9134 = vmatprep.subr.mxu0 %v11158_v24 }
 0x616   : > { %9177 = vmatprep.subr.mxu1 %v11202_v42  ;;  %9135 = vmatpush3.msra.mxu0 %v11158_v24  ;;  %v12531_v24 = vmov 0.0  }
 0x617   : > { %9178 = vmatpush3.msra.mxu1 %v11202_v42  ;;  %9136 = vmatprep.subr.mxu0 %v11175_v53  ;;  %v6290_v10 = vrot.slane %v12531_v24, 1  ;;  %v6300_v52 = vrot.slane %v12531_v24, 2 }
 0x618   : > { %9179 = vmatprep.subr.mxu1 %v11219_v11  ;;  %9137 = vmatpush3.msra.mxu0 %v11175_v53 }
 0x619   : > { %9180 = vmatpush3.msra.mxu1 %v11219_v11  ;;  %9138 = vmatprep.subr.mxu0 %v11184_v8 }
 0x61a   : > { %9181 = vmatprep.subr.mxu1 %v11235_v48  ;;  %9139 = vmatpush3.msra.mxu0 %v11184_v8 }
 0x61b   : > { %9182 = vmatpush3.msra.mxu1 %v11235_v48  ;;  %9140 = vmatprep.subr.mxu0 %v11200_v16 }
 0x61c   : > { %9183 = vmatprep.subr.mxu1 %v11246_v41  ;;  %9141 = vmatpush3.msra.mxu0 %v11200_v16 }
 0x61d   : > { %9184 = vmatpush3.msra.mxu1 %v11246_v41  ;;  %9142 = vmatprep.subr.mxu0 %v11217_v43 }
 0x61e   : > { %9185 = vmatprep.subr.mxu1 %v11261_v22  ;;  %9143 = vmatpush3.msra.mxu0 %v11217_v43 }
 0x61f   : > { %9186 = vmatpush3.msra.mxu1 %v11261_v22  ;;  %9144 = vmatprep.subr.mxu0 %v11232_v29 }
 0x620   : > { %9187 = vmatprep.subr.mxu1 %v11277_v4  ;;  %9145 = vmatpush3.msra.mxu0 %v11232_v29 }
 0x621   : > { %9188 = vmatpush3.msra.mxu1 %v11277_v4  ;;  %9146 = vmatprep.subr.mxu0 %v11250_v50 }
 0x622   : > { %9189 = vmatprep.subr.mxu1 %v11294_v45  ;;  %9147 = vmatpush3.msra.mxu0 %v11250_v50 }
 0x623   : > { %9190 = vmatpush3.msra.mxu1 %v11294_v45  ;;  %9148 = vmatprep.subr.mxu0 %v11259_v19 }
 0x624   : > { %9191 = vmatprep.subr.mxu1 %v11310_v27  ;;  %9149 = vmatpush3.msra.mxu0 %v11259_v19 }
 0x625   : > { %9192 = vmatpush3.msra.mxu1 %v11310_v27  ;;  %9150 = vmatprep.subr.mxu0 %v11275_v25 }
 0x626   : > { %9193 = vmatprep.subr.mxu1 %v11321_v59  ;;  %9151 = vmatpush3.msra.mxu0 %v11275_v25 }
 0x627   : > { %9194 = vmatpush3.msra.mxu1 %v11321_v59  ;;  %9152 = vmatprep.subr.mxu0 %v11292_v23 }
 0x628   : > { %9196 = vmatmul.mubr.f32.vlgmr.msra.gmra.mxu1 %v5575_v37  ;;  %9233 = vmatprep.subr.mxu1 %v11109_v63 }
 0x629   : > { %9153 = vmatpush3.msra.mxu0 %v11292_v23  ;;  %9234 = vmatpush3.msra.mxu1 %v11109_v63  ;;  %v12521_v63 = vld [vmem:[#allocation14_spill] sm:$0xff] }
 0x62a   : > { %9265 = vmatprep.mubr.f32.mxu1 %v11360_v58  ;;  %9154 = vmatprep.subr.mxu0 %v11307_v39 }
 0x62b   : > { %9235 = vmatprep.subr.mxu1 %v11117_v7  ;;  %9155 = vmatpush3.msra.mxu0 %v11307_v39 }
 0x62c   : > { %9236 = vmatpush3.msra.mxu1 %v11117_v7  ;;  %9156 = vmatprep.subr.mxu0 %v11325_v1  ;;  %v12523_v7 = vld [vmem:[#allocation16_spill] sm:$0xff] }
 0x62d   : > { %9237 = vmatprep.subr.mxu1 %v11130_v56  ;;  %9157 = vmatpush3.msra.mxu0 %v11325_v1 }
 0x62e   : > { %9238 = vmatpush3.msra.mxu1 %v11130_v56  ;;  %9158 = vmatprep.subr.mxu0 %v11331_v2  ;;  %v12526_v56 = vld [vmem:[#allocation19_spill] sm:$0xff] }
 0x62f   : > { %9239 = vmatprep.subr.mxu1 %v11145_v21  ;;  %9159 = vmatpush3.msra.mxu0 %v11331_v2 }
 0x630   : > { %9240 = vmatpush3.msra.mxu1 %v11145_v21  ;;  %9161 = vmatmul.mubr.f32.vlgmr.msra.gmra.mxu0 %v11364_v3  ;;  %v12529_v21 = vld [vmem:[#allocation22_spill] sm:$0xff] }
 0x631   : > { %9198 = vmatprep.subr.mxu0 %v11125_v54  ;;  %9241 = vmatprep.subr.mxu1 %v11161_v12 }
 0x632   : > { %9199 = vmatpush3.msra.mxu0 %v11125_v54  ;;  %9230 = vmatprep.mubr.f32.mxu0 %v11360_v58  ;;  %v12524_v54 = vld [vmem:[#allocation17_spill] sm:$0xff] }
 0x633   : > { %9242 = vmatpush3.msra.mxu1 %v11161_v12  ;;  %9200 = vmatprep.subr.mxu0 %v11140_v61  ;;  %v12532_v12 = vld [vmem:[#allocation24_spill] sm:$0xff] }
 0x634   : > { %9243 = vmatprep.subr.mxu1 %v11172_v47  ;;  %9201 = vmatpush3.msra.mxu0 %v11140_v61  ;;  %v12527_v61 = vld [vmem:[#allocation20_spill] sm:$0xff] }
 0x635   : > { %9244 = vmatpush3.msra.mxu1 %v11172_v47  ;;  %9202 = vmatprep.subr.mxu0 %v11155_v20 }
 0x636   : > { %9245 = vmatprep.subr.mxu1 %v11186_v14  ;;  %9203 = vmatpush3.msra.mxu0 %v11155_v20  ;;  %v12530_v20 = vld [vmem:[#allocation23_spill] sm:$0xff] }
 0x637   : > { %9246 = vmatpush3.msra.mxu1 %v11186_v14  ;;  %9204 = vmatprep.subr.mxu0 %v11170_v36 }
 0x638   : > { %9247 = vmatprep.subr.mxu1 %v11202_v42  ;;  %9205 = vmatpush3.msra.mxu0 %v11170_v36  ;;  %v12533_v36 = vld [vmem:[#allocation25_spill] sm:$0xff] }
 0x639   : > { %9248 = vmatpush3.msra.mxu1 %v11202_v42  ;;  %9206 = vmatprep.subr.mxu0 %v12521_v63 }
 0x63a   : > { %9249 = vmatprep.subr.mxu1 %v11219_v11  ;;  %9207 = vmatpush3.msra.mxu0 %v12521_v63 }
 0x63b   : > { %9250 = vmatpush3.msra.mxu1 %v11219_v11  ;;  %9208 = vmatprep.subr.mxu0 %v12522_v13 }
 0x63c   : > { %9251 = vmatprep.subr.mxu1 %v11235_v48  ;;  %9209 = vmatpush3.msra.mxu0 %v12522_v13 }
 0x63d   : > { %9252 = vmatpush3.msra.mxu1 %v11235_v48  ;;  %9210 = vmatprep.subr.mxu0 %v12523_v7 }
 0x63e   : > { %9253 = vmatprep.subr.mxu1 %v11246_v41  ;;  %9211 = vmatpush3.msra.mxu0 %v12523_v7 }
 0x63f   : > { %9254 = vmatpush3.msra.mxu1 %v11246_v41  ;;  %9212 = vmatprep.subr.mxu0 %v12524_v54 }
 0x640   : > { %9255 = vmatprep.subr.mxu1 %v11261_v22  ;;  %9213 = vmatpush3.msra.mxu0 %v12524_v54 }
 0x641   : > { %9256 = vmatpush3.msra.mxu1 %v11261_v22  ;;  %9214 = vmatprep.subr.mxu0 %v12525_v55 }
 0x642   : > { %9257 = vmatprep.subr.mxu1 %v11277_v4  ;;  %9215 = vmatpush3.msra.mxu0 %v12525_v55 }
 0x643   : > { %9258 = vmatpush3.msra.mxu1 %v11277_v4  ;;  %9216 = vmatprep.subr.mxu0 %v12526_v56 }
 0x644   : > { %9259 = vmatprep.subr.mxu1 %v11294_v45  ;;  %9217 = vmatpush3.msra.mxu0 %v12526_v56 }
 0x645   : > { %9260 = vmatpush3.msra.mxu1 %v11294_v45  ;;  %9218 = vmatprep.subr.mxu0 %v12527_v61 }
 0x646   : > { %9261 = vmatprep.subr.mxu1 %v11310_v27  ;;  %9219 = vmatpush3.msra.mxu0 %v12527_v61 }
 0x647   : > { %9262 = vmatpush3.msra.mxu1 %v11310_v27  ;;  %9220 = vmatprep.subr.mxu0 %v12528_v62 }
 0x648   : > { %9263 = vmatprep.subr.mxu1 %v11321_v59  ;;  %9221 = vmatpush3.msra.mxu0 %v12528_v62 }
 0x649   : > { %9264 = vmatpush3.msra.mxu1 %v11321_v59  ;;  %9222 = vmatprep.subr.mxu0 %v12529_v21 }
 0x64a   : > { %9266 = vmatmul.mubr.f32.vlgmr.msra.gmra.mxu1 %v11357_v5  ;;  %9223 = vmatpush3.msra.mxu0 %v12529_v21 }
 0x64b   : > { %9224 = vmatprep.subr.mxu0 %v12530_v20  ;;  %9303 = vmatprep.subr.mxu1 %v12531_v24 }
 0x64c   : > { %9225 = vmatpush3.msra.mxu0 %v12530_v20  ;;  %9335 = vmatprep.mubr.msk.f32.mxu1 %vm10022_vm9, %v12531_v24 }
 0x64d   : > { %9226 = vmatprep.subr.mxu0 %v12532_v12 }
 0x64e   : > { %9227 = vmatpush3.msra.mxu0 %v12532_v12 }
 0x64f   : > { %9228 = vmatprep.subr.mxu0 %v12533_v36 }
 0x650   : > { %9229 = vmatpush3.msra.mxu0 %v12533_v36 }
 0x651   : > { %9231 = vmatmul.mubr.f32.vlgmr.msra.gmra.mxu0 %v11357_v5  ;;  %9268 = vmatprep.subr.mxu0 %v12531_v24 }
 0x652   : > { %9300 = vmatprep.mubr.msk.f32.mxu0 %vm10022_vm9, %v12531_v24 }
 0x6c7   : > { %v9127_v53 = vpop.f32.mrf.mxu1 }
 0x6c9   : > { %v5730_v16 = vpop.f32.mrf.mxu1 }
 0x6cf   : > { %v9092_v47 = vpop.f32.mrf.mxu0 }
 0x6d0   : > { %v5737_v42 = vadd.f32 %v9127_v53, %v9092_v47 }
 0x6d1   : > { %v5569_v8 = vpop.f32.mrf.mxu0 }
 0x6d2   : > { %v5731_v29 = vadd.f32 %v5730_v16, %v5569_v8 }
 0x6e8   : > { %v9197_v43 = vpop.f32.mrf.mxu1 }
 0x6ea   : > { %v5936_v50 = vpop.f32.mrf.mxu1 }
 0x6f0   : > { %v9162_v14 = vpop.f32.mrf.mxu0 }
 0x6f1   : > { %v5848_v48 = vadd.f32 %v9162_v14, %v5737_v42  ;;  %v6310_v42 = vrot.slane %v12531_v24, 3 }
 0x6f2   : > { %v5840_v11 = vpop.f32.mrf.mxu0 }
 0x6f3   : > { %v5841_v41 = vadd.f32 %v5840_v11, %v5731_v29  ;;  %v5945_v19 = vadd.f32 %v9197_v43, %v5848_v48  ;;  %v6320_v11 = vrot.slane %v12531_v24, 4  ;;  %v6330_v48 = vrot.slane %v12531_v24, 5 }
 0x6f5   : > { %v5937_v4 = vadd.f32 %v5936_v50, %v5841_v41  ;;  %v6340_v50 = vrot.slane %v12531_v24, 6 }
 0x70a   : > { %v9267_v22 = vpop.f32.mrf.mxu1 }
 0x70c   : > { %v6156_v27 = vpop.f32.mrf.mxu1 }
 0x711   : > { %v9232_v57 = vpop.f32.mrf.mxu0 }
 0x712   : > { %v6070_v25 = vadd.f32 %v9232_v57, %v5945_v19 }
 0x713   : > { %v6063_v23 = vpop.f32.mrf.mxu0 }
 0x714   : > { %v6163_v45 = vadd.f32 %v9267_v22, %v6070_v25  ;;  %v6064_v39 = vadd.f32 %v6063_v23, %v5937_v4  ;;  %v10021_v22 = vmov 1  }
 0x715   : > { %9815 = vset.pattern.permute.xlu0 %v10021_v22  ;;  %9816 = vset.pattern.permute.xlu1 %v10021_v22 }
 0x716   : > { %v6170_v59 = vrot.slane %v6163_v45, 1  ;;  %v6157_v1 = vadd.f32 %v6156_v27, %v6064_v39 }
 0x718   : > { %v11510_v2 = vsel %vm6168_vm2, %v6170_v59, 0.0  ;;  %v6169_v17 = vrot.slane %v6157_v1, 1 }
 0x719   : > { %6283 = vrot.lane.b32.xlu1 %v11510_v2, %s10007_s12  ;;  %v6191_v31 = vrot.slane %v11510_v2, 1  ;;  %v6201_v38 = vrot.slane %v11510_v2, 2  ;;  %v6215_v62 = vrot.slane %v11510_v2, 3  ;;  %v6229_v20 = vrot.slane %v11510_v2, 4 }
 0x71a   : > { %v11514_v15 = vsel %vm6168_vm2, %v6169_v17, %v6170_v59  ;;  %v6174_v44 = vsel %vm6168_vm2, 0.0, %v6169_v17  ;;  %v6243_v36 = vrot.slane %v11510_v2, 5  ;;  %v6257_v53 = vrot.slane %v11510_v2, 6 }
 0x71b   : > { %6181 = vrot.lane.b32.xlu0 %v11514_v15, %s10008_s11  ;;  %v6226_v60 = vrot.slane %v6174_v44, 4  ;;  %v6227_v40 = vrot.slane %v11514_v15, 4  ;;  %v6291_v0 = vsel %vm6168_vm2, %v6191_v31, %v6290_v10  ;;  %v6189_v33 = vrot.slane %v11514_v15, 1 }
 0x71c   : > { %v6240_v51 = vrot.slane %v6174_v44, 5  ;;  %v6241_v30 = vrot.slane %v11514_v15, 5  ;;  %v6188_v6 = vrot.slane %v6174_v44, 1  ;;  %v6301_v5 = vsel %vm6197_vm4, %v6201_v38, %v6300_v52 }
 0x71d   : > { %6179 = vrot.lane.b32.xlu1 %v6174_v44, %s10008_s11  ;;  %v6228_v18 = vsel %vm6225_vm3, %v6226_v60, %v6227_v40  ;;  %v6198_v58 = vrot.slane %v6174_v44, 2  ;;  %v6199_v3 = vrot.slane %v11514_v15, 2  ;;  %v6254_v34 = vrot.slane %v6174_v44, 6  ;;  %s10019_s11 = smov 116  }
 0x71e   : > { %v11534_v9 = vsel %vm6168_vm2, %v6188_v6, %v6189_v33  ;;  %v6242_v37 = vsel %vm6239_vm5, %v6240_v51, %v6241_v30  ;;  %v6255_v26 = vrot.slane %v11514_v15, 6  ;;  %v6268_v49 = vrot.slane %v6174_v44, 7 }
 0x71f   : > { %6281 = vrot.lane.b32.xlu0 %v11514_v15, %s10007_s12  ;;  %v6200_v35 = vsel %vm6197_vm4, %v6198_v58, %v6199_v3  ;;  %v6269_v63 = vrot.slane %v11514_v15, 7  ;;  %v6202_v13 = vsel %vm6197_vm4, %v6199_v3, %v6201_v38  ;;  %v6212_v7 = vrot.slane %v6174_v44, 3  ;;  %s10018_s12 = smov 117  }
 0x720   : > { %v6256_v46 = vsel %vm6253_vm6, %v6254_v34, %v6255_v26  ;;  %v6213_v54 = vrot.slane %v11514_v15, 3  ;;  %v11548_v61 = vsel %vm6168_vm2, %v6189_v33, %v6191_v31  ;;  %v6230_v12 = vsel %vm6225_vm3, %v6227_v40, %v6229_v20 }
 0x721   : > { %6294 = vrot.lane.b32.xlu1 %v6291_v0, %s10009_s27  ;;  %v6270_v55 = vsel %vm6267_vm7, %v6268_v49, %v6269_v63  ;;  %v6244_v47 = vsel %vm6239_vm5, %v6241_v30, %v6243_v36  ;;  %v6258_v8 = vsel %vm6253_vm6, %v6255_v26, %v6257_v53  ;;  %v6271_v14 = vrot.slane %v11510_v2, 7  ;;  %v12534_v2 = vld [vmem:[#allocation13_spill] sm:$0xff] }
 0x722   : > { %v6214_v56 = vsel %vm6211_vm8, %v6212_v7, %v6213_v54  ;;  %v6216_v21 = vsel %vm6211_vm8, %v6213_v54, %v6215_v62  ;;  %v6311_v43 = vsel %vm6211_vm8, %v6215_v62, %v6310_v42  ;;  %v6321_v29 = vsel %vm6225_vm3, %v6229_v20, %v6320_v11 }
 0x723   : > { %6231 = vrot.lane.b32.xlu0 %v6228_v18, %s10010_s18  ;;  %v6272_v16 = vsel %vm6267_vm7, %v6269_v63, %v6271_v14  ;;  %v6331_v41 = vsel %vm6239_vm5, %v6243_v36, %v6330_v48  ;;  %v6341_v19 = vsel %vm6253_vm6, %v6257_v53, %v6340_v50 }
 0x725   : > { %6304 = vrot.lane.b32.xlu1 %v6301_v5, %s10011_s20 }
 0x727   : > { %6245 = vrot.lane.b32.xlu0 %v6242_v37, %s10012_s21 }
 0x729   : > { %6203 = vrot.lane.b32.xlu1 %v6200_v35, %s10013_s26 }
 0x72b   : > { %6259 = vrot.lane.b32.xlu0 %v6256_v46, %s10014_s28 }
 0x72d   : > { %6205 = vrot.lane.b32.xlu1 %v6202_v13, %s10013_s26  ;;  %s390_s26 = sand.u32 1, %s9987_s14  }
 0x72f   : > { %6273 = vrot.lane.b32.xlu0 %v6270_v55, %s10015_s25 }
 0x731   : > { %6217 = vrot.lane.b32.xlu1 %v6214_v56, %s10016_s29 }
 0x733   : > { %6292 = vrot.lane.b32.xlu0 %v11548_v61, %s10009_s27 }
 0x735   : > { %6219 = vrot.lane.b32.xlu1 %v6216_v21, %s10016_s29 }
 0x737   : > { %6302 = vrot.lane.b32.xlu0 %v6202_v13, %s10011_s20  ;;  %s10024_s20 = smov [#allocation8]  }
 0x739   : > { %6233 = vrot.lane.b32.xlu1 %v6230_v12, %s10010_s18  ;;  %s10020_s18 = smov 115  }
 0x73b   : > { %6312 = vrot.lane.b32.xlu0 %v6216_v21, %s10017_s30 }
 0x73d   : > { %6247 = vrot.lane.b32.xlu1 %v6244_v47, %s10012_s21  ;;  %s9931_s21 = sshll.u32 %s10024_s20, 4  ;;  %s9932_s21 = int_to_ptr.vmem [resolvable:$false] %s9931_s21 }
 0x73f   : > { %6322 = vrot.lane.b32.xlu0 %v6230_v12, %s10018_s12 }
 0x741   : > { %6261 = vrot.lane.b32.xlu1 %v6258_v8, %s10014_s28  ;;  %s8318_s28 = sshll.u32 %s390_s26, 4 }
 0x742   : > { %s392_s29 = scalar_lea.vmem [#allocation8], %s8318_s28  ;;  %s9933_s28 = scalar_lea.vmem %s9932_s21, 512 }
 0x743   : > { %6332 = vrot.lane.b32.xlu0 %v6244_v47, %s10019_s11 }
 0x745   : > { %6275 = vrot.lane.b32.xlu1 %v6272_v16, %s10015_s25  ;;  %s8337_s25 = sshll.u32 %s10103_s17, 8  ;;  %s12404_s17 = scalar_lea.sflag [#allocation4], %s390_s26 }
 0x747   : > { %6342 = vrot.lane.b32.xlu0 %v6258_v8, %s10020_s18 }
 0x749   : > { %6314 = vrot.lane.b32.xlu1 %v6311_v43, %s10017_s30  ;;  %s8215_s30 = sshll.u32 %s392_s29, 4  ;;  %s12400_s30 = int_to_ptr.vmem [resolvable:$true] %s8215_s30 }
 0x74a   : > { %p9934_p4 = scmp.lt.s32.totalorder %s12400_s30, %s9932_s21 }
 0x74d   : > { %6324 = vrot.lane.b32.xlu1 %v6321_v29, %s10018_s12 }
 0x751   : > { %6334 = vrot.lane.b32.xlu1 %v6331_v41, %s10019_s11 }
 0x755   : > { %6344 = vrot.lane.b32.xlu1 %v6341_v19, %s10020_s18  ;;  %s12398_s18 = scalar_lea.hbm %s12454_s10, %s8337_s25 }
 0x78b   : > { %v6284_v57 = vpop.permute.xlu1 %6283 }
 0x78d   : > { %v6182_v25 = vpop.permute.xlu0 %6181 }
 0x78e   : > { %v6186_v18 = vadd.f32 %v12534_v2, %v6182_v25 }
 0x78f   : > { %v6180_v4 = vpop.permute.xlu1 %6179 }
 0x790   : > { %v6185_v17 = vadd.f32 %v12534_v2, %v6180_v4  ;;  %v6196_v58 = vadd.f32 %v11548_v61, %v6186_v18 }
 0x791   : > { %v6282_v23 = vpop.permute.xlu0 %6281 }
 0x792   : > { %v6195_v31 = vadd.f32 %v11534_v9, %v6185_v17 }
 0x793   : > { %v6295_v45 = vpop.permute.xlu1 %6294 }
 0x795   : > { %v6232_v39 = vpop.permute.xlu0 %6231 }
 0x797   : > { %v6305_v27 = vpop.permute.xlu1 %6304 }
 0x799   : > { %v6246_v59 = vpop.permute.xlu0 %6245 }
 0x79b   : > { %v6204_v1 = vpop.permute.xlu1 %6203 }
 0x79c   : > { %v6209_v60 = vadd.f32 %v6204_v1, %v6195_v31  ;;  %v6398_v1 = vld [vmem:[#allocation7 + $0x68] sm:$0xff] }
 0x79d   : > { %v6260_v15 = vpop.permute.xlu0 %6259 }
 0x79f   : > { %v6206_v44 = vpop.permute.xlu1 %6205 }
 0x7a0   : > { %v6210_v34 = vadd.f32 %v6206_v44, %v6196_v58  ;;  %v11582_v44 = vand.u32 4294901760, %v6398_v1 }
 0x7a1   : > { %v6274_v10 = vpop.permute.xlu0 %6273 }
 0x7a3   : > { %v6218_v40 = vpop.permute.xlu1 %6217 }
 0x7a4   : > { %v6223_v0 = vadd.f32 %v6218_v40, %v6209_v60 }
 0x7a5   : > { %v6293_v38 = vpop.permute.xlu0 %6292 }
 0x7a6   : > { %v6237_v52 = vadd.f32 %v6232_v39, %v6223_v0 }
 0x7a7   : > { %v6220_v33 = vpop.permute.xlu1 %6219 }
 0x7a8   : > { %v6251_v51 = vadd.f32 %v6246_v59, %v6237_v52  ;;  %v6224_v46 = vadd.f32 %v6220_v33, %v6210_v34 }
 0x7a9   : > { %v6303_v30 = vpop.permute.xlu0 %6302 }
 0x7aa   : > { %v6265_v6 = vadd.f32 %v6260_v15, %v6251_v51 }
 0x7ab   : > { %v6234_v5 = vpop.permute.xlu1 %6233 }
 0x7ac   : > { %v6279_v3 = vadd.f32 %v6274_v10, %v6265_v6  ;;  %v6238_v13 = vadd.f32 %v6234_v5, %v6224_v46  ;;  %v6396_v10 = vld [vmem:[#allocation7 + $0x58] sm:$0xff] }
 0x7ad   : > { %v6313_v37 = vpop.permute.xlu0 %6312  ;;  %v11590_v40 = vand.u32 4294901760, %v6396_v10 }
 0x7ae   : > { %v6287_v26 = vadd.f32 %v6282_v23, %v6279_v3 }
 0x7af   : > { %v6248_v9 = vpop.permute.xlu1 %6247  ;;  %v11604_v18 = vsub.f32 %v6396_v10, %v11590_v40 }
 0x7b0   : > { %v6298_v35 = vadd.f32 %v6293_v38, %v6287_v26  ;;  %v6252_v55 = vadd.f32 %v6248_v9, %v6238_v13  ;;  %v11596_v38 = vsub.f32 %v6398_v1, %v11582_v44 }
 0x7b1   : > { %v6323_v49 = vpop.permute.xlu0 %6322  ;;  %v6531_v58 = vand.u32 4294901760, %v11604_v18 }
 0x7b2   : > { %v6308_v63 = vadd.f32 %v6303_v30, %v6298_v35  ;;  %v6517_v30 = vand.u32 4294901760, %v11596_v38  ;;  %v6395_v35 = vld [vmem:[#allocation7 + $0x50] sm:$0xff] }
 0x7b3   : > { %v6262_v7 = vpop.permute.xlu1 %6261  ;;  %v6532_v46 = vsub.f32 %v11604_v18, %v6531_v58 }
 0x7b4   : > { %v6318_v54 = vadd.f32 %v6313_v37, %v6308_v63  ;;  %v6266_v21 = vadd.f32 %v6262_v7, %v6252_v55  ;;  %v6518_v37 = vsub.f32 %v11596_v38, %v6517_v30  ;;  %v6394_v63 = vld [vmem:[#allocation7 + $0x48] sm:$0xff]  ;;  %v6393_v55 = vld [vmem:[#allocation7 + $0x40] sm:$0xff] }
 0x7b5   : > { %v6333_v56 = vpop.permute.xlu0 %6332 }
 0x7b6   : > { %v6328_v62 = vadd.f32 %v6323_v49, %v6318_v54  ;;  %v11633_v49 = vand.u32 4294901760, %v6395_v35  ;;  %v11641_v54 = vand.u32 4294901760, %v6394_v63 }
 0x7b7   : > { %v6276_v20 = vpop.permute.xlu1 %6275 }
 0x7b8   : > { %v6338_v12 = vadd.f32 %v6333_v56, %v6328_v62  ;;  %v6280_v36 = vadd.f32 %v6276_v20, %v6266_v21  ;;  %v11639_v7 = vsub.f32 %v6395_v35, %v11633_v49  ;;  %v6533_v56 = vand.u32 4294901760, %v6532_v46 }
 0x7b9   : > { %v6343_v61 = vpop.permute.xlu0 %6342  ;;  %v11648_v21 = vsub.f32 %v6394_v63, %v11641_v54  ;;  %v11650_v20 = vand.u32 4294901760, %v6393_v55 }
 0x7ba   : > { %v6288_v47 = vadd.f32 %v6284_v57, %v6280_v36  ;;  %v6348_v53 = vadd.f32 %v6343_v61, %v6338_v12  ;;  %v6400_v57 = vld [vmem:[#allocation7 + $0x78] sm:$0xff]  ;;  %v6538_v62 = vand.u32 4294901760, %v11639_v7 }
 0x7bb   : > { %v6315_v8 = vpop.permute.xlu1 %6314  ;;  %v11578_v59 = vand.u32 4294901760, %v6400_v57  ;;  %v6392_v36 = vld [vmem:[#allocation7 + $0x38] sm:$0xff] }
 0x7bc   : > { %v8327_v14 = vmul.f32 -1.442695, %v6348_v53  ;;  %v6299_v16 = vadd.f32 %v6295_v45, %v6288_v47  ;;  %v6399_v45 = vld [vmem:[#allocation7 + $0x70] sm:$0xff]  ;;  %v6539_v61 = vsub.f32 %v11639_v7, %v6538_v62  ;;  %v6545_v47 = vand.u32 4294901760, %v11648_v21 }
 0x7bd   : > { %v11580_v15 = vand.u32 4294901760, %v6399_v45  ;;  %v11587_v60 = vsub.f32 %v6400_v57, %v11578_v59  ;;  %9269 = vmatpush3.msra.mxu0 %v11578_v59  ;;  %v11660_v53 = vsub.f32 %v6393_v55, %v11650_v20 }
 0x7be   : > { %9831 = vpow2.f32 %v8327_v14  ;;  %v6309_v42 = vadd.f32 %v6305_v27, %v6299_v16  ;;  %v6397_v27 = vld [vmem:[#allocation7 + $0x60] sm:$0xff]  ;;  %9270 = vmatprep.subr.mxu0 %v12531_v24  ;;  %v6391_v14 = vld [vmem:[#allocation7 + $0x30] sm:$0xff]  ;;  %v6540_v16 = vand.u32 4294901760, %v6539_v61 }
 0x7bf   : > { %v6325_v43 = vpop.permute.xlu1 %6324  ;;  %v11584_v31 = vand.u32 4294901760, %v6397_v27  ;;  %v11593_v0 = vsub.f32 %v6399_v45, %v11580_v15  ;;  %v6503_v33 = vand.u32 4294901760, %v11587_v60  ;;  %9271 = vmatpush3.msra.mxu0 %v11580_v15 }
 0x7c0   : > { %v6319_v11 = vadd.f32 %v6315_v8, %v6309_v42  ;;  %9272 = vmatprep.subr.mxu0 %v12531_v24  ;;  %v11662_v8 = vand.u32 4294901760, %v6392_v36  ;;  %v6546_v42 = vsub.f32 %v11648_v21, %v6545_v47 }
 0x7c1   : > { %v11599_v52 = vsub.f32 %v6397_v27, %v11584_v31  ;;  %v6510_v51 = vand.u32 4294901760, %v11593_v0  ;;  %v6504_v5 = vsub.f32 %v11587_v60, %v6503_v33  ;;  %9273 = vmatpush3.msra.mxu0 %v11582_v44  ;;  %v6388_v27 = vld [vmem:[#allocation7 + $0x18] sm:$0xff] }
 0x7c2   : > { %v6329_v29 = vadd.f32 %v6325_v43, %v6319_v11  ;;  %9274 = vmatprep.subr.mxu0 %v12531_v24  ;;  %v6552_v43 = vand.u32 4294901760, %v11660_v53  ;;  %v11671_v11 = vsub.f32 %v6392_v36, %v11662_v8 }
 0x7c3   : > { %v6335_v48 = vpop.permute.xlu1 %6334  ;;  %v6524_v6 = vand.u32 4294901760, %v11599_v52  ;;  %v6511_v3 = vsub.f32 %v11593_v0, %v6510_v51  ;;  %v6505_v34 = vand.u32 4294901760, %v6504_v5  ;;  %9275 = vmatpush3.msra.mxu0 %v11584_v31 }
 0x7c4   : > { %v6339_v41 = vadd.f32 %v6335_v48, %v6329_v29  ;;  %9276 = vmatprep.subr.mxu0 %v12531_v24  ;;  %v11675_v29 = vand.u32 4294901760, %v6391_v14  ;;  %v6390_v48 = vld [vmem:[#allocation7 + $0x28] sm:$0xff] }
 0x7c5   : > { %v6525_v26 = vsub.f32 %v11599_v52, %v6524_v6  ;;  %v6512_v9 = vand.u32 4294901760, %v6511_v3  ;;  %9304 = vmatpush3.msra.mxu1 %v6505_v34  ;;  %9277 = vmatpush3.msra.mxu0 %v11590_v40  ;;  %v11706_v3 = vand.u32 4294901760, %v6388_v27  ;;  %v6386_v34 = vld [vmem:[#allocation7 + $0x8] sm:$0xff] }
 0x7c6   : > { %9305 = vmatprep.subr.mxu1 %v12531_v24  ;;  %9278 = vmatprep.subr.mxu0 %v12531_v24 }
 0x7c7   : > { %v6345_v50 = vpop.permute.xlu1 %6344  ;;  %9306 = vmatpush3.msra.mxu1 %v6512_v9  ;;  %v6526_v13 = vand.u32 4294901760, %v6525_v26  ;;  %9279 = vmatpush3.msra.mxu0 %v11633_v49  ;;  %v6385_v26 = vld [vmem:[#allocation7] sm:$0xff]  ;;  %v11725_v55 = vsub.f32 %v6388_v27, %v11706_v3 }
 0x7c8   : > { %v6349_v19 = vadd.f32 %v6345_v50, %v6339_v41  ;;  %9307 = vmatprep.subr.mxu1 %v12531_v24  ;;  %9280 = vmatprep.subr.mxu0 %v12531_v24  ;;  %v6547_v41 = vand.u32 4294901760, %v6546_v42  ;;  %v6553_v50 = vsub.f32 %v11660_v53, %v6552_v43  ;;  %v11718_v46 = vand.u32 4294901760, %v6385_v26 }
 0x7c9   : > { %9281 = vmatpush3.msra.mxu0 %v11641_v54  ;;  %v6587_v42 = vand.u32 4294901760, %v11725_v55 }
 0x7ca   : > { %v8328_v22 = vmul.f32 -1.442695, %v6349_v19  ;;  %9282 = vmatprep.subr.mxu0 %v12531_v24  ;;  %v6559_v19 = vand.u32 4294901760, %v11671_v11  ;;  %v11736_v61 = vsub.f32 %v6385_v26, %v11718_v46 }
 0x7cb   : > { %v9832_v25 = vpop.eup %9831  ;;  %9283 = vmatpush3.msra.mxu0 %v11650_v20 }
 0x7cc   : > { %v6356_v4 = vadd.f32 1.0, %v9832_v25  ;;  %9833 = vpow2.f32 %v8328_v22  ;;  %9284 = vmatprep.subr.mxu0 %v12531_v24  ;;  %v11682_v22 = vand.u32 4294901760, %v6390_v48  ;;  %v11687_v25 = vsub.f32 %v6391_v14, %v11675_v29 }
 0x7cd   : > { %9285 = vmatpush3.msra.mxu0 %v11662_v8  ;;  %v6560_v57 = vsub.f32 %v11671_v11, %v6559_v19 }
 0x7ce   : > { %9835 = vrcp.f32 %v6356_v4  ;;  %9286 = vmatprep.subr.mxu0 %v12531_v24  ;;  %v6389_v4 = vld [vmem:[#allocation7 + $0x20] sm:$0xff]  ;;  %v6566_v1 = vand.u32 4294901760, %v11687_v25 }
 0x7cf   : > { %9287 = vmatpush3.msra.mxu0 %v11675_v29  ;;  %v11696_v45 = vand.u32 4294901760, %v6389_v4 }
 0x7d0   : > { %9288 = vmatprep.subr.mxu0 %v12531_v24  ;;  %v6567_v9 = vsub.f32 %v11687_v25, %v6566_v1 }
 0x7d1   : > { %9289 = vmatpush3.msra.mxu0 %v11682_v22  ;;  %v11704_v5 = vsub.f32 %v6389_v4, %v11696_v45 }
 0x7d2   : > { %9290 = vmatprep.subr.mxu0 %v12531_v24 }
 0x7d3   : > { %9291 = vmatpush3.msra.mxu0 %v11696_v45 }
 0x7d4   : > { %9292 = vmatprep.subr.mxu0 %v12531_v24 }
 0x7d5   : > { %9293 = vmatpush3.msra.mxu0 %v11706_v3 }
 0x7d6   : > { %9294 = vmatprep.subr.mxu0 %v12531_v24 }
 0x7d9   : > { %v9834_v23 = vpop.eup %9833 }
 0x7da   : > { %v6357_v39 = vadd.f32 1.0, %v9834_v23  ;;  %v6554_v23 = vand.u32 4294901760, %v6553_v50  ;;  %v12488_v50 = vand.u32 4294901760, %v11736_v61 }
 0x7db   : > { %v9836_v17 = vpop.eup %9835 }
 0x7dc   : > { %9837 = vrcp.f32 %v6357_v39  ;;  %6364 = vperm.xlu0 %9815, %v9836_v17   ;;  %v11694_v39 = vsub.f32 %v6390_v48, %v11682_v22  ;;  %v6561_v17 = vand.u32 4294901760, %v6560_v57 }
 0x7de   : > { %v6573_v10 = vand.u32 4294901760, %v11694_v39 }
 0x7e0   : > { %7088 = vrot.lane.b32.xlu0 %v12534_v2, %s10009_s27  ;;  %v6519_v2 = vand.u32 4294901760, %v6518_v37  ;;  %v6387_v37 = vld [vmem:[#allocation7 + $0x10] sm:$0xff]  ;;  %v6574_v63 = vsub.f32 %v11694_v39, %v6573_v10  ;;  %s9927_s27 = scalar_lea.vmem %s12400_s30, 256 }
 0x7e1   : > { %v11713_v35 = vand.u32 4294901760, %v6387_v37  ;;  %p9928_p12 = scmp.ne.s32.totalorder %s12400_s30, %s9927_s27  ;;  %p9935_p5 = scmp.lt.s32.totalorder %s9933_s28, %s9927_s27 }
 0x7e2   : > { %9308 = vmatpush3.msra.mxu1 %v6519_v2  ;;  %v11715_v2 = vand.u32 4294901760, %v6386_v34  ;;  %v6575_v14 = vand.u32 4294901760, %v6574_v63  ;;  %v10023_v63 = vmov 2  }
 0x7e3   : > { %9309 = vmatprep.subr.mxu1 %v12531_v24  ;;  %9295 = vmatpush3.msra.mxu0 %v11713_v35  ;;  %p9929_p9 = pnand %p9928_p12, %p12546_p2  ;;  %p9936_p6 = por %p9935_p5, %p9934_p4 }
 0x7e4   : > { %9310 = vmatpush3.msra.mxu1 %v6526_v13  ;;  %v6580_v13 = vand.u32 4294901760, %v11704_v5  ;;  %v11733_v36 = vsub.f32 %v6386_v34, %v11715_v2  ;;  %9296 = vmatprep.subr.mxu0 %v12531_v24  ;;  %v6609_v34 = vsub.f32 %v11736_v61, %v12488_v50 }
 0x7e5   : > { %9311 = vmatprep.subr.mxu1 %v12531_v24  ;;  %9297 = vmatpush3.msra.mxu0 %v11715_v2  ;;  %p9930_p3 = pneg %p9929_p9 }
 0x7e6   : > { %9312 = vmatpush3.msra.mxu1 %v6533_v56  ;;  %v6568_v56 = vand.u32 4294901760, %v6567_v9  ;;  %9298 = vmatprep.subr.mxu0 %v12531_v24  ;;  %v6610_v9 = vand.u32 4294901760, %v6609_v34 }
 0x7e7   : > { %9313 = vmatprep.subr.mxu1 %v12531_v24  ;;  %9299 = vmatpush3.msra.mxu0 %v11718_v46  ;;  %p9937_p10 = pnand %p9936_p6, %p9930_p3 }
 0x7e8   : > { %9314 = vmatpush3.msra.mxu1 %v6540_v16  ;;  %v6581_v16 = vsub.f32 %v11704_v5, %v6580_v13  ;;  %9338 = vmatprep.subr.mxu0 %v12531_v24 }
 0x7e9   : > { %v9838_v12 = vpop.eup %9837  ;;  %9315 = vmatprep.subr.mxu1 %v12531_v24  ;;  %9818 = vset.pattern.permute.xlu0 %v10023_v63 }
 0x7ea   : > { %6369 = vperm.xlu1 %9816, %v9838_v12   ;;  %9316 = vmatpush3.msra.mxu1 %v6547_v41  ;;  %v11730_v12 = vsub.f32 %v6387_v37, %v11713_v35  ;;  %v6601_v41 = vand.u32 4294901760, %v11733_v36  ;;  %v6582_v4 = vand.u32 4294901760, %v6581_v16 }
 0x7eb   : > { %9317 = vmatprep.subr.mxu1 %v12531_v24 }
 0x7ec   : > { %9318 = vmatpush3.msra.mxu1 %v6554_v23  ;;  %v6594_v48 = vand.u32 4294901760, %v11730_v12  ;;  %v6588_v23 = vsub.f32 %v11725_v55, %v6587_v42  ;;  %v6602_v27 = vsub.f32 %v11733_v36, %v6601_v41 }
 0x7ed   : > { %9319 = vmatprep.subr.mxu1 %v12531_v24 }
 0x7ee   : > { %9320 = vmatpush3.msra.mxu1 %v6561_v17  ;;  %v6595_v57 = vsub.f32 %v11730_v12, %v6594_v48  ;;  %v6589_v17 = vand.u32 4294901760, %v6588_v23  ;;  %v6603_v26 = vand.u32 4294901760, %v6602_v27  ;;  %9817 = vset.pattern.permute.xlu1 %v10023_v63 }
 0x7ef   : > { %9321 = vmatprep.subr.mxu1 %v12531_v24 }
 0x7f0   : > { %9322 = vmatpush3.msra.mxu1 %v6568_v56  ;;  %v6596_v37 = vand.u32 4294901760, %v6595_v57  ;;  %v9847_v56 = vld [vmem:[%s12453_s9] sm:$0x1] }
 0x7f1   : > { %9323 = vmatprep.subr.mxu1 %v12531_v24  ;;  %6402 = vperm.xlu1 %9817, %v9847_v56  }
 0x7f2   : > { %9324 = vmatpush3.msra.mxu1 %v6575_v14 }
 0x7f3   : > { %9325 = vmatprep.subr.mxu1 %v12531_v24 }
 0x7f4   : > { %9326 = vmatpush3.msra.mxu1 %v6582_v4 }
 0x7f5   : > { %9327 = vmatprep.subr.mxu1 %v12531_v24 }
 0x7f6   : > { %9328 = vmatpush3.msra.mxu1 %v6589_v17 }
 0x7f7   : > { %9329 = vmatprep.subr.mxu1 %v12531_v24 }
 0x7f8   : > { %9330 = vmatpush3.msra.mxu1 %v6596_v37 }
 0x7f9   : > { %9331 = vmatprep.subr.mxu1 %v12531_v24 }
 0x7fa   : > { %9332 = vmatpush3.msra.mxu1 %v6603_v26 }
 0x7fb   : > { %9333 = vmatprep.subr.mxu1 %v12531_v24 }
 0x7fc   : > { %9334 = vmatpush3.msra.mxu1 %v6610_v9 }
 0x7fd   : > { %9373 = vmatprep.subr.mxu1 %v12531_v24 }
 0x857   : > { %v6365_v14 = vpop.permute.xlu0 %6364 }
 0x858   : > { %v6372_v16 = vmul.f32 %v6365_v14, %v11354_v28 }
 0x85a   : > { %v11782_v57 = vadd.f32 %v6372_v16, %v11354_v28 }
 0x865   : > { %v6370_v4 = vpop.permute.xlu1 %6369 }
 0x866   : > { %v6373_v23 = vmul.f32 %v6370_v4, %v11352_v32 }
 0x868   : > { %v11785_v27 = vadd.f32 %v6373_v23, %v11352_v32 }
 0x86a   : > { %v6376_v17 = vadd.f32 %v11785_v27, %v11782_v57 }
 0x86c   : > { %v6377_v37 = vrot.slane %v6376_v17, 4 }
 0x86e   : > { %v6378_v34 = vadd.f32 %v6377_v37, %v6376_v17  ;;  %v7075_v37 = vld [vmem:[%s12451_s7 + $0x18] sm:$0xff] }
 0x870   : > { %v6379_v26 = vrot.slane %v6378_v34, 2 }
 0x872   : > { %v6380_v9 = vadd.f32 %v6379_v26, %v6378_v34 }
 0x874   : > { %v6381_v63 = vrot.slane %v6380_v9, 1 }
 0x876   : > { %v6382_v56 = vadd.f32 %v6381_v63, %v6380_v9 }
 0x878   : > { %v6384_v50 = vmul.f32 0.0625, %v6382_v56  ;;  %v7074_v56 = vld [vmem:[%s12451_s7 + $0x10] sm:$0xff] }
 0x87a   : > { %v11789_v14 = vand.u32 4294901760, %v6384_v50 }
 0x87c   : > { %v11792_v4 = vsub.f32 %v6384_v50, %v11789_v14  ;;  %9336 = vmatmul.mubr.f32.vlgmr.msra.gmra.mxu1 %v11789_v14 }
 0x87d   : > { %9374 = vmatpush3.msra.mxu1 %v11578_v59  ;;  %9405 = vmatprep.mubr.msk.f32.mxu1 %vm10022_vm9, %v12531_v24 }
 0x87e   : > { %9375 = vmatprep.subr.mxu1 %v12531_v24  ;;  %v6492_v32 = vand.u32 4294901760, %v11792_v4 }
 0x87f   : > { %9376 = vmatpush3.msra.mxu1 %v11580_v15 }
 0x880   : > { %9377 = vmatprep.subr.mxu1 %v12531_v24  ;;  %v6493_v28 = vsub.f32 %v11792_v4, %v6492_v32 }
 0x881   : > { %9378 = vmatpush3.msra.mxu1 %v11582_v44 }
 0x882   : > { %9379 = vmatprep.subr.mxu1 %v12531_v24  ;;  %v6494_v50 = vand.u32 4294901760, %v6493_v28 }
 0x883   : > { %9380 = vmatpush3.msra.mxu1 %v11584_v31 }
 0x884   : > { %9381 = vmatprep.subr.mxu1 %v12531_v24  ;;  %9301 = vmatmul.mubr.f32.vlgmr.msra.gmra.mxu0 %v6494_v50 }
 0x885   : > { %9339 = vmatpush3.msra.mxu0 %v11587_v60  ;;  %9382 = vmatpush3.msra.mxu1 %v11590_v40 }
 0x886   : > { %9340 = vmatprep.subr.mxu0 %v12531_v24  ;;  %9383 = vmatprep.subr.mxu1 %v12531_v24 }
 0x887   : > { %9341 = vmatpush3.msra.mxu0 %v11593_v0  ;;  %9384 = vmatpush3.msra.mxu1 %v11633_v49  ;;  %v7085_v0 = vld [vmem:[%s12451_s7 + $0x68] sm:$0xff] }
 0x888   : > { %9342 = vmatprep.subr.mxu0 %v12531_v24  ;;  %9385 = vmatprep.subr.mxu1 %v12531_v24 }
 0x889   : > { %9343 = vmatpush3.msra.mxu0 %v11596_v38  ;;  %9386 = vmatpush3.msra.mxu1 %v11641_v54 }
 0x88a   : > { %9344 = vmatprep.subr.mxu0 %v12531_v24  ;;  %9387 = vmatprep.subr.mxu1 %v12531_v24 }
 0x88b   : > { %9345 = vmatpush3.msra.mxu0 %v11599_v52  ;;  %9388 = vmatpush3.msra.mxu1 %v11650_v20 }
 0x88c   : > { %9346 = vmatprep.subr.mxu0 %v12531_v24  ;;  %9389 = vmatprep.subr.mxu1 %v12531_v24 }
 0x88d   : > { %9347 = vmatpush3.msra.mxu0 %v11604_v18  ;;  %9390 = vmatpush3.msra.mxu1 %v11662_v8  ;;  %v7084_v18 = vld [vmem:[%s12451_s7 + $0x60] sm:$0xff] }
 0x88e   : > { %9348 = vmatprep.subr.mxu0 %v12531_v24  ;;  %9391 = vmatprep.subr.mxu1 %v12531_v24 }
 0x88f   : > { %9349 = vmatpush3.msra.mxu0 %v11639_v7  ;;  %9392 = vmatpush3.msra.mxu1 %v11675_v29 }
 0x890   : > { %9350 = vmatprep.subr.mxu0 %v12531_v24  ;;  %9393 = vmatprep.subr.mxu1 %v12531_v24 }
 0x891   : > { %9351 = vmatpush3.msra.mxu0 %v11648_v21  ;;  %9394 = vmatpush3.msra.mxu1 %v11682_v22 }
 0x892   : > { %9352 = vmatprep.subr.mxu0 %v12531_v24  ;;  %9395 = vmatprep.subr.mxu1 %v12531_v24 }
 0x893   : > { %9353 = vmatpush3.msra.mxu0 %v11660_v53  ;;  %9396 = vmatpush3.msra.mxu1 %v11696_v45 }
 0x894   : > { %9354 = vmatprep.subr.mxu0 %v12531_v24  ;;  %9397 = vmatprep.subr.mxu1 %v12531_v24 }
 0x895   : > { %9355 = vmatpush3.msra.mxu0 %v11671_v11  ;;  %9398 = vmatpush3.msra.mxu1 %v11706_v3 }
 0x896   : > { %9356 = vmatprep.subr.mxu0 %v12531_v24  ;;  %9399 = vmatprep.subr.mxu1 %v12531_v24 }
 0x897   : > { %9357 = vmatpush3.msra.mxu0 %v11687_v25  ;;  %9400 = vmatpush3.msra.mxu1 %v11713_v35 }
 0x898   : > { %9358 = vmatprep.subr.mxu0 %v12531_v24  ;;  %9401 = vmatprep.subr.mxu1 %v12531_v24 }
 0x899   : > { %9359 = vmatpush3.msra.mxu0 %v11694_v39  ;;  %9402 = vmatpush3.msra.mxu1 %v11715_v2 }
 0x89a   : > { %9360 = vmatprep.subr.mxu0 %v12531_v24  ;;  %9403 = vmatprep.subr.mxu1 %v12531_v24 }
 0x89b   : > { %9361 = vmatpush3.msra.mxu0 %v11704_v5  ;;  %9404 = vmatpush3.msra.mxu1 %v11718_v46  ;;  %v7079_v5 = vld [vmem:[%s12451_s7 + $0x38] sm:$0xff] }
 0x89c   : > { %9362 = vmatprep.subr.mxu0 %v12531_v24  ;;  %9406 = vmatmul.mubr.f32.vlgmr.msra.gmra.mxu1 %v6492_v32 }
 0x89d   : > { %9443 = vmatprep.subr.mxu1 %v12531_v24  ;;  %9363 = vmatpush3.msra.mxu0 %v11725_v55  ;;  %v7077_v55 = vld [vmem:[%s12451_s7 + $0x28] sm:$0xff] }
 0x89e   : > { %9444 = vmatpush3.msra.mxu1 %v11578_v59  ;;  %9364 = vmatprep.subr.mxu0 %v12531_v24  ;;  %v12535_v59 = vand.u32 4294901760, %v11736_v61 }
 0x89f   : > { %9445 = vmatprep.subr.mxu1 %v12531_v24  ;;  %9365 = vmatpush3.msra.mxu0 %v11730_v12  ;;  %v7076_v12 = vld [vmem:[%s12451_s7 + $0x20] sm:$0xff] }
 0x8a0   : > { %9446 = vmatpush3.msra.mxu1 %v11580_v15  ;;  %9366 = vmatprep.subr.mxu0 %v12531_v24  ;;  %v7087_v15 = vld [vmem:[%s12451_s7 + $0x78] sm:$0xff]  ;;  %v12080_v17 = vand.u32 4294901760, %v7076_v12 }
 0x8a1   : > { %9447 = vmatprep.subr.mxu1 %v12531_v24  ;;  %9367 = vmatpush3.msra.mxu0 %v11733_v36 }
 0x8a2   : > { %9448 = vmatpush3.msra.mxu1 %v11582_v44  ;;  %9368 = vmatprep.subr.mxu0 %v12531_v24  ;;  %v11959_v44 = vand.u32 4294901760, %v7087_v15  ;;  %v12104_v28 = vsub.f32 %v7076_v12, %v12080_v17 }
 0x8a3   : > { %9449 = vmatprep.subr.mxu1 %v12531_v24  ;;  %9369 = vmatpush3.msra.mxu0 %v11736_v61  ;;  %v12065_v61 = vand.u32 4294901760, %v7079_v5 }
 0x8a4   : > { %9370 = vmatprep.mubr.msk.f32.mxu0 %vm10022_vm9, %v12531_v24  ;;  %9450 = vmatpush3.msra.mxu1 %v11584_v31  ;;  %v7086_v31 = vld [vmem:[%s12451_s7 + $0x70] sm:$0xff]  ;;  %v11965_v60 = vsub.f32 %v7087_v15, %v11959_v44 }
 0x8a5   : > { %9371 = vmatmul.mubr.f32.vlgmr.msra.gmra.mxu0 %v11792_v4  ;;  %9408 = vmatprep.subr.mxu0 %v12531_v24  ;;  %v12087_v26 = vsub.f32 %v7079_v5, %v12065_v61 }
 0x8a6   : > { %9451 = vmatprep.subr.mxu1 %v12531_v24  ;;  %9409 = vmatpush3.msra.mxu0 %v6503_v33  ;;  %v7185_v38 = vand.u32 4294901760, %v11965_v60  ;;  %v11978_v33 = vand.u32 4294901760, %v7085_v0 }
 0x8a7   : > { %9452 = vmatpush3.msra.mxu1 %v11590_v40  ;;  %9410 = vmatprep.subr.mxu0 %v12531_v24  ;;  %v11967_v40 = vand.u32 4294901760, %v7086_v31  ;;  %v12496_v50 = vand.u32 4294901760, %v12087_v26 }
 0x8a8   : > { %9453 = vmatprep.subr.mxu1 %v12531_v24  ;;  %9411 = vmatpush3.msra.mxu0 %v6510_v51  ;;  %v7186_v51 = vsub.f32 %v11965_v60, %v7185_v38 }
 0x8a9   : > { %9454 = vmatpush3.msra.mxu1 %v11633_v49  ;;  %9412 = vmatprep.subr.mxu0 %v12531_v24  ;;  %v11976_v52 = vsub.f32 %v7086_v31, %v11967_v40  ;;  %v7083_v49 = vld [vmem:[%s12451_s7 + $0x58] sm:$0xff]  ;;  %v12111_v31 = vand.u32 4294901760, %v7075_v37 }
 0x8aa   : > { %9455 = vmatprep.subr.mxu1 %v12531_v24  ;;  %9413 = vmatpush3.msra.mxu0 %v6517_v30  ;;  %v7187_v7 = vand.u32 4294901760, %v7186_v51 }
 0x8ab   : > { %9456 = vmatpush3.msra.mxu1 %v11641_v54  ;;  %9414 = vmatprep.subr.mxu0 %v12531_v24  ;;  %v7192_v30 = vand.u32 4294901760, %v11976_v52 }
 0x8ac   : > { %9457 = vmatprep.subr.mxu1 %v12531_v24  ;;  %9415 = vmatpush3.msra.mxu0 %v6524_v6  ;;  %v11990_v6 = vsub.f32 %v7085_v0, %v11978_v33  ;;  %v7073_v0 = vld [vmem:[%s12451_s7 + $0x8] sm:$0xff] }
 0x8ad   : > { %9458 = vmatpush3.msra.mxu1 %v11650_v20  ;;  %9416 = vmatprep.subr.mxu0 %v12531_v24  ;;  %v7193_v54 = vsub.f32 %v11976_v52, %v7192_v30  ;;  %v12007_v20 = vand.u32 4294901760, %v7083_v49 }
 0x8ae   : > { %9459 = vmatprep.subr.mxu1 %v12531_v24  ;;  %9417 = vmatpush3.msra.mxu0 %v6531_v58  ;;  %v11992_v58 = vand.u32 4294901760, %v7084_v18 }
 0x8af   : > { %9460 = vmatpush3.msra.mxu1 %v11662_v8  ;;  %9418 = vmatprep.subr.mxu0 %v12531_v24  ;;  %v7194_v53 = vand.u32 4294901760, %v7193_v54 }
 0x8b0   : > { %9461 = vmatprep.subr.mxu1 %v12531_v24  ;;  %9419 = vmatpush3.msra.mxu0 %v6538_v62  ;;  %v7199_v62 = vand.u32 4294901760, %v11990_v6  ;;  %v12004_v21 = vsub.f32 %v7084_v18, %v11992_v58 }
 0x8b1   : > { %9462 = vmatpush3.msra.mxu1 %v11675_v29  ;;  %9420 = vmatprep.subr.mxu0 %v12531_v24  ;;  %v12021_v29 = vsub.f32 %v7083_v49, %v12007_v20  ;;  %v12121_v49 = vand.u32 4294901760, %v7074_v56 }
 0x8b2   : > { %9463 = vmatprep.subr.mxu1 %v12531_v24  ;;  %9421 = vmatpush3.msra.mxu0 %v6545_v47  ;;  %v7082_v47 = vld [vmem:[%s12451_s7 + $0x50] sm:$0xff]  ;;  %v7200_v8 = vsub.f32 %v11990_v6, %v7199_v62 }
 0x8b3   : > { %9464 = vmatpush3.msra.mxu1 %v11682_v22  ;;  %9422 = vmatprep.subr.mxu0 %v12531_v24  ;;  %v12017_v11 = vand.u32 4294901760, %v7082_v47 }
 0x8b4   : > { %9465 = vmatprep.subr.mxu1 %v12531_v24  ;;  %9423 = vmatpush3.msra.mxu0 %v6552_v43  ;;  %v7206_v43 = vand.u32 4294901760, %v12004_v21  ;;  %v7201_v22 = vand.u32 4294901760, %v7200_v8  ;;  %v7072_v8 = vld [vmem:[%s12451_s7] sm:$0xff] }
 0x8b5   : > { %9466 = vmatpush3.msra.mxu1 %v11696_v45  ;;  %9424 = vmatprep.subr.mxu0 %v12531_v24  ;;  %v12031_v39 = vsub.f32 %v7082_v47, %v12017_v11  ;;  %v12493_v47 = vand.u32 4294901760, %v12104_v28 }
 0x8b6   : > { %9467 = vmatprep.subr.mxu1 %v12531_v24  ;;  %9425 = vmatpush3.msra.mxu0 %v6559_v19  ;;  %v7081_v19 = vld [vmem:[%s12451_s7 + $0x48] sm:$0xff]  ;;  %v7207_v25 = vsub.f32 %v12004_v21, %v7206_v43 }
 0x8b7   : > { %9468 = vmatpush3.msra.mxu1 %v11706_v3  ;;  %9426 = vmatprep.subr.mxu0 %v12531_v24  ;;  %v12033_v45 = vand.u32 4294901760, %v7081_v19  ;;  %v7078_v3 = vld [vmem:[%s12451_s7 + $0x30] sm:$0xff] }
 0x8b8   : > { %9469 = vmatprep.subr.mxu1 %v12531_v24  ;;  %9427 = vmatpush3.msra.mxu0 %v6566_v1  ;;  %v7213_v1 = vand.u32 4294901760, %v12021_v29 }
 0x8b9   : > { %9470 = vmatpush3.msra.mxu1 %v11713_v35  ;;  %9428 = vmatprep.subr.mxu0 %v12531_v24  ;;  %v7208_v35 = vand.u32 4294901760, %v7207_v25  ;;  %v12141_v25 = vand.u32 4294901760, %v7073_v0 }
 0x8ba   : > { %9471 = vmatprep.subr.mxu1 %v12531_v24  ;;  %9429 = vmatpush3.msra.mxu0 %v6573_v10  ;;  %v7080_v10 = vld [vmem:[%s12451_s7 + $0x40] sm:$0xff]  ;;  %v7214_v36 = vsub.f32 %v12021_v29, %v7213_v1 }
 0x8bb   : > { %9472 = vmatpush3.msra.mxu1 %v11715_v2  ;;  %9430 = vmatprep.subr.mxu0 %v12531_v24  ;;  %v7220_v2 = vand.u32 4294901760, %v12031_v39 }
 0x8bc   : > { %9473 = vmatprep.subr.mxu1 %v12531_v24  ;;  %9431 = vmatpush3.msra.mxu0 %v6580_v13  ;;  %v12052_v13 = vand.u32 4294901760, %v7080_v10  ;;  %v7215_v34 = vand.u32 4294901760, %v7214_v36  ;;  %v7263_v36 = vsub.f32 %v12104_v28, %v12493_v47 }
 0x8bd   : > { %9474 = vmatpush3.msra.mxu1 %v11718_v46  ;;  %9475 = vmatprep.mubr.msk.f32.mxu1 %vm10022_vm9, %v12531_v24  ;;  %v12050_v46 = vsub.f32 %v7081_v19, %v12033_v45 }
 0x8be   : > { %9432 = vmatprep.subr.mxu0 %v12531_v24  ;;  %9476 = vmatmul.mubr.f32.vlgmr.msra.gmra.mxu1 %v11789_v14  ;;  %v12077_v23 = vsub.f32 %v7080_v10, %v12052_v13 }
 0x8bf   : > { %9433 = vmatpush3.msra.mxu0 %v6587_v42  ;;  %9440 = vmatprep.mubr.msk.f32.mxu0 %vm10022_vm9, %v12531_v24  ;;  %v12067_v42 = vand.u32 4294901760, %v7078_v3  ;;  %v7227_v16 = vand.u32 4294901760, %v12050_v46 }
 0x8c0   : > { %9434 = vmatprep.subr.mxu0 %v12531_v24  ;;  %9513 = vmatprep.subr.mxu1 %v12531_v24  ;;  %v12497_v32 = vand.u32 4294901760, %v12077_v23 }
 0x8c1   : > { %9435 = vmatpush3.msra.mxu0 %v6594_v48  ;;  %9545 = vmatprep.mubr.msk.f32.mxu1 %vm10022_vm9, %v12531_v24  ;;  %v12070_v48 = vand.u32 4294901760, %v7077_v55  ;;  %v12090_v9 = vsub.f32 %v7078_v3, %v12067_v42  ;;  %v7228_v4 = vsub.f32 %v12050_v46, %v7227_v16 }
 0x8c2   : > { %9436 = vmatprep.subr.mxu0 %v12531_v24  ;;  %9514 = vmatpush3.msra.mxu1 %v7187_v7  ;;  %v7235_v51 = vsub.f32 %v12077_v23, %v12497_v32  ;;  %v7242_v7 = vsub.f32 %v12087_v26, %v12496_v50 }
 0x8c3   : > { %9437 = vmatpush3.msra.mxu0 %v6601_v41  ;;  %9515 = vmatprep.subr.mxu1 %v12531_v24  ;;  %v7221_v41 = vsub.f32 %v12031_v39, %v7220_v2  ;;  %v12093_v63 = vsub.f32 %v7077_v55, %v12070_v48  ;;  %v7229_v18 = vand.u32 4294901760, %v7228_v4  ;;  %v12153_v55 = vand.u32 4294901760, %v7072_v8 }
 0x8c4   : > { %9438 = vmatprep.subr.mxu0 %v12531_v24  ;;  %9516 = vmatpush3.msra.mxu1 %v7194_v53  ;;  %v12131_v53 = vsub.f32 %v7075_v37, %v12111_v31  ;;  %v7236_v19 = vand.u32 4294901760, %v7235_v51  ;;  %v7243_v10 = vand.u32 4294901760, %v7242_v7  ;;  %v7264_v4 = vand.u32 4294901760, %v7263_v36 }
 0x8c5   : > { %9439 = vmatpush3.msra.mxu0 %v12535_v59  ;;  %9517 = vmatprep.subr.mxu1 %v12531_v24  ;;  %v12495_v59 = vand.u32 4294901760, %v12090_v9  ;;  %v12494_v15 = vand.u32 4294901760, %v12093_v63  ;;  %v12163_v37 = vsub.f32 %v7072_v8, %v12153_v55 }
 0x8c6   : > { %9441 = vmatmul.mubr.f32.vlgmr.msra.gmra.mxu0 %v11789_v14  ;;  %9478 = vmatprep.subr.mxu0 %v12531_v24  ;;  %v7222_v14 = vand.u32 4294901760, %v7221_v41  ;;  %v12492_v3 = vand.u32 4294901760, %v12131_v53 }
 0x8c7   : > { %9510 = vmatprep.mubr.msk.f32.mxu0 %vm10022_vm9, %v12531_v24  ;;  %9479 = vmatpush3.msra.mxu0 %v11959_v44  ;;  %v7249_v54 = vsub.f32 %v12090_v9, %v12495_v59  ;;  %v7256_v5 = vsub.f32 %v12093_v63, %v12494_v15 }
 0x8c8   : > { %9480 = vmatprep.subr.mxu0 %v12531_v24  ;;  %9518 = vmatpush3.msra.mxu1 %v7201_v22  ;;  %v12139_v22 = vsub.f32 %v7074_v56, %v12121_v49  ;;  %v7270_v56 = vsub.f32 %v12131_v53, %v12492_v3 }
 0x8c9   : > { %9481 = vmatpush3.msra.mxu0 %v11967_v40  ;;  %9519 = vmatprep.subr.mxu1 %v12531_v24  ;;  %v7250_v12 = vand.u32 4294901760, %v7249_v54 }
 0x8ca   : > { %9482 = vmatprep.subr.mxu0 %v12531_v24  ;;  %9520 = vmatpush3.msra.mxu1 %v7208_v35  ;;  %v12151_v35 = vsub.f32 %v7073_v0, %v12141_v25  ;;  %v12491_v41 = vand.u32 4294901760, %v12139_v22  ;;  %v7271_v7 = vand.u32 4294901760, %v7270_v56 }
 0x8cb   : > { %9483 = vmatpush3.msra.mxu0 %v11978_v33  ;;  %9521 = vmatprep.subr.mxu1 %v12531_v24 }
 0x8cc   : > { %9484 = vmatprep.subr.mxu0 %v12531_v24  ;;  %9522 = vmatpush3.msra.mxu1 %v7215_v34  ;;  %v7257_v34 = vand.u32 4294901760, %v7256_v5  ;;  %v7277_v0 = vsub.f32 %v12139_v22, %v12491_v41 }
 0x8cd   : > { %9485 = vmatpush3.msra.mxu0 %v11992_v58  ;;  %9523 = vmatprep.subr.mxu1 %v12531_v24 }
 0x8ce   : > { %9486 = vmatprep.subr.mxu0 %v12531_v24  ;;  %9524 = vmatpush3.msra.mxu1 %v7222_v14  ;;  %v12490_v14 = vand.u32 4294901760, %v12151_v35 }
 0x8cf   : > { %9487 = vmatpush3.msra.mxu0 %v12007_v20  ;;  %9525 = vmatprep.subr.mxu1 %v12531_v24 }
 0x8d0   : > { %9488 = vmatprep.subr.mxu0 %v12531_v24  ;;  %9526 = vmatpush3.msra.mxu1 %v7229_v18  ;;  %v12489_v18 = vand.u32 4294901760, %v12163_v37  ;;  %v7284_v54 = vsub.f32 %v12151_v35, %v12490_v14 }
 0x8d1   : > { %9489 = vmatpush3.msra.mxu0 %v12017_v11  ;;  %9527 = vmatprep.subr.mxu1 %v12531_v24 }
 0x8d2   : > { %9490 = vmatprep.subr.mxu0 %v12531_v24  ;;  %9528 = vmatpush3.msra.mxu1 %v7236_v19  ;;  %v7278_v19 = vand.u32 4294901760, %v7277_v0  ;;  %v7285_v5 = vand.u32 4294901760, %v7284_v54  ;;  %v6403_v54 = vpop.permute.xlu1 %6402 }
 0x8d3   : > { %9491 = vmatpush3.msra.mxu0 %v12033_v45  ;;  %9529 = vmatprep.subr.mxu1 %v12531_v24 }
 0x8d4   : > { %9492 = vmatprep.subr.mxu0 %v12531_v24  ;;  %9530 = vmatpush3.msra.mxu1 %v7243_v10  ;;  %v7291_v10 = vsub.f32 %v12163_v37, %v12489_v18 }
 0x8d5   : > { %9493 = vmatpush3.msra.mxu0 %v12052_v13  ;;  %9531 = vmatprep.subr.mxu1 %v12531_v24 }
 0x8d6   : > { %9494 = vmatprep.subr.mxu0 %v12531_v24  ;;  %9532 = vmatpush3.msra.mxu1 %v7250_v12  ;;  %v7292_v12 = vand.u32 4294901760, %v7291_v10 }
 0x8d7   : > { %9495 = vmatpush3.msra.mxu0 %v12065_v61  ;;  %9533 = vmatprep.subr.mxu1 %v12531_v24 }
 0x8d8   : > { %9496 = vmatprep.subr.mxu0 %v12531_v24  ;;  %9534 = vmatpush3.msra.mxu1 %v7257_v34 }
 0x8d9   : > { %9497 = vmatpush3.msra.mxu0 %v12067_v42  ;;  %9535 = vmatprep.subr.mxu1 %v12531_v24 }
 0x8da   : > { %9498 = vmatprep.subr.mxu0 %v12531_v24  ;;  %9536 = vmatpush3.msra.mxu1 %v7264_v4 }
 0x8db   : > { %9499 = vmatpush3.msra.mxu0 %v12070_v48  ;;  %9537 = vmatprep.subr.mxu1 %v12531_v24 }
 0x8dc   : > { %9500 = vmatprep.subr.mxu0 %v12531_v24  ;;  %9538 = vmatpush3.msra.mxu1 %v7271_v7 }
 0x8dd   : > { %9501 = vmatpush3.msra.mxu0 %v12080_v17  ;;  %9539 = vmatprep.subr.mxu1 %v12531_v24 }
 0x8de   : > { %9502 = vmatprep.subr.mxu0 %v12531_v24  ;;  %9540 = vmatpush3.msra.mxu1 %v7278_v19 }
 0x8df   : > { %9503 = vmatpush3.msra.mxu0 %v12111_v31  ;;  %9541 = vmatprep.subr.mxu1 %v12531_v24 }
 0x8e0   : > { %9504 = vmatprep.subr.mxu0 %v12531_v24  ;;  %9542 = vmatpush3.msra.mxu1 %v7285_v5 }
 0x8e1   : > { %9505 = vmatpush3.msra.mxu0 %v12121_v49  ;;  %9543 = vmatprep.subr.mxu1 %v12531_v24 }
 0x8e2   : > { %9506 = vmatprep.subr.mxu0 %v12531_v24  ;;  %9544 = vmatpush3.msra.mxu1 %v7292_v12 }
 0x8e3   : > { %9507 = vmatpush3.msra.mxu0 %v12141_v25  ;;  %9583 = vmatprep.subr.mxu1 %v12531_v24 }
 0x8e4   : > { %9508 = vmatprep.subr.mxu0 %v12531_v24 }
 0x8e5   : > { %9509 = vmatpush3.msra.mxu0 %v12153_v55 }
 0x8e6   : > { %9548 = vmatprep.subr.mxu0 %v12531_v24 }
 0x93c   : > { %v6647_v51 = vpop.f32.mrf.mxu1 }
 0x93e   : > { %v9337_v8 = vpop.f32.mrf.mxu1 }
 0x93f   : > { %v12536_v8 = vld [vmem:[#allocation12_spill] sm:$0xff] }
 0x940   : > { %v6408_v18 = vrot.slane %v6403_v54, %v12536_v8 }
 0x944   : > { %v6496_v36 = vpop.f32.mrf.mxu0 }
 0x945   : > { %v6497_v14 = vadd.f32 %v6496_v36, %v6408_v18 }
 0x946   : > { %v9302_v34 = vpop.f32.mrf.mxu0 }
 0x947   : > { %v6648_v10 = vadd.f32 %v6647_v51, %v6497_v14 }
 0x95c   : > { %v6840_v56 = vpop.f32.mrf.mxu1 }
 0x95e   : > { %v9407_v4 = vpop.f32.mrf.mxu1 }
 0x965   : > { %v6751_v0 = vpop.f32.mrf.mxu0 }
 0x966   : > { %v6752_v3 = vadd.f32 %v6751_v0, %v6648_v10 }
 0x967   : > { %v9372_v7 = vpop.f32.mrf.mxu0 }
 0x968   : > { %v6841_v47 = vadd.f32 %v6840_v56, %v6752_v3 }
 0x97e   : > { %v7046_v19 = vpop.f32.mrf.mxu1 }
 0x980   : > { %v9477_v41 = vpop.f32.mrf.mxu1 }
 0x986   : > { %v6959_v5 = vpop.f32.mrf.mxu0 }
 0x987   : > { %v6960_v34 = vadd.f32 %v6959_v5, %v6841_v47 }
 0x988   : > { %v9442_v15 = vpop.f32.mrf.mxu0 }
 0x989   : > { %v7047_v59 = vadd.f32 %v7046_v19, %v6960_v34 }
 0x98b   : > { %v8329_v12 = vmul.f32 -1.442695, %v7047_v59 }
 0x98d   : > { %9839 = vpow2.f32 %v8329_v12 }
 0x99a   : > { %v9840_v50 = vpop.eup %9839 }
 0x99b   : > { %v7053_v32 = vadd.f32 1.0, %v9840_v50 }
 0x99d   : > { %9841 = vrcp.f32 %v7053_v32 }
 0x9aa   : > { %v9842_v4 = vpop.eup %9841 }
 0x9ab   : > { %v7059_v7 = vrot.slane %v9842_v4, %v12536_v8 }
 0x9ad   : > { %v7060_v54 = vmul.f32 %v7059_v7, %v11782_v57  ;;  %v7061_v18 = vmul.f32 %v7059_v7, %v11785_v27 }
 0x9af   : > { %v12201_v41 = vadd.f32 %v7060_v54, %v11782_v57  ;;  %v12204_v3 = vadd.f32 %v7061_v18, %v11785_v27  ;;  %v7734_v54 = vld [vmem:[#allocation5 + $0x2] sm:$0x1] }
 0x9b1   : > { %v7064_v59 = vadd.f32 %v12204_v3, %v12201_v41 }
 0x9b3   : > { %v7065_v15 = vrot.slane %v7064_v59, 4 }
 0x9b5   : > { %v7066_v47 = vadd.f32 %v7065_v15, %v7064_v59 }
 0x9b7   : > { %v7067_v50 = vrot.slane %v7066_v47, 2 }
 0x9b9   : > { %v7068_v32 = vadd.f32 %v7067_v50, %v7066_v47 }
 0x9bb   : > { %v7069_v14 = vrot.slane %v7068_v32, 1 }
 0x9bd   : > { %v7070_v51 = vadd.f32 %v7069_v14, %v7068_v32 }
 0x9bf   : > { %v7071_v36 = vmul.f32 0.0625, %v7070_v51 }
 0x9c1   : > { %v12208_v56 = vand.u32 4294901760, %v7071_v36 }
 0x9c3   : > { %v12211_v0 = vsub.f32 %v7071_v36, %v12208_v56  ;;  %9546 = vmatmul.mubr.f32.vlgmr.msra.gmra.mxu1 %v12208_v56 }
 0x9c4   : > { %9584 = vmatpush3.msra.mxu1 %v11959_v44  ;;  %9615 = vmatprep.mubr.msk.f32.mxu1 %vm10022_vm9, %v12531_v24 }
 0x9c5   : > { %9585 = vmatprep.subr.mxu1 %v12531_v24  ;;  %v7174_v57 = vand.u32 4294901760, %v12211_v0 }
 0x9c6   : > { %9586 = vmatpush3.msra.mxu1 %v11967_v40 }
 0x9c7   : > { %9587 = vmatprep.subr.mxu1 %v12531_v24  ;;  %v7175_v27 = vsub.f32 %v12211_v0, %v7174_v57 }
 0x9c8   : > { %9588 = vmatpush3.msra.mxu1 %v11978_v33 }
 0x9c9   : > { %9589 = vmatprep.subr.mxu1 %v12531_v24  ;;  %v7176_v19 = vand.u32 4294901760, %v7175_v27 }
 0x9ca   : > { %9590 = vmatpush3.msra.mxu1 %v11992_v58 }
 0x9cb   : > { %9591 = vmatprep.subr.mxu1 %v12531_v24  ;;  %9511 = vmatmul.mubr.f32.vlgmr.msra.gmra.mxu0 %v7176_v19 }
 0x9cc   : > { %9549 = vmatpush3.msra.mxu0 %v11965_v60  ;;  %9592 = vmatpush3.msra.mxu1 %v12007_v20  ;;  %v12538_v60 = vand.u32 4294901760, %v12087_v26 }
 0x9cd   : > { %9550 = vmatprep.subr.mxu0 %v12531_v24  ;;  %9593 = vmatprep.subr.mxu1 %v12531_v24 }
 0x9ce   : > { %9551 = vmatpush3.msra.mxu0 %v11976_v52  ;;  %9594 = vmatpush3.msra.mxu1 %v12017_v11  ;;  %v12541_v52 = vand.u32 4294901760, %v12104_v28 }
 0x9cf   : > { %9552 = vmatprep.subr.mxu0 %v12531_v24  ;;  %9595 = vmatprep.subr.mxu1 %v12531_v24 }
 0x9d0   : > { %9553 = vmatpush3.msra.mxu0 %v11990_v6  ;;  %9596 = vmatpush3.msra.mxu1 %v12033_v45  ;;  %v12544_v6 = vand.u32 4294901760, %v12151_v35 }
 0x9d1   : > { %9554 = vmatprep.subr.mxu0 %v12531_v24  ;;  %9597 = vmatprep.subr.mxu1 %v12531_v24 }
 0x9d2   : > { %9555 = vmatpush3.msra.mxu0 %v12004_v21  ;;  %9598 = vmatpush3.msra.mxu1 %v12052_v13 }
 0x9d3   : > { %9556 = vmatprep.subr.mxu0 %v12531_v24  ;;  %9599 = vmatprep.subr.mxu1 %v12531_v24 }
 0x9d4   : > { %9557 = vmatpush3.msra.mxu0 %v12021_v29  ;;  %9600 = vmatpush3.msra.mxu1 %v12065_v61 }
 0x9d5   : > { %9558 = vmatprep.subr.mxu0 %v12531_v24  ;;  %9601 = vmatprep.subr.mxu1 %v12531_v24 }
 0x9d6   : > { %9559 = vmatpush3.msra.mxu0 %v12031_v39  ;;  %9602 = vmatpush3.msra.mxu1 %v12067_v42 }
 0x9d7   : > { %9560 = vmatprep.subr.mxu0 %v12531_v24  ;;  %9603 = vmatprep.subr.mxu1 %v12531_v24 }
 0x9d8   : > { %9561 = vmatpush3.msra.mxu0 %v12050_v46  ;;  %9604 = vmatpush3.msra.mxu1 %v12070_v48 }
 0x9d9   : > { %9562 = vmatprep.subr.mxu0 %v12531_v24  ;;  %9605 = vmatprep.subr.mxu1 %v12531_v24 }
 0x9da   : > { %9563 = vmatpush3.msra.mxu0 %v12077_v23  ;;  %9606 = vmatpush3.msra.mxu1 %v12080_v17 }
 0x9db   : > { %9564 = vmatprep.subr.mxu0 %v12531_v24  ;;  %9607 = vmatprep.subr.mxu1 %v12531_v24 }
 0x9dc   : > { %9565 = vmatpush3.msra.mxu0 %v12087_v26  ;;  %9608 = vmatpush3.msra.mxu1 %v12111_v31 }
 0x9dd   : > { %9566 = vmatprep.subr.mxu0 %v12531_v24  ;;  %9609 = vmatprep.subr.mxu1 %v12531_v24 }
 0x9de   : > { %9567 = vmatpush3.msra.mxu0 %v12090_v9  ;;  %9610 = vmatpush3.msra.mxu1 %v12121_v49 }
 0x9df   : > { %9568 = vmatprep.subr.mxu0 %v12531_v24  ;;  %9611 = vmatprep.subr.mxu1 %v12531_v24 }
 0x9e0   : > { %9569 = vmatpush3.msra.mxu0 %v12093_v63  ;;  %9612 = vmatpush3.msra.mxu1 %v12141_v25 }
 0x9e1   : > { %9570 = vmatprep.subr.mxu0 %v12531_v24  ;;  %9613 = vmatprep.subr.mxu1 %v12531_v24 }
 0x9e2   : > { %9571 = vmatpush3.msra.mxu0 %v12104_v28  ;;  %9614 = vmatpush3.msra.mxu1 %v12153_v55 }
 0x9e3   : > { %9572 = vmatprep.subr.mxu0 %v12531_v24  ;;  %9616 = vmatmul.mubr.f32.vlgmr.msra.gmra.mxu1 %v7174_v57 }
 0x9e4   : > { %9653 = vmatprep.subr.mxu1 %v12531_v24  ;;  %9573 = vmatpush3.msra.mxu0 %v12131_v53 }
 0x9e5   : > { %9654 = vmatpush3.msra.mxu1 %v11959_v44  ;;  %9574 = vmatprep.subr.mxu0 %v12531_v24  ;;  %v12537_v44 = vand.u32 4294901760, %v12077_v23 }
 0x9e6   : > { %9655 = vmatprep.subr.mxu1 %v12531_v24  ;;  %9575 = vmatpush3.msra.mxu0 %v12139_v22 }
 0x9e7   : > { %9656 = vmatpush3.msra.mxu1 %v11967_v40  ;;  %9576 = vmatprep.subr.mxu0 %v12531_v24  ;;  %v12539_v40 = vand.u32 4294901760, %v12090_v9 }
 0x9e8   : > { %9657 = vmatprep.subr.mxu1 %v12531_v24  ;;  %9577 = vmatpush3.msra.mxu0 %v12151_v35 }
 0x9e9   : > { %9658 = vmatpush3.msra.mxu1 %v11978_v33  ;;  %9578 = vmatprep.subr.mxu0 %v12531_v24  ;;  %v12542_v33 = vand.u32 4294901760, %v12131_v53 }
 0x9ea   : > { %9659 = vmatprep.subr.mxu1 %v12531_v24  ;;  %9579 = vmatpush3.msra.mxu0 %v12163_v37 }
 0x9eb   : > { %9580 = vmatprep.mubr.msk.f32.mxu0 %vm10022_vm9, %v12531_v24  ;;  %9660 = vmatpush3.msra.mxu1 %v11992_v58  ;;  %v12545_v58 = vand.u32 4294901760, %v12163_v37 }
 0x9ec   : > { %9581 = vmatmul.mubr.f32.vlgmr.msra.gmra.mxu0 %v12211_v0  ;;  %9618 = vmatprep.subr.mxu0 %v12531_v24 }
 0x9ed   : > { %9661 = vmatprep.subr.mxu1 %v12531_v24  ;;  %9619 = vmatpush3.msra.mxu0 %v7185_v38  ;;  %v12540_v38 = vand.u32 4294901760, %v12093_v63 }
 0x9ee   : > { %9662 = vmatpush3.msra.mxu1 %v12007_v20  ;;  %9620 = vmatprep.subr.mxu0 %v12531_v24 }
 0x9ef   : > { %9663 = vmatprep.subr.mxu1 %v12531_v24  ;;  %9621 = vmatpush3.msra.mxu0 %v7192_v30  ;;  %v12543_v30 = vand.u32 4294901760, %v12139_v22 }
 0x9f0   : > { %9664 = vmatpush3.msra.mxu1 %v12017_v11  ;;  %9622 = vmatprep.subr.mxu0 %v12531_v24 }
 0x9f1   : > { %9665 = vmatprep.subr.mxu1 %v12531_v24  ;;  %9623 = vmatpush3.msra.mxu0 %v7199_v62  ;;  %v7733_v62 = vld [vmem:[%s12452_s8] sm:$0xff] }
 0x9f2   : > { %9666 = vmatpush3.msra.mxu1 %v12033_v45  ;;  %9624 = vmatprep.subr.mxu0 %v12531_v24  ;;  %v7770_v21 = vand.u32 4294901760, %v7733_v62 }
 0x9f3   : > { %9667 = vmatprep.subr.mxu1 %v12531_v24  ;;  %9625 = vmatpush3.msra.mxu0 %v7206_v43 }
 0x9f4   : > { %9668 = vmatpush3.msra.mxu1 %v12052_v13  ;;  %9626 = vmatprep.subr.mxu0 %v12531_v24  ;;  %v7847_v20 = vsub.f32 %v7733_v62, %v7770_v21 }
 0x9f5   : > { %9669 = vmatprep.subr.mxu1 %v12531_v24  ;;  %9627 = vmatpush3.msra.mxu0 %v7213_v1 }
 0x9f6   : > { %9670 = vmatpush3.msra.mxu1 %v12065_v61  ;;  %9628 = vmatprep.subr.mxu0 %v12531_v24  ;;  %v7848_v43 = vand.u32 4294901760, %v7847_v20 }
 0x9f7   : > { %9671 = vmatprep.subr.mxu1 %v12531_v24  ;;  %9629 = vmatpush3.msra.mxu0 %v7220_v2 }
 0x9f8   : > { %9672 = vmatpush3.msra.mxu1 %v12067_v42  ;;  %9630 = vmatprep.subr.mxu0 %v12531_v24  ;;  %v7849_v11 = vsub.f32 %v7847_v20, %v7848_v43 }
 0x9f9   : > { %9673 = vmatprep.subr.mxu1 %v12531_v24  ;;  %9631 = vmatpush3.msra.mxu0 %v7227_v16 }
 0x9fa   : > { %9674 = vmatpush3.msra.mxu1 %v12070_v48  ;;  %9632 = vmatprep.subr.mxu0 %v12531_v24  ;;  %v7850_v29 = vand.u32 4294901760, %v7849_v11  ;;  %v7089_v48 = vpop.permute.xlu0 %7088 }
 0x9fb   : > { %9675 = vmatprep.subr.mxu1 %v12531_v24  ;;  %9633 = vmatpush3.msra.mxu0 %v12537_v44 }
 0x9fc   : > { %9676 = vmatpush3.msra.mxu1 %v12080_v17  ;;  %9634 = vmatprep.subr.mxu0 %v12531_v24 }
 0x9fd   : > { %9677 = vmatprep.subr.mxu1 %v12531_v24  ;;  %9635 = vmatpush3.msra.mxu0 %v12538_v60 }
 0x9fe   : > { %9678 = vmatpush3.msra.mxu1 %v12111_v31  ;;  %9636 = vmatprep.subr.mxu0 %v12531_v24 }
 0x9ff   : > { %9679 = vmatprep.subr.mxu1 %v12531_v24  ;;  %9637 = vmatpush3.msra.mxu0 %v12539_v40 }
 0xa00   : > { %9680 = vmatpush3.msra.mxu1 %v12121_v49  ;;  %9638 = vmatprep.subr.mxu0 %v12531_v24 }
 0xa01   : > { %9681 = vmatprep.subr.mxu1 %v12531_v24  ;;  %9639 = vmatpush3.msra.mxu0 %v12540_v38 }
 0xa02   : > { %9682 = vmatpush3.msra.mxu1 %v12141_v25  ;;  %9640 = vmatprep.subr.mxu0 %v12531_v24 }
 0xa03   : > { %9683 = vmatprep.subr.mxu1 %v12531_v24  ;;  %9641 = vmatpush3.msra.mxu0 %v12541_v52 }
 0xa04   : > { %9684 = vmatpush3.msra.mxu1 %v12153_v55  ;;  %9685 = vmatprep.mubr.msk.f32.mxu1 %vm10022_vm9, %v12531_v24 }
 0xa05   : > { %9642 = vmatprep.subr.mxu0 %v12531_v24  ;;  %9686 = vmatmul.mubr.f32.vlgmr.msra.gmra.mxu1 %v12208_v56 }
 0xa06   : > { %9643 = vmatpush3.msra.mxu0 %v12542_v33  ;;  %9650 = vmatprep.mubr.msk.f32.mxu0 %vm10022_vm9, %v12531_v24 }
 0xa07   : > { %9644 = vmatprep.subr.mxu0 %v12531_v24  ;;  %9693 = vmatprep.subr.mxu1 %v12531_v24 }
 0xa08   : > { %9645 = vmatpush3.msra.mxu0 %v12543_v30  ;;  %9695 = vmatprep.mubr.msk.f32.mxu1 %vm10022_vm9, %v12531_v24 }
 0xa09   : > { %9646 = vmatprep.subr.mxu0 %v12531_v24  ;;  %9694 = vmatpush3.msra.mxu1 %v7850_v29 }
 0xa0a   : > { %9647 = vmatpush3.msra.mxu0 %v12544_v6  ;;  %9703 = vmatprep.subr.mxu1 %v12531_v24 }
 0xa0b   : > { %9648 = vmatprep.subr.mxu0 %v12531_v24 }
 0xa0c   : > { %9649 = vmatpush3.msra.mxu0 %v12545_v58 }
 0xa0d   : > { %9651 = vmatmul.mubr.f32.vlgmr.msra.gmra.mxu0 %v12208_v56  ;;  %9688 = vmatprep.subr.mxu0 %v12531_v24 }
 0xa0e   : > { %9690 = vmatprep.mubr.msk.f32.mxu0 %vm10022_vm9, %v12531_v24  ;;  %9689 = vmatpush3.msra.mxu0 %v7770_v21 }
 0xa0f   : > { %9698 = vmatprep.subr.mxu0 %v12531_v24 }
 0xa83   : > { %v7329_v39 = vpop.f32.mrf.mxu1 }
 0xa85   : > { %v9547_v45 = vpop.f32.mrf.mxu1 }
 0xa8b   : > { %v7178_v1 = vpop.f32.mrf.mxu0 }
 0xa8c   : > { %v7179_v16 = vadd.f32 %v7178_v1, %v7089_v48 }
 0xa8d   : > { %v9512_v2 = vpop.f32.mrf.mxu0 }
 0xa8e   : > { %v7330_v17 = vadd.f32 %v7329_v39, %v7179_v16 }
 0xaa3   : > { %v7522_v46 = vpop.f32.mrf.mxu1 }
 0xaa5   : > { %v9617_v13 = vpop.f32.mrf.mxu1 }
 0xaac   : > { %v7433_v61 = vpop.f32.mrf.mxu0 }
 0xaad   : > { %v7434_v9 = vadd.f32 %v7433_v61, %v7330_v17 }
 0xaae   : > { %v9582_v42 = vpop.f32.mrf.mxu0 }
 0xaaf   : > { %v7523_v63 = vadd.f32 %v7522_v46, %v7434_v9 }
 0xac5   : > { %v7728_v23 = vpop.f32.mrf.mxu1 }
 0xac7   : > { %v9687_v26 = vpop.f32.mrf.mxu1 }
 0xacd   : > { %v7641_v28 = vpop.f32.mrf.mxu0 }
 0xace   : > { %v7642_v31 = vadd.f32 %v7641_v28, %v7523_v63 }
 0xacf   : > { %v9652_v49 = vpop.f32.mrf.mxu0 }
 0xad0   : > { %v7729_v53 = vadd.f32 %v7728_v23, %v7642_v31 }
 0xad2   : > { %v7732_v22 = vmax.f32 %v7729_v53, 0.0 }
 0xad4   : > { %v7737_v25 = vsel %vm7735_vm10, %v7732_v22, 0 }
 0xad5   : > { %v7805_v35 = vand.u32 4294901760, %v7737_v25 }
 0xad7   : > { %v7806_v55 = vsub.f32 %v7737_v25, %v7805_v35  ;;  %9696 = vmatmul.mubr.f32.vlgmr.msra.gmra.mxu1 %v7805_v35 }
 0xad8   : > { %9704 = vmatpush3.msra.mxu1 %v7770_v21  ;;  %9705 = vmatprep.mubr.msk.f32.mxu1 %vm10022_vm9, %v12531_v24 }
 0xad9   : > { %v7807_v37 = vand.u32 4294901760, %v7806_v55  ;;  %9713 = vmatprep.subr.mxu1 %v12531_v24 }
 0xadb   : > { %9706 = vmatmul.mubr.f32.vlgmr.msra.gmra.mxu1 %v7807_v37  ;;  %v7808_v10 = vsub.f32 %v7806_v55, %v7807_v37 }
 0xadc   : > { %9714 = vmatpush3.msra.mxu1 %v7770_v21  ;;  %9715 = vmatprep.mubr.msk.f32.mxu1 %vm10022_vm9, %v12531_v24 }
 0xadd   : > { %v7809_v5 = vand.u32 4294901760, %v7808_v10 }
 0xadf   : > { %9691 = vmatmul.mubr.f32.vlgmr.msra.gmra.mxu0 %v7809_v5  ;;  %9716 = vmatmul.mubr.f32.vlgmr.msra.gmra.mxu1 %v7805_v35 }
 0xae0   : > { %9699 = vmatpush3.msra.mxu0 %v7847_v20  ;;  %9700 = vmatprep.mubr.msk.f32.mxu0 %vm10022_vm9, %v12531_v24 }
 0xae1   : > { %9708 = vmatprep.subr.mxu0 %v12531_v24 }
 0xae3   : > { %9701 = vmatmul.mubr.f32.vlgmr.msra.gmra.mxu0 %v7806_v55 }
 0xae4   : > { %9709 = vmatpush3.msra.mxu0 %v7848_v43  ;;  %9710 = vmatprep.mubr.msk.f32.mxu0 %vm10022_vm9, %v12531_v24 }
 0xae7   : > { %9711 = vmatmul.mubr.f32.vlgmr.msra.gmra.mxu0 %v7805_v35 }
 0xb97   : > { %v7887_v34 = vpop.f32.mrf.mxu1 }
 0xb99   : > { %v9697_v12 = vpop.f32.mrf.mxu1 }
 0xb9b   : > { %v8035_v4 = vpop.f32.mrf.mxu1 }
 0xb9d   : > { %v9707_v7 = vpop.f32.mrf.mxu1 }
 0xb9f   : > { %v7811_v18 = vpop.f32.mrf.mxu0  ;;  %v8181_v59 = vpop.f32.mrf.mxu1 }
 0xba0   : > { %v7812_v15 = vadd.f32 %v7811_v18, %v7734_v54 }
 0xba1   : > { %v9692_v47 = vpop.f32.mrf.mxu0  ;;  %v9717_v50 = vpop.f32.mrf.mxu1 }
 0xba2   : > { %v7888_v32 = vadd.f32 %v7887_v34, %v7812_v15 }
 0xba3   : > { %v7961_v14 = vpop.f32.mrf.mxu0 }
 0xba4   : > { %v7962_v51 = vadd.f32 %v7961_v14, %v7888_v32 }
 0xba5   : > { %v9702_v36 = vpop.f32.mrf.mxu0 }
 0xba6   : > { %v8036_v56 = vadd.f32 %v8035_v4, %v7962_v51 }
 0xba7   : > { %v8109_v0 = vpop.f32.mrf.mxu0 }
 0xba8   : > { %v8110_v24 = vadd.f32 %v8109_v0, %v8036_v56 }
 0xba9   : > { %v9712_v57 = vpop.f32.mrf.mxu0 }
 0xbaa   : > { %v8182_v27 = vadd.f32 %v8181_v59, %v8110_v24 }
 0xbac   : > { %v8330_v19 = vmul.f32 -1.442695, %v8182_v27 }
 0xbae   : > { %9843 = vpow2.f32 %v8330_v19 }
 0xbbb   : > { %v9844_v44 = vpop.eup %9843 }
 0xbbc   : > { %v8188_v60 = vadd.f32 1.0, %v9844_v44 }
 0xbbe   : > { %9845 = vrcp.f32 %v8188_v60 }
 0xbcb   : > { %v9846_v40 = vpop.eup %9845 }
 0xbcc   : > { %v8194_v38 = vrot.slane %v9846_v40, %v12536_v8 }
 0xbce   : > { %v8195_v52 = vmul.f32 %v8194_v38, %v12201_v41  ;;  %v8196_v33 = vmul.f32 %v8194_v38, %v12204_v3 }
 0xbd0   : > { %v8197_v30 = vadd.f32 %v8195_v52, %v12201_v41  ;;  %v8198_v8 = vadd.f32 %v8196_v33, %v12204_v3 }
 0xbd2   : > { %8199 = vst [vmem:[%s392_s29] sm:$0xff] %v8197_v30  ;;  %8200 = vst [vmem:[%s392_s29 + $0x8] sm:$0xff] %v8198_v8 }
 0xbd3   : > { %9940 = shalt.err (!%p9937_p10)
}
 0xbd4   : > { %s9941_s26 = scalar_lea.hbm %s12398_s18, 256  ;;  %s9945_s12 = scalar_lea.hbm %s12454_s10, 512 }
 0xbd5   : > { %p9942_p7 = scmp.ne.s32.totalorder %s12398_s18, %s9941_s26  ;;  %p9946_p11 = scmp.lt.s32.totalorder %s12398_s18, %s12454_s10 }
 0xbd6   : > { %p9947_p0 = scmp.lt.s32.totalorder %s9945_s12, %s9941_s26 }
 0xbd7   : > { %p9943_p13 = pnand %p9942_p7, %p12546_p2 }
 0xbd8   : > { %p9948_p1 = por %p9947_p0, %p9946_p11 }
 0xbd9   : > { %p9944_p8 = pneg %p9943_p13 }
 0xbdb   : > { %p9949_p12 = pnand %p9948_p1, %p9944_p8 }
 0xbdd   : > { %9952 = shalt.err (!%p9949_p12)
}
 0xbde   : > { %s10025_s27 = smov 128   ;;  %s10026_s21 = smov 8  }
 0xbdf   : > { %9730 = dma.vmem_to_hbm [thread:$0]  (%p12546_p2), %s12400_s30, 256, %s12398_s18, %s12404_s17, %s10025_s27, %s10025_s27, %s10026_s21  }
 0xbe0 PF: > { %p9752_p9 = scmp.ge.s32.totalorder %s9995_s16, 2  ;;  %s8230_s28 = sand.u32 1, %s9983_s13  }
 0xbe1   : > { %p12547_p3 = scmp.ne.s32.totalorder %s12499_s24, 0  ;;  %s8231_s26 = scalar_lea.sflag [#allocation4], %s8230_s28 }
 0xbe3   : > { %p9743_p4 = pnand %p9752_p9, %p12547_p3 }
 0xbe5   : > { %p9744_p5 = pneg %p9743_p4 }
 0xbe7   : > { %9978 = dma.done.wait (%p9744_p5), %s8231_s26, 256  }
 0xbe8   : > { %9980 = vsyncadd (%p9744_p5), %s8231_s26, 4294967040  ;;  %p22_p6 = scmp.ge.s32.totalorder %s10107_s19, 4   ;;  %s12548_s13 = smov %s9987_s14 }
 0xbe9   : > { %s12549_s14 = smov %s9991_s15  ;;  %s12550_s15 = smov %s10118_s22 }
 0xbea   : > { %s12551_s16 = smov %s10107_s19  ;;  %24 = sbr.rel (!%p22_p6) target bundleno = 5 (0x5), region = 110 }
 0xbef   :  { %8236 = vsyncpa [#allocation3], 1 }
 0xbf0   :  { %8238 = vsyncpa [#allocation3 + $0x1], 1 }
 0xbf1   :  { %8239 = vsyncpa [#allocation6], 1 }
 0xbf2   :  { %8240 = vsyncpa [#allocation4], 1 }
 0xbf3   :  { %8242 = vsyncpa [#allocation4 + $0x1], 1 }

</bundles_post_ra>
